<compile_context>
chip_gen: v6e
topology: v6e:2x2x1
jax: 0.10.0
libtpu: 0.0.40
codegen_flags: <defaults>
</compile_context>

<pallas_src>
import functools
import math

import jax
import jax.numpy as jnp
from jax.experimental import pallas as pl
from jax.experimental.pallas import tpu as pltpu

# ----------------------------- config (small, synthetic) -----------------------------
IMG_C, IMG_H, IMG_W = 3, 32, 32
PATCH = 8                      # stand-in backbone downsampling
ENC_DIM = 16                   # stand-in for ResNet50's 2048-ch last stage
DEC_DIM = 32
DEC_DEPTH = 2
DEC_HEADS = 4
VOCAB = 50
VPAD = 128                     # vocab padded to a lane-dense 128
MAX_SEQ = 8
PAD_ID = 0
CPP = IMG_C * PATCH * PATCH    # flattened patch size


# ----------------------------- fused Pallas kernel -----------------------------
def _ocr_fused_kernel(patches_ref, h0_ref, onehot_ref, cos_ref, sin_ref,
                      sbias_ref, cbias_ref, enc_w_ref, enc_b_ref,
                      wqkv_ref, wo_ref, cwq_ref, cwkv_ref, cwo_ref,
                      lng_ref, lnb_ref, ffw1_ref, ffb1_ref, ffw2_ref, ffb2_ref,
                      fing_ref, finb_ref, logw_ref, logb_ref,
                      loss_ref, attn_sc, *, depth, heads, dh):
    f32 = jnp.float32
    bf16 = jnp.bfloat16
    inv_sqrt2 = 1.0 / math.sqrt(2.0)

    def layer_norm(x, g, b):
        mu = jnp.mean(x, axis=-1, keepdims=True)
        var = jnp.mean((x - mu) * (x - mu), axis=-1, keepdims=True)
        return (x - mu) * jax.lax.rsqrt(var + 1e-5) * g + b

    def gelu(x):  # exact (erf) GELU, matching torch.nn.GELU default
        return 0.5 * x * (1.0 + jax.lax.erf(x * inv_sqrt2))

    def softmax(s):
        s = s - jnp.max(s, axis=-1, keepdims=True)
        p = jnp.exp(s)
        return p * pl.reciprocal(jnp.sum(p, axis=-1, keepdims=True), approx=True)

    # ---- vision path: (patch-embed ∘ StdConv2dSame 1x1 ∘ BatchNorm) folded matmul + GELU ----
    ctx = gelu(jnp.dot(patches_ref[0], enc_w_ref[...], preferred_element_type=f32)
               + enc_b_ref[...])                                          # (GB*HW, D) f32
    ctx_b = ctx.astype(bf16)

    h = h0_ref[0]                                                         # (Tf, D) f32
    cos_h = cos_ref[...]                                                  # (Tf, D/2)
    sin_h = sin_ref[...]                                                  # (Tf, D/2)
    sbias = sbias_ref[...]                                                # (Tf, Tf) hoisted causal/block mask
    cbias = cbias_ref[...]                                                # (Tf, GB*HW) hoisted cross mask

    Tf, D = h.shape
    half = D // 2
    dh2 = dh // 2
    dn = (((1,), (1,)), ((), ()))     # contract last dim of both operands (q @ k^T)

    for layer in range(depth):
        g3 = lng_ref[layer]                                               # (3, D)
        b3 = lnb_ref[layer]

        # ---- pre-LN causal self-attention with rotary, fused QKV ----
        xn = layer_norm(h, g3[0:1, :], b3[0:1, :])
        qkv = jnp.dot(xn.astype(bf16), wqkv_ref[layer], preferred_element_type=f32)   # (Tf, 3D)
        # Wq/Wk columns are pre-permuted to grouped-half layout; Wv stays head-major.
        qA, qB = qkv[:, :half], qkv[:, half:D]
        kA, kB = qkv[:, D:D + half], qkv[:, D + half:2 * D]
        v = qkv[:, 2 * D:].astype(bf16)
        # rotary = complex rotation on (first-half, second-half) pair; scale folded into Wq.
        qrA = (qA * cos_h - qB * sin_h).astype(bf16)
        qrB = (qB * cos_h + qA * sin_h).astype(bf16)
        krA = (kA * cos_h - kB * sin_h).astype(bf16)
        krB = (kB * cos_h + kA * sin_h).astype(bf16)
        for hd in range(heads):
            slh = slice(hd * dh2, (hd + 1) * dh2)          # this head's half-slab columns
            s = (jax.lax.dot_general(qrA[:, slh], krA[:, slh], dn, preferred_element_type=f32)
                 + jax.lax.dot_general(qrB[:, slh], krB[:, slh], dn, preferred_element_type=f32)
                 + sbias)
            p = softmax(s).astype(bf16)
            attn_sc[:, hd * dh:(hd + 1) * dh] = jnp.dot(
                p, v[:, hd * dh:(hd + 1) * dh], preferred_element_type=f32)
        h = h + jnp.dot(attn_sc[...].astype(bf16), wo_ref[layer], preferred_element_type=f32)

        # ---- pre-LN cross-attention to image context, fused KV ----
        xn = layer_norm(h, g3[1:2, :], b3[1:2, :])
        qc = jnp.dot(xn.astype(bf16), cwq_ref[layer], preferred_element_type=f32).astype(bf16)
        kv = jnp.dot(ctx_b, cwkv_ref[layer], preferred_element_type=f32)   # (GB*HW, 2D)
        kc = kv[:, :D].astype(bf16)
        vc = kv[:, D:].astype(bf16)
        for hd in range(heads):
            sl = slice(hd * dh, (hd + 1) * dh)
            s = jax.lax.dot_general(qc[:, sl], kc[:, sl], dn, preferred_element_type=f32) + cbias
            p = softmax(s).astype(bf16)
            attn_sc[:, sl] = jnp.dot(p, vc[:, sl], preferred_element_type=f32)
        h = h + jnp.dot(attn_sc[...].astype(bf16), cwo_ref[layer], preferred_element_type=f32)

        # ---- pre-LN GELU feed-forward ----
        xn = layer_norm(h, g3[2:3, :], b3[2:3, :])
        ff = gelu(jnp.dot(xn.astype(bf16), ffw1_ref[layer], preferred_element_type=f32)
                  + ffb1_ref[layer])
        h = h + jnp.dot(ff.astype(bf16), ffw2_ref[layer], preferred_element_type=f32) + ffb2_ref[layer]

    # ---- final LayerNorm + lane-padded logit head + log-softmax + masked NLL ----
    hf = layer_norm(h, fing_ref[...], finb_ref[...])
    logits = jnp.dot(hf.astype(bf16), logw_ref[...], preferred_element_type=f32) + logb_ref[...]
    z = logits - jnp.max(logits, axis=-1, keepdims=True)
    logp = z - jnp.log(jnp.sum(jnp.exp(z), axis=-1, keepdims=True))
    # one-hot targets have pad rows (and the T-padding row) zeroed; padded vocab cols never hit
    nll = -jnp.sum(onehot_ref[0] * logp)
    loss_ref[...] = nll * jnp.ones((1, 1, logits.shape[-1]), f32)


# ----------------------------- parameters -----------------------------
def init_params(key):
    ks = iter(jax.random.split(key, 64 + DEC_DEPTH * 32))
    nrm = lambda shape, s=0.02: s * jax.random.normal(next(ks), shape, jnp.float32)
    p = {
        # stand-in vision backbone (patch-embed conv)
        "patch_w": nrm((CPP, ENC_DIM)),
        "patch_b": jnp.zeros((ENC_DIM,), jnp.float32),
        # feature_processor: StdConv2dSame(enc->dec, 1x1, bias=False), BatchNorm2d(dec)
        "feat_w": nrm((DEC_DIM, ENC_DIM), 0.1),        # (out, in) like PyTorch conv weight
        "bn_g": jnp.ones((DEC_DIM,), jnp.float32),
        "bn_b": jnp.zeros((DEC_DIM,), jnp.float32),
        "bn_mean": jnp.zeros((DEC_DIM,), jnp.float32),
        "bn_var": jnp.ones((DEC_DIM,), jnp.float32),
        # TransformerWrapper
        "tok_emb": nrm((VOCAB, DEC_DIM)),
        "final_ln_g": jnp.ones((DEC_DIM,), jnp.float32),
        "final_ln_b": jnp.zeros((DEC_DIM,), jnp.float32),
        "logit_w": nrm((DEC_DIM, VOCAB)),
        "logit_b": jnp.zeros((VOCAB,), jnp.float32),
        "layers": [],
    }
    for _ in range(DEC_DEPTH):
        layer = {
            "ln1_g": jnp.ones((DEC_DIM,), jnp.float32), "ln1_b": jnp.zeros((DEC_DIM,), jnp.float32),
            "Wq": nrm((DEC_DIM, DEC_DIM)), "Wk": nrm((DEC_DIM, DEC_DIM)),
            "Wv": nrm((DEC_DIM, DEC_DIM)), "Wo": nrm((DEC_DIM, DEC_DIM)),
            "ln2_g": jnp.ones((DEC_DIM,), jnp.float32), "ln2_b": jnp.zeros((DEC_DIM,), jnp.float32),
            "cWq": nrm((DEC_DIM, DEC_DIM)), "cWk": nrm((DEC_DIM, DEC_DIM)),
            "cWv": nrm((DEC_DIM, DEC_DIM)), "cWo": nrm((DEC_DIM, DEC_DIM)),
            "ln3_g": jnp.ones((DEC_DIM,), jnp.float32), "ln3_b": jnp.zeros((DEC_DIM,), jnp.float32),
            "ff_w1": nrm((DEC_DIM, 4 * DEC_DIM)), "ff_b1": jnp.zeros((4 * DEC_DIM,), jnp.float32),
            "ff_w2": nrm((4 * DEC_DIM, DEC_DIM)), "ff_b2": jnp.zeros((DEC_DIM,), jnp.float32),
        }
        p["layers"].append(layer)
    return p


# ----------------------------- forward wrapper -----------------------------
def _num_grid_groups(batch):
    """v7x has 2 TensorCores per chip -> 2-wide parallel grid; v5e/v6e (1 TC) -> flatten batch."""
    try:
        kind = jax.devices()[0].device_kind.lower()
    except Exception:
        kind = ""
    cores = 2 if "v7" in kind else 1
    return max(1, math.gcd(batch, cores))


def ocr_forward(params, img, tgt):
    """img: (B, 3, H, W) NCHW float32; tgt: (B, T) int32.  Returns scalar CE loss."""
    f32, bf16 = jnp.float32, jnp.bfloat16
    B, C, H, W = img.shape
    Hp, Wp = H // PATCH, W // PATCH
    HW = Hp * Wp
    D = DEC_DIM
    dh = D // DEC_HEADS
    dh2 = dh // 2
    scale = 1.0 / math.sqrt(dh)

    groups = _num_grid_groups(B)          # grid steps (v7x: 2 TCs; v5e/v6e: 1 -> whole batch fused)
    gb = B // groups                      # batch elements flattened into one grid step

    # ---- patch extraction (pure layout, stays in XLA) ----
    patches = img.reshape(B, C, Hp, PATCH, Wp, PATCH).transpose(0, 2, 4, 1, 3, 5)
    patches = patches.reshape(groups, gb * HW, CPP).astype(bf16)

    # feature_processor weight folding: StdConv2dSame(1x1, weight-standardized) + BN (eval)
    w = params["feat_w"]                                                  # (DEC, ENC)
    w_std = (w - jnp.mean(w, axis=1, keepdims=True)) / jnp.sqrt(jnp.var(w, axis=1, keepdims=True) + 1e-6)
    inv = 1.0 / jnp.sqrt(params["bn_var"] + 1e-5)
    bn_scale = params["bn_g"] * inv
    bn_shift = params["bn_b"] - params["bn_mean"] * bn_scale
    enc_w = ((params["patch_w"] @ w_std.T) * bn_scale[None, :]).astype(bf16)        # (CPP, D)
    enc_b = ((params["patch_b"] @ w_std.T) * bn_scale + bn_shift)[None, :].astype(f32)

    # ---- AutoregressiveWrapper: shifted teacher forcing; pad T 7 -> 8 (sublane-aligned) ----
    inp, target = tgt[:, :-1], tgt[:, 1:]
    Tp = inp.shape[1] + 1
    inp_p = jnp.pad(inp, ((0, 0), (0, 1)), constant_values=PAD_ID)
    target_p = jnp.pad(target, ((0, 0), (0, 1)), constant_values=PAD_ID)
    mask = (target_p != PAD_ID)                                          # padded position masked out
    onehot = jax.nn.one_hot(target_p, VPAD, dtype=f32) * mask[..., None].astype(f32)
    onehot = onehot.reshape(groups, gb * Tp, VPAD)

    # token embedding gather (tiny, XLA); rotary => no absolute pos emb; dropout off (eval)
    h0 = params["tok_emb"][inp_p].astype(f32).reshape(groups, gb * Tp, D)

    # rotary half-tables (complex form), tiled across heads and per-group batch elements
    inv_freq = 1.0 / (10000.0 ** (jnp.arange(0, dh, 2, dtype=f32) / dh))
    freqs = jnp.arange(Tp, dtype=f32)[:, None] * inv_freq[None, :]        # (Tp, dh/2)
    cos_h = jnp.tile(jnp.cos(freqs), (gb, DEC_HEADS))                     # (gb*Tp, D/2)
    sin_h = jnp.tile(jnp.sin(freqs), (gb, DEC_HEADS))

    # ---- hoisted attention biases (block-diagonal causal + per-batch cross mask) ----
    Tf = gb * Tp
    tok_b = jnp.repeat(jnp.arange(gb), Tp)
    tok_p = jnp.tile(jnp.arange(Tp), gb)
    same_b = tok_b[:, None] == tok_b[None, :]
    causal = tok_p[None, :] <= tok_p[:, None]
    self_bias = jnp.where(same_b & causal, 0.0, -1e30).astype(f32)        # (Tf, Tf)
    ctx_batch = jnp.repeat(jnp.arange(gb), HW)
    cross_bias = jnp.where(tok_b[:, None] == ctx_batch[None, :], 0.0, -1e30).astype(f32)  # (Tf, gb*HW)

    # ---- stack per-layer weights: fused QKV / KV, grouped-half Q/K columns, scale folded ----
    idx_head = jnp.arange(DEC_HEADS) * dh
    first = (idx_head[:, None] + jnp.arange(dh2)[None, :]).reshape(-1)
    second = (idx_head[:, None] + dh2 + jnp.arange(dh2)[None, :]).reshape(-1)
    perm = jnp.concatenate([first, second])                               # grouped-half column order

    L = params["layers"]
    wqkv = jnp.stack([jnp.concatenate([(l["Wq"] * scale)[:, perm], l["Wk"][:, perm], l["Wv"]],
                                      axis=1) for l in L]).astype(bf16)   # (depth, D, 3D)
    wo = jnp.stack([l["Wo"] for l in L]).astype(bf16)
    cwq = jnp.stack([l["cWq"] * scale for l in L]).astype(bf16)
    cwkv = jnp.stack([jnp.concatenate([l["cWk"], l["cWv"]], axis=1) for l in L]).astype(bf16)
    cwo = jnp.stack([l["cWo"] for l in L]).astype(bf16)
    lng = jnp.stack([jnp.stack([l["ln1_g"], l["ln2_g"], l["ln3_g"]]) for l in L])
    lnb = jnp.stack([jnp.stack([l["ln1_b"], l["ln2_b"], l["ln3_b"]]) for l in L])
    ffw1 = jnp.stack([l["ff_w1"] for l in L]).astype(bf16)
    ffb1 = jnp.stack([l["ff_b1"][None, :] for l in L])
    ffw2 = jnp.stack([l["ff_w2"] for l in L]).astype(bf16)
    ffb2 = jnp.stack([l["ff_b2"][None, :] for l in L])

    # lane-padded logit head; padded vocab columns get -1e30 bias -> zero softmax weight
    logw = jnp.zeros((D, VPAD), f32).at[:, :VOCAB].set(params["logit_w"]).astype(bf16)
    logb = jnp.full((1, VPAD), -1e30, f32).at[0, :VOCAB].set(params["logit_b"])
    fin_g = params["final_ln_g"][None, :]
    fin_b = params["final_ln_b"][None, :]

    kern = functools.partial(_ocr_fused_kernel, depth=DEC_DEPTH, heads=DEC_HEADS, dh=dh)
    per_group = pl.pallas_call(
        kern,
        out_shape=jax.ShapeDtypeStruct((groups, 1, VPAD), f32),
        grid=(groups,),
        in_specs=[
            pl.BlockSpec((1, gb * HW, CPP), lambda g: (g, 0, 0)),          # patches
            pl.BlockSpec((1, Tf, D), lambda g: (g, 0, 0)),                 # embedded tokens
            pl.BlockSpec((1, Tf, VPAD), lambda g: (g, 0, 0)),              # masked one-hot targets
            pl.BlockSpec((Tf, D // 2), lambda g: (0, 0)),                  # rotary cos (half table)
            pl.BlockSpec((Tf, D // 2), lambda g: (0, 0)),                  # rotary sin (half table)
            pl.BlockSpec((Tf, Tf), lambda g: (0, 0)),                      # hoisted causal/block bias
            pl.BlockSpec((Tf, gb * HW), lambda g: (0, 0)),                 # hoisted cross-attn bias
            pl.BlockSpec((CPP, D), lambda g: (0, 0)),                      # folded encoder weight
            pl.BlockSpec((1, D), lambda g: (0, 0)),                        # folded encoder bias
            pl.BlockSpec((DEC_DEPTH, D, 3 * D), lambda g: (0, 0, 0)),      # Wqkv
            pl.BlockSpec((DEC_DEPTH, D, D), lambda g: (0, 0, 0)),          # Wo
            pl.BlockSpec((DEC_DEPTH, D, D), lambda g: (0, 0, 0)),          # cWq
            pl.BlockSpec((DEC_DEPTH, D, 2 * D), lambda g: (0, 0, 0)),      # cWkv
            pl.BlockSpec((DEC_DEPTH, D, D), lambda g: (0, 0, 0)),          # cWo
            pl.BlockSpec((DEC_DEPTH, 3, D), lambda g: (0, 0, 0)),          # LN gammas
            pl.BlockSpec((DEC_DEPTH, 3, D), lambda g: (0, 0, 0)),          # LN betas
            pl.BlockSpec((DEC_DEPTH, D, 4 * D), lambda g: (0, 0, 0)),      # FF w1
            pl.BlockSpec((DEC_DEPTH, 1, 4 * D), lambda g: (0, 0, 0)),      # FF b1
            pl.BlockSpec((DEC_DEPTH, 4 * D, D), lambda g: (0, 0, 0)),      # FF w2
            pl.BlockSpec((DEC_DEPTH, 1, D), lambda g: (0, 0, 0)),          # FF b2
            pl.BlockSpec((1, D), lambda g: (0, 0)),                        # final LN gamma
            pl.BlockSpec((1, D), lambda g: (0, 0)),                        # final LN beta
            pl.BlockSpec((D, VPAD), lambda g: (0, 0)),                     # logit weight (lane-padded)
            pl.BlockSpec((1, VPAD), lambda g: (0, 0)),                     # logit bias (lane-padded)
        ],
        out_specs=pl.BlockSpec((1, 1, VPAD), lambda g: (g, 0, 0)),
        scratch_shapes=[pltpu.VMEM((Tf, D), f32)],                         # per-head attn output slab
        compiler_params=pltpu.CompilerParams(
            dimension_semantics=("parallel",),
            vmem_limit_bytes=16 * 1024 * 1024),
    )(patches, h0, onehot, cos_h, sin_h, self_bias, cross_bias, enc_w, enc_b,
      wqkv, wo, cwq, cwkv, cwo, lng, lnb, ffw1, ffb1, ffw2, ffb2,
      fin_g, fin_b, logw, logb)

    # final masked mean over non-pad target tokens (tiny scalar math in XLA)
    count = jnp.maximum(jnp.sum(mask.astype(f32)), 1.0)
    loss = jnp.sum(per_group[:, 0, 0]) / count
    return loss


if __name__ == "__main__":
    key = jax.random.PRNGKey(0)
    k_param, k_img, k_tgt = jax.random.split(key, 3)

    params = init_params(k_param)
    img = jax.random.normal(k_img, (2, IMG_C, IMG_H, IMG_W), jnp.float32)      # NCHW
    tgt = jax.random.randint(k_tgt, (2, MAX_SEQ), 1, VOCAB, dtype=jnp.int32)   # (B, T)
    tgt = tgt.at[:, -2:].set(PAD_ID)                                            # some padding

    loss = jax.jit(ocr_forward)(params, img, tgt)
    loss = jax.block_until_ready(loss)
    assert jnp.isfinite(loss)
    print("KERNEL_OK")
</pallas_src>

<mosaic_0001>
module attributes {stable_mosaic.version = 11 : i64} {
  func.func @_ocr_fused_kernel(%arg0: i32, %arg1: memref<1x32x192xbf16, #tpu.memory_space<vmem>>, %arg2: memref<1x16x32xf32, #tpu.memory_space<vmem>>, %arg3: memref<1x16x128xf32, #tpu.memory_space<vmem>>, %arg4: memref<16x16xf32, #tpu.memory_space<vmem>>, %arg5: memref<16x16xf32, #tpu.memory_space<vmem>>, %arg6: memref<16x16xf32, #tpu.memory_space<vmem>>, %arg7: memref<16x32xf32, #tpu.memory_space<vmem>>, %arg8: memref<192x32xbf16, #tpu.memory_space<vmem>>, %arg9: memref<1x32xf32, #tpu.memory_space<vmem>>, %arg10: memref<2x32x96xbf16, #tpu.memory_space<vmem>>, %arg11: memref<2x32x32xbf16, #tpu.memory_space<vmem>>, %arg12: memref<2x32x32xbf16, #tpu.memory_space<vmem>>, %arg13: memref<2x32x64xbf16, #tpu.memory_space<vmem>>, %arg14: memref<2x32x32xbf16, #tpu.memory_space<vmem>>, %arg15: memref<2x3x32xf32, #tpu.memory_space<vmem>>, %arg16: memref<2x3x32xf32, #tpu.memory_space<vmem>>, %arg17: memref<2x32x128xbf16, #tpu.memory_space<vmem>>, %arg18: memref<2x1x128xf32, #tpu.memory_space<vmem>>, %arg19: memref<2x128x32xbf16, #tpu.memory_space<vmem>>, %arg20: memref<2x1x32xf32, #tpu.memory_space<vmem>>, %arg21: memref<1x32xf32, #tpu.memory_space<vmem>>, %arg22: memref<1x32xf32, #tpu.memory_space<vmem>>, %arg23: memref<32x128xbf16, #tpu.memory_space<vmem>>, %arg24: memref<1x128xf32, #tpu.memory_space<vmem>>, %arg25: memref<1x1x128xf32, #tpu.memory_space<vmem>>, %arg26: memref<16x32xf32, #tpu.memory_space<vmem>>) attributes {dimension_semantics = [#tpu.dimension_semantics<parallel>], iteration_bounds = array<i64: 1>, scalar_prefetch = 0 : i64, scratch_operands = 1 : i64, tpu.core_type = #tpu.core_type<tc>, window_params = [{transform_indices = @transform_0, window_bounds = array<i64: 1, 32, 192>}, {transform_indices = @transform_1, window_bounds = array<i64: 1, 16, 32>}, {transform_indices = @transform_2, window_bounds = array<i64: 1, 16, 128>}, {pipeline_mode = #tpu.pipeline_mode<synchronous>, transform_indices = @transform_3, window_bounds = array<i64: 16, 16>}, {pipeline_mode = #tpu.pipeline_mode<synchronous>, transform_indices = @transform_4, window_bounds = array<i64: 16, 16>}, {pipeline_mode = #tpu.pipeline_mode<synchronous>, transform_indices = @transform_5, window_bounds = array<i64: 16, 16>}, {pipeline_mode = #tpu.pipeline_mode<synchronous>, transform_indices = @transform_6, window_bounds = array<i64: 16, 32>}, {pipeline_mode = #tpu.pipeline_mode<synchronous>, transform_indices = @transform_7, window_bounds = array<i64: 192, 32>}, {pipeline_mode = #tpu.pipeline_mode<synchronous>, transform_indices = @transform_8, window_bounds = array<i64: 1, 32>}, {pipeline_mode = #tpu.pipeline_mode<synchronous>, transform_indices = @transform_9, window_bounds = array<i64: 2, 32, 96>}, {pipeline_mode = #tpu.pipeline_mode<synchronous>, transform_indices = @transform_10, window_bounds = array<i64: 2, 32, 32>}, {pipeline_mode = #tpu.pipeline_mode<synchronous>, transform_indices = @transform_11, window_bounds = array<i64: 2, 32, 32>}, {pipeline_mode = #tpu.pipeline_mode<synchronous>, transform_indices = @transform_12, window_bounds = array<i64: 2, 32, 64>}, {pipeline_mode = #tpu.pipeline_mode<synchronous>, transform_indices = @transform_13, window_bounds = array<i64: 2, 32, 32>}, {pipeline_mode = #tpu.pipeline_mode<synchronous>, transform_indices = @transform_14, window_bounds = array<i64: 2, 3, 32>}, {pipeline_mode = #tpu.pipeline_mode<synchronous>, transform_indices = @transform_15, window_bounds = array<i64: 2, 3, 32>}, {pipeline_mode = #tpu.pipeline_mode<synchronous>, transform_indices = @transform_16, window_bounds = array<i64: 2, 32, 128>}, {pipeline_mode = #tpu.pipeline_mode<synchronous>, transform_indices = @transform_17, window_bounds = array<i64: 2, 1, 128>}, {pipeline_mode = #tpu.pipeline_mode<synchronous>, transform_indices = @transform_18, window_bounds = array<i64: 2, 128, 32>}, {pipeline_mode = #tpu.pipeline_mode<synchronous>, transform_indices = @transform_19, window_bounds = array<i64: 2, 1, 32>}, {pipeline_mode = #tpu.pipeline_mode<synchronous>, transform_indices = @transform_20, window_bounds = array<i64: 1, 32>}, {pipeline_mode = #tpu.pipeline_mode<synchronous>, transform_indices = @transform_21, window_bounds = array<i64: 1, 32>}, {pipeline_mode = #tpu.pipeline_mode<synchronous>, transform_indices = @transform_22, window_bounds = array<i64: 32, 128>}, {pipeline_mode = #tpu.pipeline_mode<synchronous>, transform_indices = @transform_23, window_bounds = array<i64: 1, 128>}, {transform_indices = @transform_24, window_bounds = array<i64: 1, 1, 128>}]} {
    %c0 = arith.constant 0 : index
    %c0_0 = arith.constant 0 : index
    %c0_1 = arith.constant 0 : index
    %0 = vector.load %arg1[%c0, %c0_0, %c0_1] : memref<1x32x192xbf16, #tpu.memory_space<vmem>>, vector<1x32x192xbf16>
    %1 = vector.shape_cast %0 : vector<1x32x192xbf16> to vector<32x192xbf16>
    %c0_2 = arith.constant 0 : index
    %c0_3 = arith.constant 0 : index
    %2 = vector.load %arg8[%c0_2, %c0_3] : memref<192x32xbf16, #tpu.memory_space<vmem>>, vector<192x32xbf16>
    %cst = arith.constant dense<0.000000e+00> : vector<32x32xf32>
    %3 = tpu.matmul %1, %2, %cst {dimension_numbers = #tpu.dot_dimension_numbers<[1], [0], [0], [1], [0, 0, 1, 1], [], []>} : vector<32x192xbf16>, vector<192x32xbf16>, vector<32x32xf32> -> vector<32x32xf32>
    %c0_4 = arith.constant 0 : index
    %c0_5 = arith.constant 0 : index
    %4 = vector.load %arg9[%c0_4, %c0_5] : memref<1x32xf32, #tpu.memory_space<vmem>>, vector<1x32xf32>
    %5 = vector.broadcast %4 : vector<1x32xf32> to vector<32x32xf32>
    %6 = arith.addf %3, %5 : vector<32x32xf32>
    %cst_6 = arith.constant 5.000000e-01 : f32
    %7 = vector.broadcast %cst_6 : f32 to vector<32x32xf32>
    %8 = arith.mulf %7, %6 : vector<32x32xf32>
    %cst_7 = arith.constant 0.707106769 : f32
    %9 = vector.broadcast %cst_7 : f32 to vector<32x32xf32>
    %10 = arith.mulf %6, %9 : vector<32x32xf32>
    %11 = math.erf %10 : vector<32x32xf32>
    %cst_8 = arith.constant 1.000000e+00 : f32
    %12 = vector.broadcast %cst_8 : f32 to vector<32x32xf32>
    %13 = arith.addf %12, %11 : vector<32x32xf32>
    %14 = arith.mulf %8, %13 : vector<32x32xf32>
    %15 = arith.truncf %14 : vector<32x32xf32> to vector<32x32xbf16>
    %c0_9 = arith.constant 0 : index
    %c0_10 = arith.constant 0 : index
    %c0_11 = arith.constant 0 : index
    %16 = vector.load %arg2[%c0_9, %c0_10, %c0_11] : memref<1x16x32xf32, #tpu.memory_space<vmem>>, vector<1x16x32xf32>
    %17 = vector.shape_cast %16 : vector<1x16x32xf32> to vector<16x32xf32>
    %c0_12 = arith.constant 0 : index
    %c0_13 = arith.constant 0 : index
    %18 = vector.load %arg4[%c0_12, %c0_13] : memref<16x16xf32, #tpu.memory_space<vmem>>, vector<16x16xf32>
    %c0_14 = arith.constant 0 : index
    %c0_15 = arith.constant 0 : index
    %19 = vector.load %arg5[%c0_14, %c0_15] : memref<16x16xf32, #tpu.memory_space<vmem>>, vector<16x16xf32>
    %c0_16 = arith.constant 0 : index
    %c0_17 = arith.constant 0 : index
    %20 = vector.load %arg6[%c0_16, %c0_17] : memref<16x16xf32, #tpu.memory_space<vmem>>, vector<16x16xf32>
    %c0_18 = arith.constant 0 : index
    %c0_19 = arith.constant 0 : index
    %21 = vector.load %arg7[%c0_18, %c0_19] : memref<16x32xf32, #tpu.memory_space<vmem>>, vector<16x32xf32>
    %c0_20 = arith.constant 0 : index
    %c0_21 = arith.constant 0 : index
    %c0_22 = arith.constant 0 : index
    %22 = vector.load %arg15[%c0_20, %c0_21, %c0_22] : memref<2x3x32xf32, #tpu.memory_space<vmem>>, vector<1x3x32xf32>
    %23 = vector.shape_cast %22 : vector<1x3x32xf32> to vector<3x32xf32>
    %c0_23 = arith.constant 0 : index
    %c0_24 = arith.constant 0 : index
    %c0_25 = arith.constant 0 : index
    %24 = vector.load %arg16[%c0_23, %c0_24, %c0_25] : memref<2x3x32xf32, #tpu.memory_space<vmem>>, vector<1x3x32xf32>
    %25 = vector.shape_cast %24 : vector<1x3x32xf32> to vector<3x32xf32>
    %26 = vector.extract_strided_slice %23 {offsets = [0, 0], sizes = [1, 32], strides = [1, 1]} : vector<3x32xf32> to vector<1x32xf32>
    %27 = vector.extract_strided_slice %25 {offsets = [0, 0], sizes = [1, 32], strides = [1, 1]} : vector<3x32xf32> to vector<1x32xf32>
    %cst_26 = arith.constant dense<0.000000e+00> : vector<16xf32>
    %28 = vector.multi_reduction <add>, %17, %cst_26 [1] : vector<16x32xf32> to vector<16xf32>
    %29 = vector.shape_cast %28 : vector<16xf32> to vector<16x1xf32>
    %cst_27 = arith.constant 3.200000e+01 : f32
    %30 = vector.broadcast %cst_27 : f32 to vector<16x1xf32>
    %31 = arith.divf %29, %30 : vector<16x1xf32>
    %32 = vector.broadcast %31 : vector<16x1xf32> to vector<16x32xf32>
    %33 = arith.subf %17, %32 : vector<16x32xf32>
    %34 = vector.broadcast %31 : vector<16x1xf32> to vector<16x32xf32>
    %35 = arith.subf %17, %34 : vector<16x32xf32>
    %36 = arith.mulf %33, %35 : vector<16x32xf32>
    %cst_28 = arith.constant dense<0.000000e+00> : vector<16xf32>
    %37 = vector.multi_reduction <add>, %36, %cst_28 [1] : vector<16x32xf32> to vector<16xf32>
    %38 = vector.shape_cast %37 : vector<16xf32> to vector<16x1xf32>
    %cst_29 = arith.constant 3.200000e+01 : f32
    %39 = vector.broadcast %cst_29 : f32 to vector<16x1xf32>
    %40 = arith.divf %38, %39 : vector<16x1xf32>
    %41 = vector.broadcast %31 : vector<16x1xf32> to vector<16x32xf32>
    %42 = arith.subf %17, %41 : vector<16x32xf32>
    %cst_30 = arith.constant 9.99999974E-6 : f32
    %43 = vector.broadcast %cst_30 : f32 to vector<16x1xf32>
    %44 = arith.addf %40, %43 : vector<16x1xf32>
    %45 = math.rsqrt %44 : vector<16x1xf32>
    %46 = vector.broadcast %45 : vector<16x1xf32> to vector<16x32xf32>
    %47 = arith.mulf %42, %46 : vector<16x32xf32>
    %48 = vector.broadcast %26 : vector<1x32xf32> to vector<16x32xf32>
    %49 = arith.mulf %47, %48 : vector<16x32xf32>
    %50 = vector.broadcast %27 : vector<1x32xf32> to vector<16x32xf32>
    %51 = arith.addf %49, %50 : vector<16x32xf32>
    %52 = arith.truncf %51 : vector<16x32xf32> to vector<16x32xbf16>
    %c0_31 = arith.constant 0 : index
    %c0_32 = arith.constant 0 : index
    %c0_33 = arith.constant 0 : index
    %53 = vector.load %arg10[%c0_31, %c0_32, %c0_33] : memref<2x32x96xbf16, #tpu.memory_space<vmem>>, vector<1x32x96xbf16>
    %54 = vector.shape_cast %53 : vector<1x32x96xbf16> to vector<32x96xbf16>
    %cst_34 = arith.constant dense<0.000000e+00> : vector<16x96xf32>
    %55 = tpu.matmul %52, %54, %cst_34 {dimension_numbers = #tpu.dot_dimension_numbers<[1], [0], [0], [1], [0, 0, 1, 1], [], []>} : vector<16x32xbf16>, vector<32x96xbf16>, vector<16x96xf32> -> vector<16x96xf32>
    %56 = vector.extract_strided_slice %55 {offsets = [0, 0], sizes = [16, 16], strides = [1, 1]} : vector<16x96xf32> to vector<16x16xf32>
    %57 = vector.extract_strided_slice %55 {offsets = [0, 16], sizes = [16, 16], strides = [1, 1]} : vector<16x96xf32> to vector<16x16xf32>
    %58 = vector.extract_strided_slice %55 {offsets = [0, 32], sizes = [16, 16], strides = [1, 1]} : vector<16x96xf32> to vector<16x16xf32>
    %59 = vector.extract_strided_slice %55 {offsets = [0, 48], sizes = [16, 16], strides = [1, 1]} : vector<16x96xf32> to vector<16x16xf32>
    %60 = vector.extract_strided_slice %55 {offsets = [0, 64], sizes = [16, 32], strides = [1, 1]} : vector<16x96xf32> to vector<16x32xf32>
    %61 = arith.truncf %60 : vector<16x32xf32> to vector<16x32xbf16>
    %62 = arith.mulf %56, %18 : vector<16x16xf32>
    %63 = arith.mulf %57, %19 : vector<16x16xf32>
    %64 = arith.subf %62, %63 : vector<16x16xf32>
    %65 = arith.truncf %64 : vector<16x16xf32> to vector<16x16xbf16>
    %66 = arith.mulf %57, %18 : vector<16x16xf32>
    %67 = arith.mulf %56, %19 : vector<16x16xf32>
    %68 = arith.addf %66, %67 : vector<16x16xf32>
    %69 = arith.truncf %68 : vector<16x16xf32> to vector<16x16xbf16>
    %70 = arith.mulf %58, %18 : vector<16x16xf32>
    %71 = arith.mulf %59, %19 : vector<16x16xf32>
    %72 = arith.subf %70, %71 : vector<16x16xf32>
    %73 = arith.truncf %72 : vector<16x16xf32> to vector<16x16xbf16>
    %74 = arith.mulf %59, %18 : vector<16x16xf32>
    %75 = arith.mulf %58, %19 : vector<16x16xf32>
    %76 = arith.addf %74, %75 : vector<16x16xf32>
    %77 = arith.truncf %76 : vector<16x16xf32> to vector<16x16xbf16>
    %78 = vector.extract_strided_slice %65 {offsets = [0, 0], sizes = [16, 4], strides = [1, 1]} : vector<16x16xbf16> to vector<16x4xbf16>
    %79 = vector.extract_strided_slice %73 {offsets = [0, 0], sizes = [16, 4], strides = [1, 1]} : vector<16x16xbf16> to vector<16x4xbf16>
    %cst_35 = arith.constant dense<0.000000e+00> : vector<16x16xf32>
    %80 = tpu.matmul %78, %79, %cst_35 {dimension_numbers = #tpu.dot_dimension_numbers<[1], [1], [0], [0], [0, 0, 1, 0], [], []>} : vector<16x4xbf16>, vector<16x4xbf16>, vector<16x16xf32> -> vector<16x16xf32>
    %81 = vector.extract_strided_slice %69 {offsets = [0, 0], sizes = [16, 4], strides = [1, 1]} : vector<16x16xbf16> to vector<16x4xbf16>
    %82 = vector.extract_strided_slice %77 {offsets = [0, 0], sizes = [16, 4], strides = [1, 1]} : vector<16x16xbf16> to vector<16x4xbf16>
    %cst_36 = arith.constant dense<0.000000e+00> : vector<16x16xf32>
    %83 = tpu.matmul %81, %82, %cst_36 {dimension_numbers = #tpu.dot_dimension_numbers<[1], [1], [0], [0], [0, 0, 1, 0], [], []>} : vector<16x4xbf16>, vector<16x4xbf16>, vector<16x16xf32> -> vector<16x16xf32>
    %84 = arith.addf %80, %83 : vector<16x16xf32>
    %85 = arith.addf %84, %20 : vector<16x16xf32>
    %cst_37 = arith.constant dense<0xFF800000> : vector<16xf32>
    %86 = vector.multi_reduction <maximumf>, %85, %cst_37 [1] : vector<16x16xf32> to vector<16xf32>
    %87 = vector.shape_cast %86 : vector<16xf32> to vector<16x1xf32>
    %88 = vector.broadcast %87 : vector<16x1xf32> to vector<16x16xf32>
    %89 = arith.subf %85, %88 : vector<16x16xf32>
    %90 = math.exp %89 : vector<16x16xf32>
    %cst_38 = arith.constant dense<0.000000e+00> : vector<16xf32>
    %91 = vector.multi_reduction <add>, %90, %cst_38 [1] : vector<16x16xf32> to vector<16xf32>
    %92 = vector.shape_cast %91 : vector<16xf32> to vector<16x1xf32>
    %93 = tpu.reciprocal %92 {approx = true} : vector<16x1xf32> -> vector<16x1xf32>
    %94 = vector.broadcast %93 : vector<16x1xf32> to vector<16x16xf32>
    %95 = arith.mulf %90, %94 : vector<16x16xf32>
    %96 = arith.truncf %95 : vector<16x16xf32> to vector<16x16xbf16>
    %97 = vector.extract_strided_slice %61 {offsets = [0, 0], sizes = [16, 8], strides = [1, 1]} : vector<16x32xbf16> to vector<16x8xbf16>
    %cst_39 = arith.constant dense<0.000000e+00> : vector<16x8xf32>
    %98 = tpu.matmul %96, %97, %cst_39 {dimension_numbers = #tpu.dot_dimension_numbers<[1], [0], [0], [1], [0, 0, 1, 1], [], []>} : vector<16x16xbf16>, vector<16x8xbf16>, vector<16x8xf32> -> vector<16x8xf32>
    %c0_40 = arith.constant 0 : index
    %c0_41 = arith.constant 0 : index
    %99 = vector.load %arg26[%c0_40, %c0_41] : memref<16x32xf32, #tpu.memory_space<vmem>>, vector<16x8xf32>
    tpu.vector_store %arg26[%c0_40, %c0_41], %98 {strides = array<i32>} : memref<16x32xf32, #tpu.memory_space<vmem>>, vector<16x8xf32>,
    %100 = vector.extract_strided_slice %65 {offsets = [0, 4], sizes = [16, 4], strides = [1, 1]} : vector<16x16xbf16> to vector<16x4xbf16>
    %101 = vector.extract_strided_slice %73 {offsets = [0, 4], sizes = [16, 4], strides = [1, 1]} : vector<16x16xbf16> to vector<16x4xbf16>
    %cst_42 = arith.constant dense<0.000000e+00> : vector<16x16xf32>
    %102 = tpu.matmul %100, %101, %cst_42 {dimension_numbers = #tpu.dot_dimension_numbers<[1], [1], [0], [0], [0, 0, 1, 0], [], []>} : vector<16x4xbf16>, vector<16x4xbf16>, vector<16x16xf32> -> vector<16x16xf32>
    %103 = vector.extract_strided_slice %69 {offsets = [0, 4], sizes = [16, 4], strides = [1, 1]} : vector<16x16xbf16> to vector<16x4xbf16>
    %104 = vector.extract_strided_slice %77 {offsets = [0, 4], sizes = [16, 4], strides = [1, 1]} : vector<16x16xbf16> to vector<16x4xbf16>
    %cst_43 = arith.constant dense<0.000000e+00> : vector<16x16xf32>
    %105 = tpu.matmul %103, %104, %cst_43 {dimension_numbers = #tpu.dot_dimension_numbers<[1], [1], [0], [0], [0, 0, 1, 0], [], []>} : vector<16x4xbf16>, vector<16x4xbf16>, vector<16x16xf32> -> vector<16x16xf32>
    %106 = arith.addf %102, %105 : vector<16x16xf32>
    %107 = arith.addf %106, %20 : vector<16x16xf32>
    %cst_44 = arith.constant dense<0xFF800000> : vector<16xf32>
    %108 = vector.multi_reduction <maximumf>, %107, %cst_44 [1] : vector<16x16xf32> to vector<16xf32>
    %109 = vector.shape_cast %108 : vector<16xf32> to vector<16x1xf32>
    %110 = vector.broadcast %109 : vector<16x1xf32> to vector<16x16xf32>
    %111 = arith.subf %107, %110 : vector<16x16xf32>
    %112 = math.exp %111 : vector<16x16xf32>
    %cst_45 = arith.constant dense<0.000000e+00> : vector<16xf32>
    %113 = vector.multi_reduction <add>, %112, %cst_45 [1] : vector<16x16xf32> to vector<16xf32>
    %114 = vector.shape_cast %113 : vector<16xf32> to vector<16x1xf32>
    %115 = tpu.reciprocal %114 {approx = true} : vector<16x1xf32> -> vector<16x1xf32>
    %116 = vector.broadcast %115 : vector<16x1xf32> to vector<16x16xf32>
    %117 = arith.mulf %112, %116 : vector<16x16xf32>
    %118 = arith.truncf %117 : vector<16x16xf32> to vector<16x16xbf16>
    %119 = vector.extract_strided_slice %61 {offsets = [0, 8], sizes = [16, 8], strides = [1, 1]} : vector<16x32xbf16> to vector<16x8xbf16>
    %cst_46 = arith.constant dense<0.000000e+00> : vector<16x8xf32>
    %120 = tpu.matmul %118, %119, %cst_46 {dimension_numbers = #tpu.dot_dimension_numbers<[1], [0], [0], [1], [0, 0, 1, 1], [], []>} : vector<16x16xbf16>, vector<16x8xbf16>, vector<16x8xf32> -> vector<16x8xf32>
    %c0_47 = arith.constant 0 : index
    %c8 = arith.constant 8 : index
    %121 = vector.load %arg26[%c0_47, %c8] : memref<16x32xf32, #tpu.memory_space<vmem>>, vector<16x8xf32>
    tpu.vector_store %arg26[%c0_47, %c8], %120 {strides = array<i32>} : memref<16x32xf32, #tpu.memory_space<vmem>>, vector<16x8xf32>,
    %122 = vector.extract_strided_slice %65 {offsets = [0, 8], sizes = [16, 4], strides = [1, 1]} : vector<16x16xbf16> to vector<16x4xbf16>
    %123 = vector.extract_strided_slice %73 {offsets = [0, 8], sizes = [16, 4], strides = [1, 1]} : vector<16x16xbf16> to vector<16x4xbf16>
    %cst_48 = arith.constant dense<0.000000e+00> : vector<16x16xf32>
    %124 = tpu.matmul %122, %123, %cst_48 {dimension_numbers = #tpu.dot_dimension_numbers<[1], [1], [0], [0], [0, 0, 1, 0], [], []>} : vector<16x4xbf16>, vector<16x4xbf16>, vector<16x16xf32> -> vector<16x16xf32>
    %125 = vector.extract_strided_slice %69 {offsets = [0, 8], sizes = [16, 4], strides = [1, 1]} : vector<16x16xbf16> to vector<16x4xbf16>
    %126 = vector.extract_strided_slice %77 {offsets = [0, 8], sizes = [16, 4], strides = [1, 1]} : vector<16x16xbf16> to vector<16x4xbf16>
    %cst_49 = arith.constant dense<0.000000e+00> : vector<16x16xf32>
    %127 = tpu.matmul %125, %126, %cst_49 {dimension_numbers = #tpu.dot_dimension_numbers<[1], [1], [0], [0], [0, 0, 1, 0], [], []>} : vector<16x4xbf16>, vector<16x4xbf16>, vector<16x16xf32> -> vector<16x16xf32>
    %128 = arith.addf %124, %127 : vector<16x16xf32>
    %129 = arith.addf %128, %20 : vector<16x16xf32>
    %cst_50 = arith.constant dense<0xFF800000> : vector<16xf32>
    %130 = vector.multi_reduction <maximumf>, %129, %cst_50 [1] : vector<16x16xf32> to vector<16xf32>
    %131 = vector.shape_cast %130 : vector<16xf32> to vector<16x1xf32>
    %132 = vector.broadcast %131 : vector<16x1xf32> to vector<16x16xf32>
    %133 = arith.subf %129, %132 : vector<16x16xf32>
    %134 = math.exp %133 : vector<16x16xf32>
    %cst_51 = arith.constant dense<0.000000e+00> : vector<16xf32>
    %135 = vector.multi_reduction <add>, %134, %cst_51 [1] : vector<16x16xf32> to vector<16xf32>
    %136 = vector.shape_cast %135 : vector<16xf32> to vector<16x1xf32>
    %137 = tpu.reciprocal %136 {approx = true} : vector<16x1xf32> -> vector<16x1xf32>
    %138 = vector.broadcast %137 : vector<16x1xf32> to vector<16x16xf32>
    %139 = arith.mulf %134, %138 : vector<16x16xf32>
    %140 = arith.truncf %139 : vector<16x16xf32> to vector<16x16xbf16>
    %141 = vector.extract_strided_slice %61 {offsets = [0, 16], sizes = [16, 8], strides = [1, 1]} : vector<16x32xbf16> to vector<16x8xbf16>
    %cst_52 = arith.constant dense<0.000000e+00> : vector<16x8xf32>
    %142 = tpu.matmul %140, %141, %cst_52 {dimension_numbers = #tpu.dot_dimension_numbers<[1], [0], [0], [1], [0, 0, 1, 1], [], []>} : vector<16x16xbf16>, vector<16x8xbf16>, vector<16x8xf32> -> vector<16x8xf32>
    %c0_53 = arith.constant 0 : index
    %c16 = arith.constant 16 : index
    %143 = vector.load %arg26[%c0_53, %c16] : memref<16x32xf32, #tpu.memory_space<vmem>>, vector<16x8xf32>
    tpu.vector_store %arg26[%c0_53, %c16], %142 {strides = array<i32>} : memref<16x32xf32, #tpu.memory_space<vmem>>, vector<16x8xf32>,
    %144 = vector.extract_strided_slice %65 {offsets = [0, 12], sizes = [16, 4], strides = [1, 1]} : vector<16x16xbf16> to vector<16x4xbf16>
    %145 = vector.extract_strided_slice %73 {offsets = [0, 12], sizes = [16, 4], strides = [1, 1]} : vector<16x16xbf16> to vector<16x4xbf16>
    %cst_54 = arith.constant dense<0.000000e+00> : vector<16x16xf32>
    %146 = tpu.matmul %144, %145, %cst_54 {dimension_numbers = #tpu.dot_dimension_numbers<[1], [1], [0], [0], [0, 0, 1, 0], [], []>} : vector<16x4xbf16>, vector<16x4xbf16>, vector<16x16xf32> -> vector<16x16xf32>
    %147 = vector.extract_strided_slice %69 {offsets = [0, 12], sizes = [16, 4], strides = [1, 1]} : vector<16x16xbf16> to vector<16x4xbf16>
    %148 = vector.extract_strided_slice %77 {offsets = [0, 12], sizes = [16, 4], strides = [1, 1]} : vector<16x16xbf16> to vector<16x4xbf16>
    %cst_55 = arith.constant dense<0.000000e+00> : vector<16x16xf32>
    %149 = tpu.matmul %147, %148, %cst_55 {dimension_numbers = #tpu.dot_dimension_numbers<[1], [1], [0], [0], [0, 0, 1, 0], [], []>} : vector<16x4xbf16>, vector<16x4xbf16>, vector<16x16xf32> -> vector<16x16xf32>
    %150 = arith.addf %146, %149 : vector<16x16xf32>
    %151 = arith.addf %150, %20 : vector<16x16xf32>
    %cst_56 = arith.constant dense<0xFF800000> : vector<16xf32>
    %152 = vector.multi_reduction <maximumf>, %151, %cst_56 [1] : vector<16x16xf32> to vector<16xf32>
    %153 = vector.shape_cast %152 : vector<16xf32> to vector<16x1xf32>
    %154 = vector.broadcast %153 : vector<16x1xf32> to vector<16x16xf32>
    %155 = arith.subf %151, %154 : vector<16x16xf32>
    %156 = math.exp %155 : vector<16x16xf32>
    %cst_57 = arith.constant dense<0.000000e+00> : vector<16xf32>
    %157 = vector.multi_reduction <add>, %156, %cst_57 [1] : vector<16x16xf32> to vector<16xf32>
    %158 = vector.shape_cast %157 : vector<16xf32> to vector<16x1xf32>
    %159 = tpu.reciprocal %158 {approx = true} : vector<16x1xf32> -> vector<16x1xf32>
    %160 = vector.broadcast %159 : vector<16x1xf32> to vector<16x16xf32>
    %161 = arith.mulf %156, %160 : vector<16x16xf32>
    %162 = arith.truncf %161 : vector<16x16xf32> to vector<16x16xbf16>
    %163 = vector.extract_strided_slice %61 {offsets = [0, 24], sizes = [16, 8], strides = [1, 1]} : vector<16x32xbf16> to vector<16x8xbf16>
    %cst_58 = arith.constant dense<0.000000e+00> : vector<16x8xf32>
    %164 = tpu.matmul %162, %163, %cst_58 {dimension_numbers = #tpu.dot_dimension_numbers<[1], [0], [0], [1], [0, 0, 1, 1], [], []>} : vector<16x16xbf16>, vector<16x8xbf16>, vector<16x8xf32> -> vector<16x8xf32>
    %c0_59 = arith.constant 0 : index
    %c24 = arith.constant 24 : index
    %165 = vector.load %arg26[%c0_59, %c24] : memref<16x32xf32, #tpu.memory_space<vmem>>, vector<16x8xf32>
    tpu.vector_store %arg26[%c0_59, %c24], %164 {strides = array<i32>} : memref<16x32xf32, #tpu.memory_space<vmem>>, vector<16x8xf32>,
    %c0_60 = arith.constant 0 : index
    %c0_61 = arith.constant 0 : index
    %166 = vector.load %arg26[%c0_60, %c0_61] : memref<16x32xf32, #tpu.memory_space<vmem>>, vector<16x32xf32>
    %167 = arith.truncf %166 : vector<16x32xf32> to vector<16x32xbf16>
    %c0_62 = arith.constant 0 : index
    %c0_63 = arith.constant 0 : index
    %c0_64 = arith.constant 0 : index
    %168 = vector.load %arg11[%c0_62, %c0_63, %c0_64] : memref<2x32x32xbf16, #tpu.memory_space<vmem>>, vector<1x32x32xbf16>
    %169 = vector.shape_cast %168 : vector<1x32x32xbf16> to vector<32x32xbf16>
    %cst_65 = arith.constant dense<0.000000e+00> : vector<16x32xf32>
    %170 = tpu.matmul %167, %169, %cst_65 {dimension_numbers = #tpu.dot_dimension_numbers<[1], [0], [0], [1], [0, 0, 1, 1], [], []>} : vector<16x32xbf16>, vector<32x32xbf16>, vector<16x32xf32> -> vector<16x32xf32>
    %171 = arith.addf %17, %170 : vector<16x32xf32>
    %172 = vector.extract_strided_slice %23 {offsets = [1, 0], sizes = [1, 32], strides = [1, 1]} : vector<3x32xf32> to vector<1x32xf32>
    %173 = vector.extract_strided_slice %25 {offsets = [1, 0], sizes = [1, 32], strides = [1, 1]} : vector<3x32xf32> to vector<1x32xf32>
    %cst_66 = arith.constant dense<0.000000e+00> : vector<16xf32>
    %174 = vector.multi_reduction <add>, %171, %cst_66 [1] : vector<16x32xf32> to vector<16xf32>
    %175 = vector.shape_cast %174 : vector<16xf32> to vector<16x1xf32>
    %cst_67 = arith.constant 3.200000e+01 : f32
    %176 = vector.broadcast %cst_67 : f32 to vector<16x1xf32>
    %177 = arith.divf %175, %176 : vector<16x1xf32>
    %178 = vector.broadcast %177 : vector<16x1xf32> to vector<16x32xf32>
    %179 = arith.subf %171, %178 : vector<16x32xf32>
    %180 = vector.broadcast %177 : vector<16x1xf32> to vector<16x32xf32>
    %181 = arith.subf %171, %180 : vector<16x32xf32>
    %182 = arith.mulf %179, %181 : vector<16x32xf32>
    %cst_68 = arith.constant dense<0.000000e+00> : vector<16xf32>
    %183 = vector.multi_reduction <add>, %182, %cst_68 [1] : vector<16x32xf32> to vector<16xf32>
    %184 = vector.shape_cast %183 : vector<16xf32> to vector<16x1xf32>
    %cst_69 = arith.constant 3.200000e+01 : f32
    %185 = vector.broadcast %cst_69 : f32 to vector<16x1xf32>
    %186 = arith.divf %184, %185 : vector<16x1xf32>
    %187 = vector.broadcast %177 : vector<16x1xf32> to vector<16x32xf32>
    %188 = arith.subf %171, %187 : vector<16x32xf32>
    %cst_70 = arith.constant 9.99999974E-6 : f32
    %189 = vector.broadcast %cst_70 : f32 to vector<16x1xf32>
    %190 = arith.addf %186, %189 : vector<16x1xf32>
    %191 = math.rsqrt %190 : vector<16x1xf32>
    %192 = vector.broadcast %191 : vector<16x1xf32> to vector<16x32xf32>
    %193 = arith.mulf %188, %192 : vector<16x32xf32>
    %194 = vector.broadcast %172 : vector<1x32xf32> to vector<16x32xf32>
    %195 = arith.mulf %193, %194 : vector<16x32xf32>
    %196 = vector.broadcast %173 : vector<1x32xf32> to vector<16x32xf32>
    %197 = arith.addf %195, %196 : vector<16x32xf32>
    %198 = arith.truncf %197 : vector<16x32xf32> to vector<16x32xbf16>
    %c0_71 = arith.constant 0 : index
    %c0_72 = arith.constant 0 : index
    %c0_73 = arith.constant 0 : index
    %199 = vector.load %arg12[%c0_71, %c0_72, %c0_73] : memref<2x32x32xbf16, #tpu.memory_space<vmem>>, vector<1x32x32xbf16>
    %200 = vector.shape_cast %199 : vector<1x32x32xbf16> to vector<32x32xbf16>
    %cst_74 = arith.constant dense<0.000000e+00> : vector<16x32xf32>
    %201 = tpu.matmul %198, %200, %cst_74 {dimension_numbers = #tpu.dot_dimension_numbers<[1], [0], [0], [1], [0, 0, 1, 1], [], []>} : vector<16x32xbf16>, vector<32x32xbf16>, vector<16x32xf32> -> vector<16x32xf32>
    %202 = arith.truncf %201 : vector<16x32xf32> to vector<16x32xbf16>
    %c0_75 = arith.constant 0 : index
    %c0_76 = arith.constant 0 : index
    %c0_77 = arith.constant 0 : index
    %203 = vector.load %arg13[%c0_75, %c0_76, %c0_77] : memref<2x32x64xbf16, #tpu.memory_space<vmem>>, vector<1x32x64xbf16>
    %204 = vector.shape_cast %203 : vector<1x32x64xbf16> to vector<32x64xbf16>
    %cst_78 = arith.constant dense<0.000000e+00> : vector<32x64xf32>
    %205 = tpu.matmul %15, %204, %cst_78 {dimension_numbers = #tpu.dot_dimension_numbers<[1], [0], [0], [1], [0, 0, 1, 1], [], []>} : vector<32x32xbf16>, vector<32x64xbf16>, vector<32x64xf32> -> vector<32x64xf32>
    %206 = vector.extract_strided_slice %205 {offsets = [0, 0], sizes = [32, 32], strides = [1, 1]} : vector<32x64xf32> to vector<32x32xf32>
    %207 = arith.truncf %206 : vector<32x32xf32> to vector<32x32xbf16>
    %208 = vector.extract_strided_slice %205 {offsets = [0, 32], sizes = [32, 32], strides = [1, 1]} : vector<32x64xf32> to vector<32x32xf32>
    %209 = arith.truncf %208 : vector<32x32xf32> to vector<32x32xbf16>
    %210 = vector.extract_strided_slice %202 {offsets = [0, 0], sizes = [16, 8], strides = [1, 1]} : vector<16x32xbf16> to vector<16x8xbf16>
    %211 = vector.extract_strided_slice %207 {offsets = [0, 0], sizes = [32, 8], strides = [1, 1]} : vector<32x32xbf16> to vector<32x8xbf16>
    %cst_79 = arith.constant dense<0.000000e+00> : vector<16x32xf32>
    %212 = tpu.matmul %210, %211, %cst_79 {dimension_numbers = #tpu.dot_dimension_numbers<[1], [1], [0], [0], [0, 0, 1, 0], [], []>} : vector<16x8xbf16>, vector<32x8xbf16>, vector<16x32xf32> -> vector<16x32xf32>
    %213 = arith.addf %212, %21 : vector<16x32xf32>
    %cst_80 = arith.constant dense<0xFF800000> : vector<16xf32>
    %214 = vector.multi_reduction <maximumf>, %213, %cst_80 [1] : vector<16x32xf32> to vector<16xf32>
    %215 = vector.shape_cast %214 : vector<16xf32> to vector<16x1xf32>
    %216 = vector.broadcast %215 : vector<16x1xf32> to vector<16x32xf32>
    %217 = arith.subf %213, %216 : vector<16x32xf32>
    %218 = math.exp %217 : vector<16x32xf32>
    %cst_81 = arith.constant dense<0.000000e+00> : vector<16xf32>
    %219 = vector.multi_reduction <add>, %218, %cst_81 [1] : vector<16x32xf32> to vector<16xf32>
    %220 = vector.shape_cast %219 : vector<16xf32> to vector<16x1xf32>
    %221 = tpu.reciprocal %220 {approx = true} : vector<16x1xf32> -> vector<16x1xf32>
    %222 = vector.broadcast %221 : vector<16x1xf32> to vector<16x32xf32>
    %223 = arith.mulf %218, %222 : vector<16x32xf32>
    %224 = arith.truncf %223 : vector<16x32xf32> to vector<16x32xbf16>
    %225 = vector.extract_strided_slice %209 {offsets = [0, 0], sizes = [32, 8], strides = [1, 1]} : vector<32x32xbf16> to vector<32x8xbf16>
    %cst_82 = arith.constant dense<0.000000e+00> : vector<16x8xf32>
    %226 = tpu.matmul %224, %225, %cst_82 {dimension_numbers = #tpu.dot_dimension_numbers<[1], [0], [0], [1], [0, 0, 1, 1], [], []>} : vector<16x32xbf16>, vector<32x8xbf16>, vector<16x8xf32> -> vector<16x8xf32>
    %c0_83 = arith.constant 0 : index
    %c0_84 = arith.constant 0 : index
    %227 = vector.load %arg26[%c0_83, %c0_84] : memref<16x32xf32, #tpu.memory_space<vmem>>, vector<16x8xf32>
    tpu.vector_store %arg26[%c0_83, %c0_84], %226 {strides = array<i32>} : memref<16x32xf32, #tpu.memory_space<vmem>>, vector<16x8xf32>,
    %228 = vector.extract_strided_slice %202 {offsets = [0, 8], sizes = [16, 8], strides = [1, 1]} : vector<16x32xbf16> to vector<16x8xbf16>
    %229 = vector.extract_strided_slice %207 {offsets = [0, 8], sizes = [32, 8], strides = [1, 1]} : vector<32x32xbf16> to vector<32x8xbf16>
    %cst_85 = arith.constant dense<0.000000e+00> : vector<16x32xf32>
    %230 = tpu.matmul %228, %229, %cst_85 {dimension_numbers = #tpu.dot_dimension_numbers<[1], [1], [0], [0], [0, 0, 1, 0], [], []>} : vector<16x8xbf16>, vector<32x8xbf16>, vector<16x32xf32> -> vector<16x32xf32>
    %231 = arith.addf %230, %21 : vector<16x32xf32>
    %cst_86 = arith.constant dense<0xFF800000> : vector<16xf32>
    %232 = vector.multi_reduction <maximumf>, %231, %cst_86 [1] : vector<16x32xf32> to vector<16xf32>
    %233 = vector.shape_cast %232 : vector<16xf32> to vector<16x1xf32>
    %234 = vector.broadcast %233 : vector<16x1xf32> to vector<16x32xf32>
    %235 = arith.subf %231, %234 : vector<16x32xf32>
    %236 = math.exp %235 : vector<16x32xf32>
    %cst_87 = arith.constant dense<0.000000e+00> : vector<16xf32>
    %237 = vector.multi_reduction <add>, %236, %cst_87 [1] : vector<16x32xf32> to vector<16xf32>
    %238 = vector.shape_cast %237 : vector<16xf32> to vector<16x1xf32>
    %239 = tpu.reciprocal %238 {approx = true} : vector<16x1xf32> -> vector<16x1xf32>
    %240 = vector.broadcast %239 : vector<16x1xf32> to vector<16x32xf32>
    %241 = arith.mulf %236, %240 : vector<16x32xf32>
    %242 = arith.truncf %241 : vector<16x32xf32> to vector<16x32xbf16>
    %243 = vector.extract_strided_slice %209 {offsets = [0, 8], sizes = [32, 8], strides = [1, 1]} : vector<32x32xbf16> to vector<32x8xbf16>
    %cst_88 = arith.constant dense<0.000000e+00> : vector<16x8xf32>
    %244 = tpu.matmul %242, %243, %cst_88 {dimension_numbers = #tpu.dot_dimension_numbers<[1], [0], [0], [1], [0, 0, 1, 1], [], []>} : vector<16x32xbf16>, vector<32x8xbf16>, vector<16x8xf32> -> vector<16x8xf32>
    %c0_89 = arith.constant 0 : index
    %c8_90 = arith.constant 8 : index
    %245 = vector.load %arg26[%c0_89, %c8_90] : memref<16x32xf32, #tpu.memory_space<vmem>>, vector<16x8xf32>
    tpu.vector_store %arg26[%c0_89, %c8_90], %244 {strides = array<i32>} : memref<16x32xf32, #tpu.memory_space<vmem>>, vector<16x8xf32>,
    %246 = vector.extract_strided_slice %202 {offsets = [0, 16], sizes = [16, 8], strides = [1, 1]} : vector<16x32xbf16> to vector<16x8xbf16>
    %247 = vector.extract_strided_slice %207 {offsets = [0, 16], sizes = [32, 8], strides = [1, 1]} : vector<32x32xbf16> to vector<32x8xbf16>
    %cst_91 = arith.constant dense<0.000000e+00> : vector<16x32xf32>
    %248 = tpu.matmul %246, %247, %cst_91 {dimension_numbers = #tpu.dot_dimension_numbers<[1], [1], [0], [0], [0, 0, 1, 0], [], []>} : vector<16x8xbf16>, vector<32x8xbf16>, vector<16x32xf32> -> vector<16x32xf32>
    %249 = arith.addf %248, %21 : vector<16x32xf32>
    %cst_92 = arith.constant dense<0xFF800000> : vector<16xf32>
    %250 = vector.multi_reduction <maximumf>, %249, %cst_92 [1] : vector<16x32xf32> to vector<16xf32>
    %251 = vector.shape_cast %250 : vector<16xf32> to vector<16x1xf32>
    %252 = vector.broadcast %251 : vector<16x1xf32> to vector<16x32xf32>
    %253 = arith.subf %249, %252 : vector<16x32xf32>
    %254 = math.exp %253 : vector<16x32xf32>
    %cst_93 = arith.constant dense<0.000000e+00> : vector<16xf32>
    %255 = vector.multi_reduction <add>, %254, %cst_93 [1] : vector<16x32xf32> to vector<16xf32>
    %256 = vector.shape_cast %255 : vector<16xf32> to vector<16x1xf32>
    %257 = tpu.reciprocal %256 {approx = true} : vector<16x1xf32> -> vector<16x1xf32>
    %258 = vector.broadcast %257 : vector<16x1xf32> to vector<16x32xf32>
    %259 = arith.mulf %254, %258 : vector<16x32xf32>
    %260 = arith.truncf %259 : vector<16x32xf32> to vector<16x32xbf16>
    %261 = vector.extract_strided_slice %209 {offsets = [0, 16], sizes = [32, 8], strides = [1, 1]} : vector<32x32xbf16> to vector<32x8xbf16>
    %cst_94 = arith.constant dense<0.000000e+00> : vector<16x8xf32>
    %262 = tpu.matmul %260, %261, %cst_94 {dimension_numbers = #tpu.dot_dimension_numbers<[1], [0], [0], [1], [0, 0, 1, 1], [], []>} : vector<16x32xbf16>, vector<32x8xbf16>, vector<16x8xf32> -> vector<16x8xf32>
    %c0_95 = arith.constant 0 : index
    %c16_96 = arith.constant 16 : index
    %263 = vector.load %arg26[%c0_95, %c16_96] : memref<16x32xf32, #tpu.memory_space<vmem>>, vector<16x8xf32>
    tpu.vector_store %arg26[%c0_95, %c16_96], %262 {strides = array<i32>} : memref<16x32xf32, #tpu.memory_space<vmem>>, vector<16x8xf32>,
    %264 = vector.extract_strided_slice %202 {offsets = [0, 24], sizes = [16, 8], strides = [1, 1]} : vector<16x32xbf16> to vector<16x8xbf16>
    %265 = vector.extract_strided_slice %207 {offsets = [0, 24], sizes = [32, 8], strides = [1, 1]} : vector<32x32xbf16> to vector<32x8xbf16>
    %cst_97 = arith.constant dense<0.000000e+00> : vector<16x32xf32>
    %266 = tpu.matmul %264, %265, %cst_97 {dimension_numbers = #tpu.dot_dimension_numbers<[1], [1], [0], [0], [0, 0, 1, 0], [], []>} : vector<16x8xbf16>, vector<32x8xbf16>, vector<16x32xf32> -> vector<16x32xf32>
    %267 = arith.addf %266, %21 : vector<16x32xf32>
    %cst_98 = arith.constant dense<0xFF800000> : vector<16xf32>
    %268 = vector.multi_reduction <maximumf>, %267, %cst_98 [1] : vector<16x32xf32> to vector<16xf32>
    %269 = vector.shape_cast %268 : vector<16xf32> to vector<16x1xf32>
    %270 = vector.broadcast %269 : vector<16x1xf32> to vector<16x32xf32>
    %271 = arith.subf %267, %270 : vector<16x32xf32>
    %272 = math.exp %271 : vector<16x32xf32>
    %cst_99 = arith.constant dense<0.000000e+00> : vector<16xf32>
    %273 = vector.multi_reduction <add>, %272, %cst_99 [1] : vector<16x32xf32> to vector<16xf32>
    %274 = vector.shape_cast %273 : vector<16xf32> to vector<16x1xf32>
    %275 = tpu.reciprocal %274 {approx = true} : vector<16x1xf32> -> vector<16x1xf32>
    %276 = vector.broadcast %275 : vector<16x1xf32> to vector<16x32xf32>
    %277 = arith.mulf %272, %276 : vector<16x32xf32>
    %278 = arith.truncf %277 : vector<16x32xf32> to vector<16x32xbf16>
    %279 = vector.extract_strided_slice %209 {offsets = [0, 24], sizes = [32, 8], strides = [1, 1]} : vector<32x32xbf16> to vector<32x8xbf16>
    %cst_100 = arith.constant dense<0.000000e+00> : vector<16x8xf32>
    %280 = tpu.matmul %278, %279, %cst_100 {dimension_numbers = #tpu.dot_dimension_numbers<[1], [0], [0], [1], [0, 0, 1, 1], [], []>} : vector<16x32xbf16>, vector<32x8xbf16>, vector<16x8xf32> -> vector<16x8xf32>
    %c0_101 = arith.constant 0 : index
    %c24_102 = arith.constant 24 : index
    %281 = vector.load %arg26[%c0_101, %c24_102] : memref<16x32xf32, #tpu.memory_space<vmem>>, vector<16x8xf32>
    tpu.vector_store %arg26[%c0_101, %c24_102], %280 {strides = array<i32>} : memref<16x32xf32, #tpu.memory_space<vmem>>, vector<16x8xf32>,
    %c0_103 = arith.constant 0 : index
    %c0_104 = arith.constant 0 : index
    %282 = vector.load %arg26[%c0_103, %c0_104] : memref<16x32xf32, #tpu.memory_space<vmem>>, vector<16x32xf32>
    %283 = arith.truncf %282 : vector<16x32xf32> to vector<16x32xbf16>
    %c0_105 = arith.constant 0 : index
    %c0_106 = arith.constant 0 : index
    %c0_107 = arith.constant 0 : index
    %284 = vector.load %arg14[%c0_105, %c0_106, %c0_107] : memref<2x32x32xbf16, #tpu.memory_space<vmem>>, vector<1x32x32xbf16>
    %285 = vector.shape_cast %284 : vector<1x32x32xbf16> to vector<32x32xbf16>
    %cst_108 = arith.constant dense<0.000000e+00> : vector<16x32xf32>
    %286 = tpu.matmul %283, %285, %cst_108 {dimension_numbers = #tpu.dot_dimension_numbers<[1], [0], [0], [1], [0, 0, 1, 1], [], []>} : vector<16x32xbf16>, vector<32x32xbf16>, vector<16x32xf32> -> vector<16x32xf32>
    %287 = arith.addf %171, %286 : vector<16x32xf32>
    %288 = vector.extract_strided_slice %23 {offsets = [2, 0], sizes = [1, 32], strides = [1, 1]} : vector<3x32xf32> to vector<1x32xf32>
    %289 = vector.extract_strided_slice %25 {offsets = [2, 0], sizes = [1, 32], strides = [1, 1]} : vector<3x32xf32> to vector<1x32xf32>
    %cst_109 = arith.constant dense<0.000000e+00> : vector<16xf32>
    %290 = vector.multi_reduction <add>, %287, %cst_109 [1] : vector<16x32xf32> to vector<16xf32>
    %291 = vector.shape_cast %290 : vector<16xf32> to vector<16x1xf32>
    %cst_110 = arith.constant 3.200000e+01 : f32
    %292 = vector.broadcast %cst_110 : f32 to vector<16x1xf32>
    %293 = arith.divf %291, %292 : vector<16x1xf32>
    %294 = vector.broadcast %293 : vector<16x1xf32> to vector<16x32xf32>
    %295 = arith.subf %287, %294 : vector<16x32xf32>
    %296 = vector.broadcast %293 : vector<16x1xf32> to vector<16x32xf32>
    %297 = arith.subf %287, %296 : vector<16x32xf32>
    %298 = arith.mulf %295, %297 : vector<16x32xf32>
    %cst_111 = arith.constant dense<0.000000e+00> : vector<16xf32>
    %299 = vector.multi_reduction <add>, %298, %cst_111 [1] : vector<16x32xf32> to vector<16xf32>
    %300 = vector.shape_cast %299 : vector<16xf32> to vector<16x1xf32>
    %cst_112 = arith.constant 3.200000e+01 : f32
    %301 = vector.broadcast %cst_112 : f32 to vector<16x1xf32>
    %302 = arith.divf %300, %301 : vector<16x1xf32>
    %303 = vector.broadcast %293 : vector<16x1xf32> to vector<16x32xf32>
    %304 = arith.subf %287, %303 : vector<16x32xf32>
    %cst_113 = arith.constant 9.99999974E-6 : f32
    %305 = vector.broadcast %cst_113 : f32 to vector<16x1xf32>
    %306 = arith.addf %302, %305 : vector<16x1xf32>
    %307 = math.rsqrt %306 : vector<16x1xf32>
    %308 = vector.broadcast %307 : vector<16x1xf32> to vector<16x32xf32>
    %309 = arith.mulf %304, %308 : vector<16x32xf32>
    %310 = vector.broadcast %288 : vector<1x32xf32> to vector<16x32xf32>
    %311 = arith.mulf %309, %310 : vector<16x32xf32>
    %312 = vector.broadcast %289 : vector<1x32xf32> to vector<16x32xf32>
    %313 = arith.addf %311, %312 : vector<16x32xf32>
    %314 = arith.truncf %313 : vector<16x32xf32> to vector<16x32xbf16>
    %c0_114 = arith.constant 0 : index
    %c0_115 = arith.constant 0 : index
    %c0_116 = arith.constant 0 : index
    %315 = vector.load %arg17[%c0_114, %c0_115, %c0_116] : memref<2x32x128xbf16, #tpu.memory_space<vmem>>, vector<1x32x128xbf16>
    %316 = vector.shape_cast %315 : vector<1x32x128xbf16> to vector<32x128xbf16>
    %cst_117 = arith.constant dense<0.000000e+00> : vector<16x128xf32>
    %317 = tpu.matmul %314, %316, %cst_117 {dimension_numbers = #tpu.dot_dimension_numbers<[1], [0], [0], [1], [0, 0, 1, 1], [], []>} : vector<16x32xbf16>, vector<32x128xbf16>, vector<16x128xf32> -> vector<16x128xf32>
    %c0_118 = arith.constant 0 : index
    %c0_119 = arith.constant 0 : index
    %c0_120 = arith.constant 0 : index
    %318 = vector.load %arg18[%c0_118, %c0_119, %c0_120] : memref<2x1x128xf32, #tpu.memory_space<vmem>>, vector<1x1x128xf32>
    %319 = vector.shape_cast %318 : vector<1x1x128xf32> to vector<1x128xf32>
    %320 = vector.broadcast %319 : vector<1x128xf32> to vector<16x128xf32>
    %321 = arith.addf %317, %320 : vector<16x128xf32>
    %cst_121 = arith.constant 5.000000e-01 : f32
    %322 = vector.broadcast %cst_121 : f32 to vector<16x128xf32>
    %323 = arith.mulf %322, %321 : vector<16x128xf32>
    %cst_122 = arith.constant 0.707106769 : f32
    %324 = vector.broadcast %cst_122 : f32 to vector<16x128xf32>
    %325 = arith.mulf %321, %324 : vector<16x128xf32>
    %326 = math.erf %325 : vector<16x128xf32>
    %cst_123 = arith.constant 1.000000e+00 : f32
    %327 = vector.broadcast %cst_123 : f32 to vector<16x128xf32>
    %328 = arith.addf %327, %326 : vector<16x128xf32>
    %329 = arith.mulf %323, %328 : vector<16x128xf32>
    %330 = arith.truncf %329 : vector<16x128xf32> to vector<16x128xbf16>
    %c0_124 = arith.constant 0 : index
    %c0_125 = arith.constant 0 : index
    %c0_126 = arith.constant 0 : index
    %331 = vector.load %arg19[%c0_124, %c0_125, %c0_126] : memref<2x128x32xbf16, #tpu.memory_space<vmem>>, vector<1x128x32xbf16>
    %332 = vector.shape_cast %331 : vector<1x128x32xbf16> to vector<128x32xbf16>
    %cst_127 = arith.constant dense<0.000000e+00> : vector<16x32xf32>
    %333 = tpu.matmul %330, %332, %cst_127 {dimension_numbers = #tpu.dot_dimension_numbers<[1], [0], [0], [1], [0, 0, 1, 1], [], []>} : vector<16x128xbf16>, vector<128x32xbf16>, vector<16x32xf32> -> vector<16x32xf32>
    %334 = arith.addf %287, %333 : vector<16x32xf32>
    %c0_128 = arith.constant 0 : index
    %c0_129 = arith.constant 0 : index
    %c0_130 = arith.constant 0 : index
    %335 = vector.load %arg20[%c0_128, %c0_129, %c0_130] : memref<2x1x32xf32, #tpu.memory_space<vmem>>, vector<1x1x32xf32>
    %336 = vector.shape_cast %335 : vector<1x1x32xf32> to vector<1x32xf32>
    %337 = vector.broadcast %336 : vector<1x32xf32> to vector<16x32xf32>
    %338 = arith.addf %334, %337 : vector<16x32xf32>
    %c1 = arith.constant 1 : index
    %c0_131 = arith.constant 0 : index
    %c0_132 = arith.constant 0 : index
    %339 = vector.load %arg15[%c1, %c0_131, %c0_132] : memref<2x3x32xf32, #tpu.memory_space<vmem>>, vector<1x3x32xf32>
    %340 = vector.shape_cast %339 : vector<1x3x32xf32> to vector<3x32xf32>
    %c1_133 = arith.constant 1 : index
    %c0_134 = arith.constant 0 : index
    %c0_135 = arith.constant 0 : index
    %341 = vector.load %arg16[%c1_133, %c0_134, %c0_135] : memref<2x3x32xf32, #tpu.memory_space<vmem>>, vector<1x3x32xf32>
    %342 = vector.shape_cast %341 : vector<1x3x32xf32> to vector<3x32xf32>
    %343 = vector.extract_strided_slice %340 {offsets = [0, 0], sizes = [1, 32], strides = [1, 1]} : vector<3x32xf32> to vector<1x32xf32>
    %344 = vector.extract_strided_slice %342 {offsets = [0, 0], sizes = [1, 32], strides = [1, 1]} : vector<3x32xf32> to vector<1x32xf32>
    %cst_136 = arith.constant dense<0.000000e+00> : vector<16xf32>
    %345 = vector.multi_reduction <add>, %338, %cst_136 [1] : vector<16x32xf32> to vector<16xf32>
    %346 = vector.shape_cast %345 : vector<16xf32> to vector<16x1xf32>
    %cst_137 = arith.constant 3.200000e+01 : f32
    %347 = vector.broadcast %cst_137 : f32 to vector<16x1xf32>
    %348 = arith.divf %346, %347 : vector<16x1xf32>
    %349 = vector.broadcast %348 : vector<16x1xf32> to vector<16x32xf32>
    %350 = arith.subf %338, %349 : vector<16x32xf32>
    %351 = vector.broadcast %348 : vector<16x1xf32> to vector<16x32xf32>
    %352 = arith.subf %338, %351 : vector<16x32xf32>
    %353 = arith.mulf %350, %352 : vector<16x32xf32>
    %cst_138 = arith.constant dense<0.000000e+00> : vector<16xf32>
    %354 = vector.multi_reduction <add>, %353, %cst_138 [1] : vector<16x32xf32> to vector<16xf32>
    %355 = vector.shape_cast %354 : vector<16xf32> to vector<16x1xf32>
    %cst_139 = arith.constant 3.200000e+01 : f32
    %356 = vector.broadcast %cst_139 : f32 to vector<16x1xf32>
    %357 = arith.divf %355, %356 : vector<16x1xf32>
    %358 = vector.broadcast %348 : vector<16x1xf32> to vector<16x32xf32>
    %359 = arith.subf %338, %358 : vector<16x32xf32>
    %cst_140 = arith.constant 9.99999974E-6 : f32
    %360 = vector.broadcast %cst_140 : f32 to vector<16x1xf32>
    %361 = arith.addf %357, %360 : vector<16x1xf32>
    %362 = math.rsqrt %361 : vector<16x1xf32>
    %363 = vector.broadcast %362 : vector<16x1xf32> to vector<16x32xf32>
    %364 = arith.mulf %359, %363 : vector<16x32xf32>
    %365 = vector.broadcast %343 : vector<1x32xf32> to vector<16x32xf32>
    %366 = arith.mulf %364, %365 : vector<16x32xf32>
    %367 = vector.broadcast %344 : vector<1x32xf32> to vector<16x32xf32>
    %368 = arith.addf %366, %367 : vector<16x32xf32>
    %369 = arith.truncf %368 : vector<16x32xf32> to vector<16x32xbf16>
    %c1_141 = arith.constant 1 : index
    %c0_142 = arith.constant 0 : index
    %c0_143 = arith.constant 0 : index
    %370 = vector.load %arg10[%c1_141, %c0_142, %c0_143] : memref<2x32x96xbf16, #tpu.memory_space<vmem>>, vector<1x32x96xbf16>
    %371 = vector.shape_cast %370 : vector<1x32x96xbf16> to vector<32x96xbf16>
    %cst_144 = arith.constant dense<0.000000e+00> : vector<16x96xf32>
    %372 = tpu.matmul %369, %371, %cst_144 {dimension_numbers = #tpu.dot_dimension_numbers<[1], [0], [0], [1], [0, 0, 1, 1], [], []>} : vector<16x32xbf16>, vector<32x96xbf16>, vector<16x96xf32> -> vector<16x96xf32>
    %373 = vector.extract_strided_slice %372 {offsets = [0, 0], sizes = [16, 16], strides = [1, 1]} : vector<16x96xf32> to vector<16x16xf32>
    %374 = vector.extract_strided_slice %372 {offsets = [0, 16], sizes = [16, 16], strides = [1, 1]} : vector<16x96xf32> to vector<16x16xf32>
    %375 = vector.extract_strided_slice %372 {offsets = [0, 32], sizes = [16, 16], strides = [1, 1]} : vector<16x96xf32> to vector<16x16xf32>
    %376 = vector.extract_strided_slice %372 {offsets = [0, 48], sizes = [16, 16], strides = [1, 1]} : vector<16x96xf32> to vector<16x16xf32>
    %377 = vector.extract_strided_slice %372 {offsets = [0, 64], sizes = [16, 32], strides = [1, 1]} : vector<16x96xf32> to vector<16x32xf32>
    %378 = arith.truncf %377 : vector<16x32xf32> to vector<16x32xbf16>
    %379 = arith.mulf %373, %18 : vector<16x16xf32>
    %380 = arith.mulf %374, %19 : vector<16x16xf32>
    %381 = arith.subf %379, %380 : vector<16x16xf32>
    %382 = arith.truncf %381 : vector<16x16xf32> to vector<16x16xbf16>
    %383 = arith.mulf %374, %18 : vector<16x16xf32>
    %384 = arith.mulf %373, %19 : vector<16x16xf32>
    %385 = arith.addf %383, %384 : vector<16x16xf32>
    %386 = arith.truncf %385 : vector<16x16xf32> to vector<16x16xbf16>
    %387 = arith.mulf %375, %18 : vector<16x16xf32>
    %388 = arith.mulf %376, %19 : vector<16x16xf32>
    %389 = arith.subf %387, %388 : vector<16x16xf32>
    %390 = arith.truncf %389 : vector<16x16xf32> to vector<16x16xbf16>
    %391 = arith.mulf %376, %18 : vector<16x16xf32>
    %392 = arith.mulf %375, %19 : vector<16x16xf32>
    %393 = arith.addf %391, %392 : vector<16x16xf32>
    %394 = arith.truncf %393 : vector<16x16xf32> to vector<16x16xbf16>
    %395 = vector.extract_strided_slice %382 {offsets = [0, 0], sizes = [16, 4], strides = [1, 1]} : vector<16x16xbf16> to vector<16x4xbf16>
    %396 = vector.extract_strided_slice %390 {offsets = [0, 0], sizes = [16, 4], strides = [1, 1]} : vector<16x16xbf16> to vector<16x4xbf16>
    %cst_145 = arith.constant dense<0.000000e+00> : vector<16x16xf32>
    %397 = tpu.matmul %395, %396, %cst_145 {dimension_numbers = #tpu.dot_dimension_numbers<[1], [1], [0], [0], [0, 0, 1, 0], [], []>} : vector<16x4xbf16>, vector<16x4xbf16>, vector<16x16xf32> -> vector<16x16xf32>
    %398 = vector.extract_strided_slice %386 {offsets = [0, 0], sizes = [16, 4], strides = [1, 1]} : vector<16x16xbf16> to vector<16x4xbf16>
    %399 = vector.extract_strided_slice %394 {offsets = [0, 0], sizes = [16, 4], strides = [1, 1]} : vector<16x16xbf16> to vector<16x4xbf16>
    %cst_146 = arith.constant dense<0.000000e+00> : vector<16x16xf32>
    %400 = tpu.matmul %398, %399, %cst_146 {dimension_numbers = #tpu.dot_dimension_numbers<[1], [1], [0], [0], [0, 0, 1, 0], [], []>} : vector<16x4xbf16>, vector<16x4xbf16>, vector<16x16xf32> -> vector<16x16xf32>
    %401 = arith.addf %397, %400 : vector<16x16xf32>
    %402 = arith.addf %401, %20 : vector<16x16xf32>
    %cst_147 = arith.constant dense<0xFF800000> : vector<16xf32>
    %403 = vector.multi_reduction <maximumf>, %402, %cst_147 [1] : vector<16x16xf32> to vector<16xf32>
    %404 = vector.shape_cast %403 : vector<16xf32> to vector<16x1xf32>
    %405 = vector.broadcast %404 : vector<16x1xf32> to vector<16x16xf32>
    %406 = arith.subf %402, %405 : vector<16x16xf32>
    %407 = math.exp %406 : vector<16x16xf32>
    %cst_148 = arith.constant dense<0.000000e+00> : vector<16xf32>
    %408 = vector.multi_reduction <add>, %407, %cst_148 [1] : vector<16x16xf32> to vector<16xf32>
    %409 = vector.shape_cast %408 : vector<16xf32> to vector<16x1xf32>
    %410 = tpu.reciprocal %409 {approx = true} : vector<16x1xf32> -> vector<16x1xf32>
    %411 = vector.broadcast %410 : vector<16x1xf32> to vector<16x16xf32>
    %412 = arith.mulf %407, %411 : vector<16x16xf32>
    %413 = arith.truncf %412 : vector<16x16xf32> to vector<16x16xbf16>
    %414 = vector.extract_strided_slice %378 {offsets = [0, 0], sizes = [16, 8], strides = [1, 1]} : vector<16x32xbf16> to vector<16x8xbf16>
    %cst_149 = arith.constant dense<0.000000e+00> : vector<16x8xf32>
    %415 = tpu.matmul %413, %414, %cst_149 {dimension_numbers = #tpu.dot_dimension_numbers<[1], [0], [0], [1], [0, 0, 1, 1], [], []>} : vector<16x16xbf16>, vector<16x8xbf16>, vector<16x8xf32> -> vector<16x8xf32>
    %c0_150 = arith.constant 0 : index
    %c0_151 = arith.constant 0 : index
    %416 = vector.load %arg26[%c0_150, %c0_151] : memref<16x32xf32, #tpu.memory_space<vmem>>, vector<16x8xf32>
    tpu.vector_store %arg26[%c0_150, %c0_151], %415 {strides = array<i32>} : memref<16x32xf32, #tpu.memory_space<vmem>>, vector<16x8xf32>,
    %417 = vector.extract_strided_slice %382 {offsets = [0, 4], sizes = [16, 4], strides = [1, 1]} : vector<16x16xbf16> to vector<16x4xbf16>
    %418 = vector.extract_strided_slice %390 {offsets = [0, 4], sizes = [16, 4], strides = [1, 1]} : vector<16x16xbf16> to vector<16x4xbf16>
    %cst_152 = arith.constant dense<0.000000e+00> : vector<16x16xf32>
    %419 = tpu.matmul %417, %418, %cst_152 {dimension_numbers = #tpu.dot_dimension_numbers<[1], [1], [0], [0], [0, 0, 1, 0], [], []>} : vector<16x4xbf16>, vector<16x4xbf16>, vector<16x16xf32> -> vector<16x16xf32>
    %420 = vector.extract_strided_slice %386 {offsets = [0, 4], sizes = [16, 4], strides = [1, 1]} : vector<16x16xbf16> to vector<16x4xbf16>
    %421 = vector.extract_strided_slice %394 {offsets = [0, 4], sizes = [16, 4], strides = [1, 1]} : vector<16x16xbf16> to vector<16x4xbf16>
    %cst_153 = arith.constant dense<0.000000e+00> : vector<16x16xf32>
    %422 = tpu.matmul %420, %421, %cst_153 {dimension_numbers = #tpu.dot_dimension_numbers<[1], [1], [0], [0], [0, 0, 1, 0], [], []>} : vector<16x4xbf16>, vector<16x4xbf16>, vector<16x16xf32> -> vector<16x16xf32>
    %423 = arith.addf %419, %422 : vector<16x16xf32>
    %424 = arith.addf %423, %20 : vector<16x16xf32>
    %cst_154 = arith.constant dense<0xFF800000> : vector<16xf32>
    %425 = vector.multi_reduction <maximumf>, %424, %cst_154 [1] : vector<16x16xf32> to vector<16xf32>
    %426 = vector.shape_cast %425 : vector<16xf32> to vector<16x1xf32>
    %427 = vector.broadcast %426 : vector<16x1xf32> to vector<16x16xf32>
    %428 = arith.subf %424, %427 : vector<16x16xf32>
    %429 = math.exp %428 : vector<16x16xf32>
    %cst_155 = arith.constant dense<0.000000e+00> : vector<16xf32>
    %430 = vector.multi_reduction <add>, %429, %cst_155 [1] : vector<16x16xf32> to vector<16xf32>
    %431 = vector.shape_cast %430 : vector<16xf32> to vector<16x1xf32>
    %432 = tpu.reciprocal %431 {approx = true} : vector<16x1xf32> -> vector<16x1xf32>
    %433 = vector.broadcast %432 : vector<16x1xf32> to vector<16x16xf32>
    %434 = arith.mulf %429, %433 : vector<16x16xf32>
    %435 = arith.truncf %434 : vector<16x16xf32> to vector<16x16xbf16>
    %436 = vector.extract_strided_slice %378 {offsets = [0, 8], sizes = [16, 8], strides = [1, 1]} : vector<16x32xbf16> to vector<16x8xbf16>
    %cst_156 = arith.constant dense<0.000000e+00> : vector<16x8xf32>
    %437 = tpu.matmul %435, %436, %cst_156 {dimension_numbers = #tpu.dot_dimension_numbers<[1], [0], [0], [1], [0, 0, 1, 1], [], []>} : vector<16x16xbf16>, vector<16x8xbf16>, vector<16x8xf32> -> vector<16x8xf32>
    %c0_157 = arith.constant 0 : index
    %c8_158 = arith.constant 8 : index
    %438 = vector.load %arg26[%c0_157, %c8_158] : memref<16x32xf32, #tpu.memory_space<vmem>>, vector<16x8xf32>
    tpu.vector_store %arg26[%c0_157, %c8_158], %437 {strides = array<i32>} : memref<16x32xf32, #tpu.memory_space<vmem>>, vector<16x8xf32>,
    %439 = vector.extract_strided_slice %382 {offsets = [0, 8], sizes = [16, 4], strides = [1, 1]} : vector<16x16xbf16> to vector<16x4xbf16>
    %440 = vector.extract_strided_slice %390 {offsets = [0, 8], sizes = [16, 4], strides = [1, 1]} : vector<16x16xbf16> to vector<16x4xbf16>
    %cst_159 = arith.constant dense<0.000000e+00> : vector<16x16xf32>
    %441 = tpu.matmul %439, %440, %cst_159 {dimension_numbers = #tpu.dot_dimension_numbers<[1], [1], [0], [0], [0, 0, 1, 0], [], []>} : vector<16x4xbf16>, vector<16x4xbf16>, vector<16x16xf32> -> vector<16x16xf32>
    %442 = vector.extract_strided_slice %386 {offsets = [0, 8], sizes = [16, 4], strides = [1, 1]} : vector<16x16xbf16> to vector<16x4xbf16>
    %443 = vector.extract_strided_slice %394 {offsets = [0, 8], sizes = [16, 4], strides = [1, 1]} : vector<16x16xbf16> to vector<16x4xbf16>
    %cst_160 = arith.constant dense<0.000000e+00> : vector<16x16xf32>
    %444 = tpu.matmul %442, %443, %cst_160 {dimension_numbers = #tpu.dot_dimension_numbers<[1], [1], [0], [0], [0, 0, 1, 0], [], []>} : vector<16x4xbf16>, vector<16x4xbf16>, vector<16x16xf32> -> vector<16x16xf32>
    %445 = arith.addf %441, %444 : vector<16x16xf32>
    %446 = arith.addf %445, %20 : vector<16x16xf32>
    %cst_161 = arith.constant dense<0xFF800000> : vector<16xf32>
    %447 = vector.multi_reduction <maximumf>, %446, %cst_161 [1] : vector<16x16xf32> to vector<16xf32>
    %448 = vector.shape_cast %447 : vector<16xf32> to vector<16x1xf32>
    %449 = vector.broadcast %448 : vector<16x1xf32> to vector<16x16xf32>
    %450 = arith.subf %446, %449 : vector<16x16xf32>
    %451 = math.exp %450 : vector<16x16xf32>
    %cst_162 = arith.constant dense<0.000000e+00> : vector<16xf32>
    %452 = vector.multi_reduction <add>, %451, %cst_162 [1] : vector<16x16xf32> to vector<16xf32>
    %453 = vector.shape_cast %452 : vector<16xf32> to vector<16x1xf32>
    %454 = tpu.reciprocal %453 {approx = true} : vector<16x1xf32> -> vector<16x1xf32>
    %455 = vector.broadcast %454 : vector<16x1xf32> to vector<16x16xf32>
    %456 = arith.mulf %451, %455 : vector<16x16xf32>
    %457 = arith.truncf %456 : vector<16x16xf32> to vector<16x16xbf16>
    %458 = vector.extract_strided_slice %378 {offsets = [0, 16], sizes = [16, 8], strides = [1, 1]} : vector<16x32xbf16> to vector<16x8xbf16>
    %cst_163 = arith.constant dense<0.000000e+00> : vector<16x8xf32>
    %459 = tpu.matmul %457, %458, %cst_163 {dimension_numbers = #tpu.dot_dimension_numbers<[1], [0], [0], [1], [0, 0, 1, 1], [], []>} : vector<16x16xbf16>, vector<16x8xbf16>, vector<16x8xf32> -> vector<16x8xf32>
    %c0_164 = arith.constant 0 : index
    %c16_165 = arith.constant 16 : index
    %460 = vector.load %arg26[%c0_164, %c16_165] : memref<16x32xf32, #tpu.memory_space<vmem>>, vector<16x8xf32>
    tpu.vector_store %arg26[%c0_164, %c16_165], %459 {strides = array<i32>} : memref<16x32xf32, #tpu.memory_space<vmem>>, vector<16x8xf32>,
    %461 = vector.extract_strided_slice %382 {offsets = [0, 12], sizes = [16, 4], strides = [1, 1]} : vector<16x16xbf16> to vector<16x4xbf16>
    %462 = vector.extract_strided_slice %390 {offsets = [0, 12], sizes = [16, 4], strides = [1, 1]} : vector<16x16xbf16> to vector<16x4xbf16>
    %cst_166 = arith.constant dense<0.000000e+00> : vector<16x16xf32>
    %463 = tpu.matmul %461, %462, %cst_166 {dimension_numbers = #tpu.dot_dimension_numbers<[1], [1], [0], [0], [0, 0, 1, 0], [], []>} : vector<16x4xbf16>, vector<16x4xbf16>, vector<16x16xf32> -> vector<16x16xf32>
    %464 = vector.extract_strided_slice %386 {offsets = [0, 12], sizes = [16, 4], strides = [1, 1]} : vector<16x16xbf16> to vector<16x4xbf16>
    %465 = vector.extract_strided_slice %394 {offsets = [0, 12], sizes = [16, 4], strides = [1, 1]} : vector<16x16xbf16> to vector<16x4xbf16>
    %cst_167 = arith.constant dense<0.000000e+00> : vector<16x16xf32>
    %466 = tpu.matmul %464, %465, %cst_167 {dimension_numbers = #tpu.dot_dimension_numbers<[1], [1], [0], [0], [0, 0, 1, 0], [], []>} : vector<16x4xbf16>, vector<16x4xbf16>, vector<16x16xf32> -> vector<16x16xf32>
    %467 = arith.addf %463, %466 : vector<16x16xf32>
    %468 = arith.addf %467, %20 : vector<16x16xf32>
    %cst_168 = arith.constant dense<0xFF800000> : vector<16xf32>
    %469 = vector.multi_reduction <maximumf>, %468, %cst_168 [1] : vector<16x16xf32> to vector<16xf32>
    %470 = vector.shape_cast %469 : vector<16xf32> to vector<16x1xf32>
    %471 = vector.broadcast %470 : vector<16x1xf32> to vector<16x16xf32>
    %472 = arith.subf %468, %471 : vector<16x16xf32>
    %473 = math.exp %472 : vector<16x16xf32>
    %cst_169 = arith.constant dense<0.000000e+00> : vector<16xf32>
    %474 = vector.multi_reduction <add>, %473, %cst_169 [1] : vector<16x16xf32> to vector<16xf32>
    %475 = vector.shape_cast %474 : vector<16xf32> to vector<16x1xf32>
    %476 = tpu.reciprocal %475 {approx = true} : vector<16x1xf32> -> vector<16x1xf32>
    %477 = vector.broadcast %476 : vector<16x1xf32> to vector<16x16xf32>
    %478 = arith.mulf %473, %477 : vector<16x16xf32>
    %479 = arith.truncf %478 : vector<16x16xf32> to vector<16x16xbf16>
    %480 = vector.extract_strided_slice %378 {offsets = [0, 24], sizes = [16, 8], strides = [1, 1]} : vector<16x32xbf16> to vector<16x8xbf16>
    %cst_170 = arith.constant dense<0.000000e+00> : vector<16x8xf32>
    %481 = tpu.matmul %479, %480, %cst_170 {dimension_numbers = #tpu.dot_dimension_numbers<[1], [0], [0], [1], [0, 0, 1, 1], [], []>} : vector<16x16xbf16>, vector<16x8xbf16>, vector<16x8xf32> -> vector<16x8xf32>
    %c0_171 = arith.constant 0 : index
    %c24_172 = arith.constant 24 : index
    %482 = vector.load %arg26[%c0_171, %c24_172] : memref<16x32xf32, #tpu.memory_space<vmem>>, vector<16x8xf32>
    tpu.vector_store %arg26[%c0_171, %c24_172], %481 {strides = array<i32>} : memref<16x32xf32, #tpu.memory_space<vmem>>, vector<16x8xf32>,
    %c0_173 = arith.constant 0 : index
    %c0_174 = arith.constant 0 : index
    %483 = vector.load %arg26[%c0_173, %c0_174] : memref<16x32xf32, #tpu.memory_space<vmem>>, vector<16x32xf32>
    %484 = arith.truncf %483 : vector<16x32xf32> to vector<16x32xbf16>
    %c1_175 = arith.constant 1 : index
    %c0_176 = arith.constant 0 : index
    %c0_177 = arith.constant 0 : index
    %485 = vector.load %arg11[%c1_175, %c0_176, %c0_177] : memref<2x32x32xbf16, #tpu.memory_space<vmem>>, vector<1x32x32xbf16>
    %486 = vector.shape_cast %485 : vector<1x32x32xbf16> to vector<32x32xbf16>
    %cst_178 = arith.constant dense<0.000000e+00> : vector<16x32xf32>
    %487 = tpu.matmul %484, %486, %cst_178 {dimension_numbers = #tpu.dot_dimension_numbers<[1], [0], [0], [1], [0, 0, 1, 1], [], []>} : vector<16x32xbf16>, vector<32x32xbf16>, vector<16x32xf32> -> vector<16x32xf32>
    %488 = arith.addf %338, %487 : vector<16x32xf32>
    %489 = vector.extract_strided_slice %340 {offsets = [1, 0], sizes = [1, 32], strides = [1, 1]} : vector<3x32xf32> to vector<1x32xf32>
    %490 = vector.extract_strided_slice %342 {offsets = [1, 0], sizes = [1, 32], strides = [1, 1]} : vector<3x32xf32> to vector<1x32xf32>
    %cst_179 = arith.constant dense<0.000000e+00> : vector<16xf32>
    %491 = vector.multi_reduction <add>, %488, %cst_179 [1] : vector<16x32xf32> to vector<16xf32>
    %492 = vector.shape_cast %491 : vector<16xf32> to vector<16x1xf32>
    %cst_180 = arith.constant 3.200000e+01 : f32
    %493 = vector.broadcast %cst_180 : f32 to vector<16x1xf32>
    %494 = arith.divf %492, %493 : vector<16x1xf32>
    %495 = vector.broadcast %494 : vector<16x1xf32> to vector<16x32xf32>
    %496 = arith.subf %488, %495 : vector<16x32xf32>
    %497 = vector.broadcast %494 : vector<16x1xf32> to vector<16x32xf32>
    %498 = arith.subf %488, %497 : vector<16x32xf32>
    %499 = arith.mulf %496, %498 : vector<16x32xf32>
    %cst_181 = arith.constant dense<0.000000e+00> : vector<16xf32>
    %500 = vector.multi_reduction <add>, %499, %cst_181 [1] : vector<16x32xf32> to vector<16xf32>
    %501 = vector.shape_cast %500 : vector<16xf32> to vector<16x1xf32>
    %cst_182 = arith.constant 3.200000e+01 : f32
    %502 = vector.broadcast %cst_182 : f32 to vector<16x1xf32>
    %503 = arith.divf %501, %502 : vector<16x1xf32>
    %504 = vector.broadcast %494 : vector<16x1xf32> to vector<16x32xf32>
    %505 = arith.subf %488, %504 : vector<16x32xf32>
    %cst_183 = arith.constant 9.99999974E-6 : f32
    %506 = vector.broadcast %cst_183 : f32 to vector<16x1xf32>
    %507 = arith.addf %503, %506 : vector<16x1xf32>
    %508 = math.rsqrt %507 : vector<16x1xf32>
    %509 = vector.broadcast %508 : vector<16x1xf32> to vector<16x32xf32>
    %510 = arith.mulf %505, %509 : vector<16x32xf32>
    %511 = vector.broadcast %489 : vector<1x32xf32> to vector<16x32xf32>
    %512 = arith.mulf %510, %511 : vector<16x32xf32>
    %513 = vector.broadcast %490 : vector<1x32xf32> to vector<16x32xf32>
    %514 = arith.addf %512, %513 : vector<16x32xf32>
    %515 = arith.truncf %514 : vector<16x32xf32> to vector<16x32xbf16>
    %c1_184 = arith.constant 1 : index
    %c0_185 = arith.constant 0 : index
    %c0_186 = arith.constant 0 : index
    %516 = vector.load %arg12[%c1_184, %c0_185, %c0_186] : memref<2x32x32xbf16, #tpu.memory_space<vmem>>, vector<1x32x32xbf16>
    %517 = vector.shape_cast %516 : vector<1x32x32xbf16> to vector<32x32xbf16>
    %cst_187 = arith.constant dense<0.000000e+00> : vector<16x32xf32>
    %518 = tpu.matmul %515, %517, %cst_187 {dimension_numbers = #tpu.dot_dimension_numbers<[1], [0], [0], [1], [0, 0, 1, 1], [], []>} : vector<16x32xbf16>, vector<32x32xbf16>, vector<16x32xf32> -> vector<16x32xf32>
    %519 = arith.truncf %518 : vector<16x32xf32> to vector<16x32xbf16>
    %c1_188 = arith.constant 1 : index
    %c0_189 = arith.constant 0 : index
    %c0_190 = arith.constant 0 : index
    %520 = vector.load %arg13[%c1_188, %c0_189, %c0_190] : memref<2x32x64xbf16, #tpu.memory_space<vmem>>, vector<1x32x64xbf16>
    %521 = vector.shape_cast %520 : vector<1x32x64xbf16> to vector<32x64xbf16>
    %cst_191 = arith.constant dense<0.000000e+00> : vector<32x64xf32>
    %522 = tpu.matmul %15, %521, %cst_191 {dimension_numbers = #tpu.dot_dimension_numbers<[1], [0], [0], [1], [0, 0, 1, 1], [], []>} : vector<32x32xbf16>, vector<32x64xbf16>, vector<32x64xf32> -> vector<32x64xf32>
    %523 = vector.extract_strided_slice %522 {offsets = [0, 0], sizes = [32, 32], strides = [1, 1]} : vector<32x64xf32> to vector<32x32xf32>
    %524 = arith.truncf %523 : vector<32x32xf32> to vector<32x32xbf16>
    %525 = vector.extract_strided_slice %522 {offsets = [0, 32], sizes = [32, 32], strides = [1, 1]} : vector<32x64xf32> to vector<32x32xf32>
    %526 = arith.truncf %525 : vector<32x32xf32> to vector<32x32xbf16>
    %527 = vector.extract_strided_slice %519 {offsets = [0, 0], sizes = [16, 8], strides = [1, 1]} : vector<16x32xbf16> to vector<16x8xbf16>
    %528 = vector.extract_strided_slice %524 {offsets = [0, 0], sizes = [32, 8], strides = [1, 1]} : vector<32x32xbf16> to vector<32x8xbf16>
    %cst_192 = arith.constant dense<0.000000e+00> : vector<16x32xf32>
    %529 = tpu.matmul %527, %528, %cst_192 {dimension_numbers = #tpu.dot_dimension_numbers<[1], [1], [0], [0], [0, 0, 1, 0], [], []>} : vector<16x8xbf16>, vector<32x8xbf16>, vector<16x32xf32> -> vector<16x32xf32>
    %530 = arith.addf %529, %21 : vector<16x32xf32>
    %cst_193 = arith.constant dense<0xFF800000> : vector<16xf32>
    %531 = vector.multi_reduction <maximumf>, %530, %cst_193 [1] : vector<16x32xf32> to vector<16xf32>
    %532 = vector.shape_cast %531 : vector<16xf32> to vector<16x1xf32>
    %533 = vector.broadcast %532 : vector<16x1xf32> to vector<16x32xf32>
    %534 = arith.subf %530, %533 : vector<16x32xf32>
    %535 = math.exp %534 : vector<16x32xf32>
    %cst_194 = arith.constant dense<0.000000e+00> : vector<16xf32>
    %536 = vector.multi_reduction <add>, %535, %cst_194 [1] : vector<16x32xf32> to vector<16xf32>
    %537 = vector.shape_cast %536 : vector<16xf32> to vector<16x1xf32>
    %538 = tpu.reciprocal %537 {approx = true} : vector<16x1xf32> -> vector<16x1xf32>
    %539 = vector.broadcast %538 : vector<16x1xf32> to vector<16x32xf32>
    %540 = arith.mulf %535, %539 : vector<16x32xf32>
    %541 = arith.truncf %540 : vector<16x32xf32> to vector<16x32xbf16>
    %542 = vector.extract_strided_slice %526 {offsets = [0, 0], sizes = [32, 8], strides = [1, 1]} : vector<32x32xbf16> to vector<32x8xbf16>
    %cst_195 = arith.constant dense<0.000000e+00> : vector<16x8xf32>
    %543 = tpu.matmul %541, %542, %cst_195 {dimension_numbers = #tpu.dot_dimension_numbers<[1], [0], [0], [1], [0, 0, 1, 1], [], []>} : vector<16x32xbf16>, vector<32x8xbf16>, vector<16x8xf32> -> vector<16x8xf32>
    %c0_196 = arith.constant 0 : index
    %c0_197 = arith.constant 0 : index
    %544 = vector.load %arg26[%c0_196, %c0_197] : memref<16x32xf32, #tpu.memory_space<vmem>>, vector<16x8xf32>
    tpu.vector_store %arg26[%c0_196, %c0_197], %543 {strides = array<i32>} : memref<16x32xf32, #tpu.memory_space<vmem>>, vector<16x8xf32>,
    %545 = vector.extract_strided_slice %519 {offsets = [0, 8], sizes = [16, 8], strides = [1, 1]} : vector<16x32xbf16> to vector<16x8xbf16>
    %546 = vector.extract_strided_slice %524 {offsets = [0, 8], sizes = [32, 8], strides = [1, 1]} : vector<32x32xbf16> to vector<32x8xbf16>
    %cst_198 = arith.constant dense<0.000000e+00> : vector<16x32xf32>
    %547 = tpu.matmul %545, %546, %cst_198 {dimension_numbers = #tpu.dot_dimension_numbers<[1], [1], [0], [0], [0, 0, 1, 0], [], []>} : vector<16x8xbf16>, vector<32x8xbf16>, vector<16x32xf32> -> vector<16x32xf32>
    %548 = arith.addf %547, %21 : vector<16x32xf32>
    %cst_199 = arith.constant dense<0xFF800000> : vector<16xf32>
    %549 = vector.multi_reduction <maximumf>, %548, %cst_199 [1] : vector<16x32xf32> to vector<16xf32>
    %550 = vector.shape_cast %549 : vector<16xf32> to vector<16x1xf32>
    %551 = vector.broadcast %550 : vector<16x1xf32> to vector<16x32xf32>
    %552 = arith.subf %548, %551 : vector<16x32xf32>
    %553 = math.exp %552 : vector<16x32xf32>
    %cst_200 = arith.constant dense<0.000000e+00> : vector<16xf32>
    %554 = vector.multi_reduction <add>, %553, %cst_200 [1] : vector<16x32xf32> to vector<16xf32>
    %555 = vector.shape_cast %554 : vector<16xf32> to vector<16x1xf32>
    %556 = tpu.reciprocal %555 {approx = true} : vector<16x1xf32> -> vector<16x1xf32>
    %557 = vector.broadcast %556 : vector<16x1xf32> to vector<16x32xf32>
    %558 = arith.mulf %553, %557 : vector<16x32xf32>
    %559 = arith.truncf %558 : vector<16x32xf32> to vector<16x32xbf16>
    %560 = vector.extract_strided_slice %526 {offsets = [0, 8], sizes = [32, 8], strides = [1, 1]} : vector<32x32xbf16> to vector<32x8xbf16>
    %cst_201 = arith.constant dense<0.000000e+00> : vector<16x8xf32>
    %561 = tpu.matmul %559, %560, %cst_201 {dimension_numbers = #tpu.dot_dimension_numbers<[1], [0], [0], [1], [0, 0, 1, 1], [], []>} : vector<16x32xbf16>, vector<32x8xbf16>, vector<16x8xf32> -> vector<16x8xf32>
    %c0_202 = arith.constant 0 : index
    %c8_203 = arith.constant 8 : index
    %562 = vector.load %arg26[%c0_202, %c8_203] : memref<16x32xf32, #tpu.memory_space<vmem>>, vector<16x8xf32>
    tpu.vector_store %arg26[%c0_202, %c8_203], %561 {strides = array<i32>} : memref<16x32xf32, #tpu.memory_space<vmem>>, vector<16x8xf32>,
    %563 = vector.extract_strided_slice %519 {offsets = [0, 16], sizes = [16, 8], strides = [1, 1]} : vector<16x32xbf16> to vector<16x8xbf16>
    %564 = vector.extract_strided_slice %524 {offsets = [0, 16], sizes = [32, 8], strides = [1, 1]} : vector<32x32xbf16> to vector<32x8xbf16>
    %cst_204 = arith.constant dense<0.000000e+00> : vector<16x32xf32>
    %565 = tpu.matmul %563, %564, %cst_204 {dimension_numbers = #tpu.dot_dimension_numbers<[1], [1], [0], [0], [0, 0, 1, 0], [], []>} : vector<16x8xbf16>, vector<32x8xbf16>, vector<16x32xf32> -> vector<16x32xf32>
    %566 = arith.addf %565, %21 : vector<16x32xf32>
    %cst_205 = arith.constant dense<0xFF800000> : vector<16xf32>
    %567 = vector.multi_reduction <maximumf>, %566, %cst_205 [1] : vector<16x32xf32> to vector<16xf32>
    %568 = vector.shape_cast %567 : vector<16xf32> to vector<16x1xf32>
    %569 = vector.broadcast %568 : vector<16x1xf32> to vector<16x32xf32>
    %570 = arith.subf %566, %569 : vector<16x32xf32>
    %571 = math.exp %570 : vector<16x32xf32>
    %cst_206 = arith.constant dense<0.000000e+00> : vector<16xf32>
    %572 = vector.multi_reduction <add>, %571, %cst_206 [1] : vector<16x32xf32> to vector<16xf32>
    %573 = vector.shape_cast %572 : vector<16xf32> to vector<16x1xf32>
    %574 = tpu.reciprocal %573 {approx = true} : vector<16x1xf32> -> vector<16x1xf32>
    %575 = vector.broadcast %574 : vector<16x1xf32> to vector<16x32xf32>
    %576 = arith.mulf %571, %575 : vector<16x32xf32>
    %577 = arith.truncf %576 : vector<16x32xf32> to vector<16x32xbf16>
    %578 = vector.extract_strided_slice %526 {offsets = [0, 16], sizes = [32, 8], strides = [1, 1]} : vector<32x32xbf16> to vector<32x8xbf16>
    %cst_207 = arith.constant dense<0.000000e+00> : vector<16x8xf32>
    %579 = tpu.matmul %577, %578, %cst_207 {dimension_numbers = #tpu.dot_dimension_numbers<[1], [0], [0], [1], [0, 0, 1, 1], [], []>} : vector<16x32xbf16>, vector<32x8xbf16>, vector<16x8xf32> -> vector<16x8xf32>
    %c0_208 = arith.constant 0 : index
    %c16_209 = arith.constant 16 : index
    %580 = vector.load %arg26[%c0_208, %c16_209] : memref<16x32xf32, #tpu.memory_space<vmem>>, vector<16x8xf32>
    tpu.vector_store %arg26[%c0_208, %c16_209], %579 {strides = array<i32>} : memref<16x32xf32, #tpu.memory_space<vmem>>, vector<16x8xf32>,
    %581 = vector.extract_strided_slice %519 {offsets = [0, 24], sizes = [16, 8], strides = [1, 1]} : vector<16x32xbf16> to vector<16x8xbf16>
    %582 = vector.extract_strided_slice %524 {offsets = [0, 24], sizes = [32, 8], strides = [1, 1]} : vector<32x32xbf16> to vector<32x8xbf16>
    %cst_210 = arith.constant dense<0.000000e+00> : vector<16x32xf32>
    %583 = tpu.matmul %581, %582, %cst_210 {dimension_numbers = #tpu.dot_dimension_numbers<[1], [1], [0], [0], [0, 0, 1, 0], [], []>} : vector<16x8xbf16>, vector<32x8xbf16>, vector<16x32xf32> -> vector<16x32xf32>
    %584 = arith.addf %583, %21 : vector<16x32xf32>
    %cst_211 = arith.constant dense<0xFF800000> : vector<16xf32>
    %585 = vector.multi_reduction <maximumf>, %584, %cst_211 [1] : vector<16x32xf32> to vector<16xf32>
    %586 = vector.shape_cast %585 : vector<16xf32> to vector<16x1xf32>
    %587 = vector.broadcast %586 : vector<16x1xf32> to vector<16x32xf32>
    %588 = arith.subf %584, %587 : vector<16x32xf32>
    %589 = math.exp %588 : vector<16x32xf32>
    %cst_212 = arith.constant dense<0.000000e+00> : vector<16xf32>
    %590 = vector.multi_reduction <add>, %589, %cst_212 [1] : vector<16x32xf32> to vector<16xf32>
    %591 = vector.shape_cast %590 : vector<16xf32> to vector<16x1xf32>
    %592 = tpu.reciprocal %591 {approx = true} : vector<16x1xf32> -> vector<16x1xf32>
    %593 = vector.broadcast %592 : vector<16x1xf32> to vector<16x32xf32>
    %594 = arith.mulf %589, %593 : vector<16x32xf32>
    %595 = arith.truncf %594 : vector<16x32xf32> to vector<16x32xbf16>
    %596 = vector.extract_strided_slice %526 {offsets = [0, 24], sizes = [32, 8], strides = [1, 1]} : vector<32x32xbf16> to vector<32x8xbf16>
    %cst_213 = arith.constant dense<0.000000e+00> : vector<16x8xf32>
    %597 = tpu.matmul %595, %596, %cst_213 {dimension_numbers = #tpu.dot_dimension_numbers<[1], [0], [0], [1], [0, 0, 1, 1], [], []>} : vector<16x32xbf16>, vector<32x8xbf16>, vector<16x8xf32> -> vector<16x8xf32>
    %c0_214 = arith.constant 0 : index
    %c24_215 = arith.constant 24 : index
    %598 = vector.load %arg26[%c0_214, %c24_215] : memref<16x32xf32, #tpu.memory_space<vmem>>, vector<16x8xf32>
    tpu.vector_store %arg26[%c0_214, %c24_215], %597 {strides = array<i32>} : memref<16x32xf32, #tpu.memory_space<vmem>>, vector<16x8xf32>,
    %c0_216 = arith.constant 0 : index
    %c0_217 = arith.constant 0 : index
    %599 = vector.load %arg26[%c0_216, %c0_217] : memref<16x32xf32, #tpu.memory_space<vmem>>, vector<16x32xf32>
    %600 = arith.truncf %599 : vector<16x32xf32> to vector<16x32xbf16>
    %c1_218 = arith.constant 1 : index
    %c0_219 = arith.constant 0 : index
    %c0_220 = arith.constant 0 : index
    %601 = vector.load %arg14[%c1_218, %c0_219, %c0_220] : memref<2x32x32xbf16, #tpu.memory_space<vmem>>, vector<1x32x32xbf16>
    %602 = vector.shape_cast %601 : vector<1x32x32xbf16> to vector<32x32xbf16>
    %cst_221 = arith.constant dense<0.000000e+00> : vector<16x32xf32>
    %603 = tpu.matmul %600, %602, %cst_221 {dimension_numbers = #tpu.dot_dimension_numbers<[1], [0], [0], [1], [0, 0, 1, 1], [], []>} : vector<16x32xbf16>, vector<32x32xbf16>, vector<16x32xf32> -> vector<16x32xf32>
    %604 = arith.addf %488, %603 : vector<16x32xf32>
    %605 = vector.extract_strided_slice %340 {offsets = [2, 0], sizes = [1, 32], strides = [1, 1]} : vector<3x32xf32> to vector<1x32xf32>
    %606 = vector.extract_strided_slice %342 {offsets = [2, 0], sizes = [1, 32], strides = [1, 1]} : vector<3x32xf32> to vector<1x32xf32>
    %cst_222 = arith.constant dense<0.000000e+00> : vector<16xf32>
    %607 = vector.multi_reduction <add>, %604, %cst_222 [1] : vector<16x32xf32> to vector<16xf32>
    %608 = vector.shape_cast %607 : vector<16xf32> to vector<16x1xf32>
    %cst_223 = arith.constant 3.200000e+01 : f32
    %609 = vector.broadcast %cst_223 : f32 to vector<16x1xf32>
    %610 = arith.divf %608, %609 : vector<16x1xf32>
    %611 = vector.broadcast %610 : vector<16x1xf32> to vector<16x32xf32>
    %612 = arith.subf %604, %611 : vector<16x32xf32>
    %613 = vector.broadcast %610 : vector<16x1xf32> to vector<16x32xf32>
    %614 = arith.subf %604, %613 : vector<16x32xf32>
    %615 = arith.mulf %612, %614 : vector<16x32xf32>
    %cst_224 = arith.constant dense<0.000000e+00> : vector<16xf32>
    %616 = vector.multi_reduction <add>, %615, %cst_224 [1] : vector<16x32xf32> to vector<16xf32>
    %617 = vector.shape_cast %616 : vector<16xf32> to vector<16x1xf32>
    %cst_225 = arith.constant 3.200000e+01 : f32
    %618 = vector.broadcast %cst_225 : f32 to vector<16x1xf32>
    %619 = arith.divf %617, %618 : vector<16x1xf32>
    %620 = vector.broadcast %610 : vector<16x1xf32> to vector<16x32xf32>
    %621 = arith.subf %604, %620 : vector<16x32xf32>
    %cst_226 = arith.constant 9.99999974E-6 : f32
    %622 = vector.broadcast %cst_226 : f32 to vector<16x1xf32>
    %623 = arith.addf %619, %622 : vector<16x1xf32>
    %624 = math.rsqrt %623 : vector<16x1xf32>
    %625 = vector.broadcast %624 : vector<16x1xf32> to vector<16x32xf32>
    %626 = arith.mulf %621, %625 : vector<16x32xf32>
    %627 = vector.broadcast %605 : vector<1x32xf32> to vector<16x32xf32>
    %628 = arith.mulf %626, %627 : vector<16x32xf32>
    %629 = vector.broadcast %606 : vector<1x32xf32> to vector<16x32xf32>
    %630 = arith.addf %628, %629 : vector<16x32xf32>
    %631 = arith.truncf %630 : vector<16x32xf32> to vector<16x32xbf16>
    %c1_227 = arith.constant 1 : index
    %c0_228 = arith.constant 0 : index
    %c0_229 = arith.constant 0 : index
    %632 = vector.load %arg17[%c1_227, %c0_228, %c0_229] : memref<2x32x128xbf16, #tpu.memory_space<vmem>>, vector<1x32x128xbf16>
    %633 = vector.shape_cast %632 : vector<1x32x128xbf16> to vector<32x128xbf16>
    %cst_230 = arith.constant dense<0.000000e+00> : vector<16x128xf32>
    %634 = tpu.matmul %631, %633, %cst_230 {dimension_numbers = #tpu.dot_dimension_numbers<[1], [0], [0], [1], [0, 0, 1, 1], [], []>} : vector<16x32xbf16>, vector<32x128xbf16>, vector<16x128xf32> -> vector<16x128xf32>
    %c1_231 = arith.constant 1 : index
    %c0_232 = arith.constant 0 : index
    %c0_233 = arith.constant 0 : index
    %635 = vector.load %arg18[%c1_231, %c0_232, %c0_233] : memref<2x1x128xf32, #tpu.memory_space<vmem>>, vector<1x1x128xf32>
    %636 = vector.shape_cast %635 : vector<1x1x128xf32> to vector<1x128xf32>
    %637 = vector.broadcast %636 : vector<1x128xf32> to vector<16x128xf32>
    %638 = arith.addf %634, %637 : vector<16x128xf32>
    %cst_234 = arith.constant 5.000000e-01 : f32
    %639 = vector.broadcast %cst_234 : f32 to vector<16x128xf32>
    %640 = arith.mulf %639, %638 : vector<16x128xf32>
    %cst_235 = arith.constant 0.707106769 : f32
    %641 = vector.broadcast %cst_235 : f32 to vector<16x128xf32>
    %642 = arith.mulf %638, %641 : vector<16x128xf32>
    %643 = math.erf %642 : vector<16x128xf32>
    %cst_236 = arith.constant 1.000000e+00 : f32
    %644 = vector.broadcast %cst_236 : f32 to vector<16x128xf32>
    %645 = arith.addf %644, %643 : vector<16x128xf32>
    %646 = arith.mulf %640, %645 : vector<16x128xf32>
    %647 = arith.truncf %646 : vector<16x128xf32> to vector<16x128xbf16>
    %c1_237 = arith.constant 1 : index
    %c0_238 = arith.constant 0 : index
    %c0_239 = arith.constant 0 : index
    %648 = vector.load %arg19[%c1_237, %c0_238, %c0_239] : memref<2x128x32xbf16, #tpu.memory_space<vmem>>, vector<1x128x32xbf16>
    %649 = vector.shape_cast %648 : vector<1x128x32xbf16> to vector<128x32xbf16>
    %cst_240 = arith.constant dense<0.000000e+00> : vector<16x32xf32>
    %650 = tpu.matmul %647, %649, %cst_240 {dimension_numbers = #tpu.dot_dimension_numbers<[1], [0], [0], [1], [0, 0, 1, 1], [], []>} : vector<16x128xbf16>, vector<128x32xbf16>, vector<16x32xf32> -> vector<16x32xf32>
    %651 = arith.addf %604, %650 : vector<16x32xf32>
    %c1_241 = arith.constant 1 : index
    %c0_242 = arith.constant 0 : index
    %c0_243 = arith.constant 0 : index
    %652 = vector.load %arg20[%c1_241, %c0_242, %c0_243] : memref<2x1x32xf32, #tpu.memory_space<vmem>>, vector<1x1x32xf32>
    %653 = vector.shape_cast %652 : vector<1x1x32xf32> to vector<1x32xf32>
    %654 = vector.broadcast %653 : vector<1x32xf32> to vector<16x32xf32>
    %655 = arith.addf %651, %654 : vector<16x32xf32>
    %c0_244 = arith.constant 0 : index
    %c0_245 = arith.constant 0 : index
    %656 = vector.load %arg21[%c0_244, %c0_245] : memref<1x32xf32, #tpu.memory_space<vmem>>, vector<1x32xf32>
    %c0_246 = arith.constant 0 : index
    %c0_247 = arith.constant 0 : index
    %657 = vector.load %arg22[%c0_246, %c0_247] : memref<1x32xf32, #tpu.memory_space<vmem>>, vector<1x32xf32>
    %cst_248 = arith.constant dense<0.000000e+00> : vector<16xf32>
    %658 = vector.multi_reduction <add>, %655, %cst_248 [1] : vector<16x32xf32> to vector<16xf32>
    %659 = vector.shape_cast %658 : vector<16xf32> to vector<16x1xf32>
    %cst_249 = arith.constant 3.200000e+01 : f32
    %660 = vector.broadcast %cst_249 : f32 to vector<16x1xf32>
    %661 = arith.divf %659, %660 : vector<16x1xf32>
    %662 = vector.broadcast %661 : vector<16x1xf32> to vector<16x32xf32>
    %663 = arith.subf %655, %662 : vector<16x32xf32>
    %664 = vector.broadcast %661 : vector<16x1xf32> to vector<16x32xf32>
    %665 = arith.subf %655, %664 : vector<16x32xf32>
    %666 = arith.mulf %663, %665 : vector<16x32xf32>
    %cst_250 = arith.constant dense<0.000000e+00> : vector<16xf32>
    %667 = vector.multi_reduction <add>, %666, %cst_250 [1] : vector<16x32xf32> to vector<16xf32>
    %668 = vector.shape_cast %667 : vector<16xf32> to vector<16x1xf32>
    %cst_251 = arith.constant 3.200000e+01 : f32
    %669 = vector.broadcast %cst_251 : f32 to vector<16x1xf32>
    %670 = arith.divf %668, %669 : vector<16x1xf32>
    %671 = vector.broadcast %661 : vector<16x1xf32> to vector<16x32xf32>
    %672 = arith.subf %655, %671 : vector<16x32xf32>
    %cst_252 = arith.constant 9.99999974E-6 : f32
    %673 = vector.broadcast %cst_252 : f32 to vector<16x1xf32>
    %674 = arith.addf %670, %673 : vector<16x1xf32>
    %675 = math.rsqrt %674 : vector<16x1xf32>
    %676 = vector.broadcast %675 : vector<16x1xf32> to vector<16x32xf32>
    %677 = arith.mulf %672, %676 : vector<16x32xf32>
    %678 = vector.broadcast %656 : vector<1x32xf32> to vector<16x32xf32>
    %679 = arith.mulf %677, %678 : vector<16x32xf32>
    %680 = vector.broadcast %657 : vector<1x32xf32> to vector<16x32xf32>
    %681 = arith.addf %679, %680 : vector<16x32xf32>
    %682 = arith.truncf %681 : vector<16x32xf32> to vector<16x32xbf16>
    %c0_253 = arith.constant 0 : index
    %c0_254 = arith.constant 0 : index
    %683 = vector.load %arg23[%c0_253, %c0_254] : memref<32x128xbf16, #tpu.memory_space<vmem>>, vector<32x128xbf16>
    %cst_255 = arith.constant dense<0.000000e+00> : vector<16x128xf32>
    %684 = tpu.matmul %682, %683, %cst_255 {dimension_numbers = #tpu.dot_dimension_numbers<[1], [0], [0], [1], [0, 0, 1, 1], [], []>} : vector<16x32xbf16>, vector<32x128xbf16>, vector<16x128xf32> -> vector<16x128xf32>
    %c0_256 = arith.constant 0 : index
    %c0_257 = arith.constant 0 : index
    %685 = vector.load %arg24[%c0_256, %c0_257] : memref<1x128xf32, #tpu.memory_space<vmem>>, vector<1x128xf32>
    %686 = vector.broadcast %685 : vector<1x128xf32> to vector<16x128xf32>
    %687 = arith.addf %684, %686 : vector<16x128xf32>
    %cst_258 = arith.constant dense<0xFF800000> : vector<16xf32>
    %688 = vector.multi_reduction <maximumf>, %687, %cst_258 [1] : vector<16x128xf32> to vector<16xf32>
    %689 = vector.shape_cast %688 : vector<16xf32> to vector<16x1xf32>
    %690 = vector.broadcast %689 : vector<16x1xf32> to vector<16x128xf32>
    %691 = arith.subf %687, %690 : vector<16x128xf32>
    %692 = math.exp %691 : vector<16x128xf32>
    %cst_259 = arith.constant dense<0.000000e+00> : vector<16xf32>
    %693 = vector.multi_reduction <add>, %692, %cst_259 [1] : vector<16x128xf32> to vector<16xf32>
    %694 = vector.shape_cast %693 : vector<16xf32> to vector<16x1xf32>
    %695 = math.log %694 : vector<16x1xf32>
    %696 = vector.broadcast %695 : vector<16x1xf32> to vector<16x128xf32>
    %697 = arith.subf %691, %696 : vector<16x128xf32>
    %c0_260 = arith.constant 0 : index
    %c0_261 = arith.constant 0 : index
    %c0_262 = arith.constant 0 : index
    %698 = vector.load %arg3[%c0_260, %c0_261, %c0_262] : memref<1x16x128xf32, #tpu.memory_space<vmem>>, vector<1x16x128xf32>
    %699 = vector.shape_cast %698 : vector<1x16x128xf32> to vector<16x128xf32>
    %700 = arith.mulf %699, %697 : vector<16x128xf32>
    %701 = vector.shape_cast %700 : vector<16x128xf32> to vector<1x16x128xf32>
    %cst_263 = arith.constant dense<0.000000e+00> : vector<1xf32>
    %702 = vector.multi_reduction <add>, %701, %cst_263 [1, 2] : vector<1x16x128xf32> to vector<1xf32>
    %703 = vector.shape_cast %702 : vector<1xf32> to vector<1x1x1xf32>
    %704 = vector.extract %703[0, 0, 0] : f32 from vector<1x1x1xf32>
    %cst_264 = arith.constant 0.000000e+00 : f32
    %705 = arith.subf %cst_264, %704 : f32
    %cst_265 = arith.constant 1.000000e+00 : f32
    %706 = vector.broadcast %cst_265 : f32 to vector<1x1x128xf32>
    %707 = vector.broadcast %705 : f32 to vector<1x1x128xf32>
    %708 = arith.mulf %707, %706 : vector<1x1x128xf32>
    %c0_266 = arith.constant 0 : index
    %c0_267 = arith.constant 0 : index
    %c0_268 = arith.constant 0 : index
    %709 = vector.load %arg25[%c0_266, %c0_267, %c0_268] : memref<1x1x128xf32, #tpu.memory_space<vmem>>, vector<1x1x128xf32>
    tpu.vector_store %arg25[%c0_266, %c0_267, %c0_268], %708 {strides = array<i32>} : memref<1x1x128xf32, #tpu.memory_space<vmem>>, vector<1x1x128xf32>,
    return
  }
  func.func @transform_0(%arg0: i32) -> (i32, i32, i32) {
    %c0_i32 = arith.constant 0 : i32
    %c0_i32_0 = arith.constant 0 : i32
    %c0_i32_1 = arith.constant 0 : i32
    return %arg0, %c0_i32, %c0_i32_0 : i32, i32, i32
  }
  func.func @transform_1(%arg0: i32) -> (i32, i32, i32) {
    %c0_i32 = arith.constant 0 : i32
    %c0_i32_0 = arith.constant 0 : i32
    %c0_i32_1 = arith.constant 0 : i32
    return %arg0, %c0_i32, %c0_i32_0 : i32, i32, i32
  }
  func.func @transform_2(%arg0: i32) -> (i32, i32, i32) {
    %c0_i32 = arith.constant 0 : i32
    %c0_i32_0 = arith.constant 0 : i32
    %c0_i32_1 = arith.constant 0 : i32
    return %arg0, %c0_i32, %c0_i32_0 : i32, i32, i32
  }
  func.func @transform_3(%arg0: i32) -> (i32, i32) {
    %c0_i32 = arith.constant 0 : i32
    %c0_i32_0 = arith.constant 0 : i32
    %c0_i32_1 = arith.constant 0 : i32
    return %c0_i32, %c0_i32_0 : i32, i32
  }
  func.func @transform_4(%arg0: i32) -> (i32, i32) {
    %c0_i32 = arith.constant 0 : i32
    %c0_i32_0 = arith.constant 0 : i32
    %c0_i32_1 = arith.constant 0 : i32
    return %c0_i32, %c0_i32_0 : i32, i32
  }
  func.func @transform_5(%arg0: i32) -> (i32, i32) {
    %c0_i32 = arith.constant 0 : i32
    %c0_i32_0 = arith.constant 0 : i32
    %c0_i32_1 = arith.constant 0 : i32
    return %c0_i32, %c0_i32_0 : i32, i32
  }
  func.func @transform_6(%arg0: i32) -> (i32, i32) {
    %c0_i32 = arith.constant 0 : i32
    %c0_i32_0 = arith.constant 0 : i32
    %c0_i32_1 = arith.constant 0 : i32
    return %c0_i32, %c0_i32_0 : i32, i32
  }
  func.func @transform_7(%arg0: i32) -> (i32, i32) {
    %c0_i32 = arith.constant 0 : i32
    %c0_i32_0 = arith.constant 0 : i32
    %c0_i32_1 = arith.constant 0 : i32
    return %c0_i32, %c0_i32_0 : i32, i32
  }
  func.func @transform_8(%arg0: i32) -> (i32, i32) {
    %c0_i32 = arith.constant 0 : i32
    %c0_i32_0 = arith.constant 0 : i32
    %c0_i32_1 = arith.constant 0 : i32
    return %c0_i32, %c0_i32_0 : i32, i32
  }
  func.func @transform_9(%arg0: i32) -> (i32, i32, i32) {
    %c0_i32 = arith.constant 0 : i32
    %c0_i32_0 = arith.constant 0 : i32
    %c0_i32_1 = arith.constant 0 : i32
    %c0_i32_2 = arith.constant 0 : i32
    return %c0_i32, %c0_i32_0, %c0_i32_1 : i32, i32, i32
  }
  func.func @transform_10(%arg0: i32) -> (i32, i32, i32) {
    %c0_i32 = arith.constant 0 : i32
    %c0_i32_0 = arith.constant 0 : i32
    %c0_i32_1 = arith.constant 0 : i32
    %c0_i32_2 = arith.constant 0 : i32
    return %c0_i32, %c0_i32_0, %c0_i32_1 : i32, i32, i32
  }
  func.func @transform_11(%arg0: i32) -> (i32, i32, i32) {
    %c0_i32 = arith.constant 0 : i32
    %c0_i32_0 = arith.constant 0 : i32
    %c0_i32_1 = arith.constant 0 : i32
    %c0_i32_2 = arith.constant 0 : i32
    return %c0_i32, %c0_i32_0, %c0_i32_1 : i32, i32, i32
  }
  func.func @transform_12(%arg0: i32) -> (i32, i32, i32) {
    %c0_i32 = arith.constant 0 : i32
    %c0_i32_0 = arith.constant 0 : i32
    %c0_i32_1 = arith.constant 0 : i32
    %c0_i32_2 = arith.constant 0 : i32
    return %c0_i32, %c0_i32_0, %c0_i32_1 : i32, i32, i32
  }
  func.func @transform_13(%arg0: i32) -> (i32, i32, i32) {
    %c0_i32 = arith.constant 0 : i32
    %c0_i32_0 = arith.constant 0 : i32
    %c0_i32_1 = arith.constant 0 : i32
    %c0_i32_2 = arith.constant 0 : i32
    return %c0_i32, %c0_i32_0, %c0_i32_1 : i32, i32, i32
  }
  func.func @transform_14(%arg0: i32) -> (i32, i32, i32) {
    %c0_i32 = arith.constant 0 : i32
    %c0_i32_0 = arith.constant 0 : i32
    %c0_i32_1 = arith.constant 0 : i32
    %c0_i32_2 = arith.constant 0 : i32
    return %c0_i32, %c0_i32_0, %c0_i32_1 : i32, i32, i32
  }
  func.func @transform_15(%arg0: i32) -> (i32, i32, i32) {
    %c0_i32 = arith.constant 0 : i32
    %c0_i32_0 = arith.constant 0 : i32
    %c0_i32_1 = arith.constant 0 : i32
    %c0_i32_2 = arith.constant 0 : i32
    return %c0_i32, %c0_i32_0, %c0_i32_1 : i32, i32, i32
  }
  func.func @transform_16(%arg0: i32) -> (i32, i32, i32) {
    %c0_i32 = arith.constant 0 : i32
    %c0_i32_0 = arith.constant 0 : i32
    %c0_i32_1 = arith.constant 0 : i32
    %c0_i32_2 = arith.constant 0 : i32
    return %c0_i32, %c0_i32_0, %c0_i32_1 : i32, i32, i32
  }
  func.func @transform_17(%arg0: i32) -> (i32, i32, i32) {
    %c0_i32 = arith.constant 0 : i32
    %c0_i32_0 = arith.constant 0 : i32
    %c0_i32_1 = arith.constant 0 : i32
    %c0_i32_2 = arith.constant 0 : i32
    return %c0_i32, %c0_i32_0, %c0_i32_1 : i32, i32, i32
  }
  func.func @transform_18(%arg0: i32) -> (i32, i32, i32) {
    %c0_i32 = arith.constant 0 : i32
    %c0_i32_0 = arith.constant 0 : i32
    %c0_i32_1 = arith.constant 0 : i32
    %c0_i32_2 = arith.constant 0 : i32
    return %c0_i32, %c0_i32_0, %c0_i32_1 : i32, i32, i32
  }
  func.func @transform_19(%arg0: i32) -> (i32, i32, i32) {
    %c0_i32 = arith.constant 0 : i32
    %c0_i32_0 = arith.constant 0 : i32
    %c0_i32_1 = arith.constant 0 : i32
    %c0_i32_2 = arith.constant 0 : i32
    return %c0_i32, %c0_i32_0, %c0_i32_1 : i32, i32, i32
  }
  func.func @transform_20(%arg0: i32) -> (i32, i32) {
    %c0_i32 = arith.constant 0 : i32
    %c0_i32_0 = arith.constant 0 : i32
    %c0_i32_1 = arith.constant 0 : i32
    return %c0_i32, %c0_i32_0 : i32, i32
  }
  func.func @transform_21(%arg0: i32) -> (i32, i32) {
    %c0_i32 = arith.constant 0 : i32
    %c0_i32_0 = arith.constant 0 : i32
    %c0_i32_1 = arith.constant 0 : i32
    return %c0_i32, %c0_i32_0 : i32, i32
  }
  func.func @transform_22(%arg0: i32) -> (i32, i32) {
    %c0_i32 = arith.constant 0 : i32
    %c0_i32_0 = arith.constant 0 : i32
    %c0_i32_1 = arith.constant 0 : i32
    return %c0_i32, %c0_i32_0 : i32, i32
  }
  func.func @transform_23(%arg0: i32) -> (i32, i32) {
    %c0_i32 = arith.constant 0 : i32
    %c0_i32_0 = arith.constant 0 : i32
    %c0_i32_1 = arith.constant 0 : i32
    return %c0_i32, %c0_i32_0 : i32, i32
  }
  func.func @transform_24(%arg0: i32) -> (i32, i32, i32) {
    %c0_i32 = arith.constant 0 : i32
    %c0_i32_0 = arith.constant 0 : i32
    %c0_i32_1 = arith.constant 0 : i32
    return %arg0, %c0_i32, %c0_i32_0 : i32, i32, i32
  }
}

</mosaic_0001>

<bundles_post_ra>
// kernel: tile.19
= control target key start
LH: loop header
LB: loop body
LE: loop exit
PB: predicated region body
PF: predicated region fallthrough
CT: control target
= control target key end

     0   :  { %s130_s0 = inlined_call_operand.vmem [shape: f32[8,4], index: 0, kind: input, shape index: {}]   ;;  %s131_s1 = inlined_call_operand.vmem [shape: f32[2,8,4,4], index: 1, kind: output, shape index: {}]  }
   0x1   :  { %v4_v0 = vld [vmem:[%s130_s0] ss:$0 sm:$0xff]  ;;  %v45_v1 = vld [vmem:[%s130_s0 + $0x1] ss:$0 sm:$0xff]  ;;  %v50_v2 = vld [vmem:[%s130_s0 + $0x2] ss:$0 sm:$0xff] }
   0x2   :  { %5 = vst [vmem:[%s131_s1] sm:$0x3] %v4_v0  ;;  %42 = vst [vmem:[%s131_s1 + $0x8] sm:$0x3] %v4_v0  ;;  %v55_v3 = vld [vmem:[%s130_s0 + $0x3] ss:$0 sm:$0xff] }
   0x3   :  { %43 = vst [vmem:[%s131_s1 + $0x10] sm:$0x3] %v4_v0  ;;  %44 = vst [vmem:[%s131_s1 + $0x18] sm:$0x3] %v4_v0 }
   0x4   :  { %46 = vst [vmem:[%s131_s1 + $0x2] sm:$0x3] %v45_v1  ;;  %47 = vst [vmem:[%s131_s1 + $0xa] sm:$0x3] %v45_v1 }
   0x5   :  { %48 = vst [vmem:[%s131_s1 + $0x12] sm:$0x3] %v45_v1  ;;  %49 = vst [vmem:[%s131_s1 + $0x1a] sm:$0x3] %v45_v1 }
   0x6   :  { %51 = vst [vmem:[%s131_s1 + $0x4] sm:$0x3] %v50_v2  ;;  %52 = vst [vmem:[%s131_s1 + $0xc] sm:$0x3] %v50_v2 }
   0x7   :  { %53 = vst [vmem:[%s131_s1 + $0x14] sm:$0x3] %v50_v2  ;;  %54 = vst [vmem:[%s131_s1 + $0x1c] sm:$0x3] %v50_v2 }
   0x8   :  { %56 = vst [vmem:[%s131_s1 + $0x6] sm:$0x3] %v55_v3  ;;  %57 = vst [vmem:[%s131_s1 + $0xe] sm:$0x3] %v55_v3 }
   0x9   :  { %58 = vst [vmem:[%s131_s1 + $0x16] sm:$0x3] %v55_v3  ;;  %59 = vst [vmem:[%s131_s1 + $0x1e] sm:$0x3] %v55_v3 }

// kernel: tile.20
= control target key start
LH: loop header
LB: loop body
LE: loop exit
PB: predicated region body
PF: predicated region fallthrough
CT: control target
= control target key end

     0   :  { %vm83_vm0 = vcmask 1047556   ;;  %vm85_vm1 = vcmask 64512   ;;  %vm104_vm2 = vcmask 130112   ;;  %s226_s0 = inlined_call_operand.vmem [shape: f32[2,8,4,4], index: 0, kind: input, shape index: {}]   ;;  %s227_s1 = inlined_call_operand.vmem [shape: f32[16,16], index: 1, kind: output, shape index: {}]  }
   0x1   :  { %v139_v0 = vld [vmem:[%s226_s0 + $0xe] sm:$0x3]  ;;  %v140_v1 = vld [vmem:[%s226_s0 + $0xc] sm:$0x3]  ;;  %v141_v2 = vld [vmem:[%s226_s0 + $0xa] sm:$0x3] }
   0x2   :  { %49 = vst [vmem:[#allocation0 + $0x38] sm:$0x3] %v139_v0  ;;  %54 = vst [vmem:[#allocation0 + $0x30] sm:$0x3] %v140_v1  ;;  %v142_v3 = vld [vmem:[%s226_s0 + $0x8] sm:$0x3] }
   0x3   :  { %59 = vst [vmem:[#allocation0 + $0x28] sm:$0x3] %v141_v2  ;;  %v143_v4 = vld [vmem:[%s226_s0 + $0x6] sm:$0x3]  ;;  %v144_v5 = vld [vmem:[%s226_s0 + $0x4] sm:$0x3] }
   0x4   :  { %64 = vst [vmem:[#allocation0 + $0x20] sm:$0x3] %v142_v3  ;;  %69 = vst [vmem:[#allocation0 + $0x18] sm:$0x3] %v143_v4  ;;  %v145_v6 = vld [vmem:[%s226_s0 + $0x2] sm:$0x3] }
   0x5   :  { %74 = vst [vmem:[#allocation0 + $0x10] sm:$0x3] %v144_v5  ;;  %v79_v7 = vld [vmem:[%s226_s0] sm:$0x3]  ;;  %78 = vst [vmem:[#allocation0 + $0x8] sm:$0x3] %v145_v6 }
   0x6   :  { %80 = vst [vmem:[#allocation0] sm:$0x3] %v79_v7  ;;  %v131_v8 = vld [vmem:[%s226_s0 + $0x1e] sm:$0x3]  ;;  %v132_v9 = vld [vmem:[%s226_s0 + $0x1c] sm:$0x3] }
   0x7   :  { %v133_v10 = vld [vmem:[%s226_s0 + $0x1a] sm:$0x3]  ;;  %9 = vst [vmem:[#allocation0 + $0x78] sm:$0x3] %v131_v8  ;;  %14 = vst [vmem:[#allocation0 + $0x70] sm:$0x3] %v132_v9 }
   0x8   :  { %19 = vst [vmem:[#allocation0 + $0x68] sm:$0x3] %v133_v10  ;;  %v134_v11 = vld [vmem:[%s226_s0 + $0x18] sm:$0x3]  ;;  %v135_v12 = vld [vmem:[%s226_s0 + $0x16] sm:$0x3] }
   0x9   :  { %v136_v13 = vld [vmem:[%s226_s0 + $0x14] sm:$0x3]  ;;  %24 = vst [vmem:[#allocation0 + $0x60] sm:$0x3] %v134_v11  ;;  %29 = vst [vmem:[#allocation0 + $0x58] sm:$0x3] %v135_v12 }
   0xa   :  { %34 = vst [vmem:[#allocation0 + $0x50] sm:$0x3] %v136_v13  ;;  %v137_v14 = vld [vmem:[%s226_s0 + $0x12] sm:$0x3]  ;;  %v138_v15 = vld [vmem:[%s226_s0 + $0x10] sm:$0x3] }
   0xb   :  { %39 = vst [vmem:[#allocation0 + $0x48] sm:$0x3] %v137_v14  ;;  %44 = vst [vmem:[#allocation0 + $0x40] sm:$0x3] %v138_v15  ;;  %s149_s0 = smov 8  }
   0xc   :  { %v99_v16 = vld [vmem:[#allocation0 + $0x1] ss:$8 sm:$0xf0]   ;;  %v82_v17 = vld [vmem:[#allocation0] ss:$8 sm:$0xf0]  }
   0xd   :  { %v97_v18 = vld [vmem:[#allocation0 + $0x1] ss:$8 sm:$0xf]   ;;  %v81_v19 = vld [vmem:[#allocation0] ss:$8 sm:$0xf]  }
   0xe   :  { %v101_v20 = vsel %vm83_vm0, %v99_v16, %v97_v18  ;;  %v84_v21 = vsel %vm83_vm0, %v82_v17, %v81_v19 }
   0xf   :  { %102 = vrot.lane.b32.xlu0 %v101_v20, %s149_s0  ;;  %86 = vst.msk [vmem:[%s227_s1] sm:$0xff] %vm85_vm1, %v84_v21  }
  0x10   :  { %v109_v22 = vld [vmem:[#allocation0 + $0x41] ss:$8 sm:$0xf0]   ;;  %v90_v23 = vld [vmem:[#allocation0 + $0x40] ss:$8 sm:$0xf0]  }
  0x12   :  { %v107_v24 = vld [vmem:[#allocation0 + $0x41] ss:$8 sm:$0xf]   ;;  %v88_v25 = vld [vmem:[#allocation0 + $0x40] ss:$8 sm:$0xf]  }
  0x13   :  { %v111_v26 = vsel %vm83_vm0, %v109_v22, %v107_v24  ;;  %v92_v27 = vsel %vm83_vm0, %v90_v23, %v88_v25 }
  0x14   :  { %146 = vst.msk [vmem:[%s227_s1 + $0x8] sm:$0xff] %vm85_vm1, %v92_v27   ;;  %112 = vrot.lane.b32.xlu0 %v111_v26, %s149_s0 }
  0x81   :  { %v103_v28 = vpop.permute.xlu0 %102  }
  0x82   :  { %105 = vst.msk [vmem:[%s227_s1] sm:$0xff] %vm104_vm2, %v103_v28  }
  0x86   :  { %v113_v29 = vpop.permute.xlu0 %112  }
  0x87   :  { %147 = vst.msk [vmem:[%s227_s1 + $0x8] sm:$0xff] %vm104_vm2, %v113_v29  }

// kernel: eq.39
= control target key start
LH: loop header
LB: loop body
LE: loop exit
PB: predicated region body
PF: predicated region fallthrough
CT: control target
= control target key end

     0   :  { %vm8_vm0 = vcmask 130048   ;;  %vm14_vm1 = vcmask 261248   ;;  %s42_s0 = inlined_call_operand.vmem [shape: s32[2,16], index: 0, kind: input, shape index: {}]   ;;  %s43_s1 = inlined_call_operand.vmem [shape: s32[32], index: 1, kind: output, shape index: {}]  }
   0x1   :  { %v5_v0 = vld [vmem:[%s42_s0] sm:$0x3]  ;;  %s25_s0 = smov 16  }
   0x2   :  { %6 = vst [vmem:[#allocation1] sm:$0x3] %v5_v0 }
   0x9   :  { %v11_v1 = vld [vmem:[#allocation1 + $0x1] sm:$0x1]   ;;  %v7_v2 = vld [vmem:[#allocation1] sm:$0x1]  }
   0xa   :  { %12 = vrot.lane.b32.xlu0 %v11_v1, %s25_s0  ;;  %9 = vst.msk [vmem:[#allocation0] sm:$0x1] %vm8_vm0, %v7_v2  }
  0x7c   :  { %v13_v3 = vpop.permute.xlu0 %12  }
  0x7d   :  { %15 = vst.msk [vmem:[#allocation0] sm:$0x1] %vm14_vm1, %v13_v3  }
  0x84   :  { %v20_v4 = vld [vmem:[#allocation0] sm:$0x1] }
  0x85   :  { %23 = vst [vmem:[%s43_s1] sm:$0x1] %v20_v4 }

// kernel: ocr_forward.1
= control target key start
LH: loop header
LB: loop body
LE: loop exit
PB: predicated region body
PF: predicated region fallthrough
CT: control target
= control target key end

     0   :  { %vm293_vm0 = vcmask 261120   ;;  %v5465_v4 = vmov 0   ;;  %vm203_vm1 = vcmask 523264   ;;  %v5466_v32 = vmov 0.0   ;;  %s6862_s30 = smov 64   ;;  %s6861_s25 = smov 92   ;;  %s6825_s1 = inlined_call_operand.vmem [shape: f32[1,16,32], index: 1, kind: input, shape index: {}]   ;;  %s6826_s7 = inlined_call_operand.vmem [shape: bf16[192,32], index: 7, kind: input, shape index: {}]   ;;  %s6827_s0 = inlined_call_operand.vmem [shape: bf16[1,32,192], index: 0, kind: input, shape index: {}]   ;;  %s6828_s9 = inlined_call_operand.vmem [shape: bf16[2,32,96], index: 9, kind: input, shape index: {}]   ;;  %s6829_s4 = inlined_call_operand.vmem [shape: f32[16,16], index: 4, kind: input, shape index: {}]   ;;  %s6830_s3 = inlined_call_operand.vmem [shape: f32[16,16], index: 3, kind: input, shape index: {}]   ;;  %s6831_s8 = inlined_call_operand.vmem [shape: f32[1,32], index: 8, kind: input, shape index: {}]   ;;  %s6832_s14 = inlined_call_operand.vmem [shape: f32[2,3,32], index: 14, kind: input, shape index: {}]   ;;  %s6833_s15 = inlined_call_operand.vmem [shape: f32[2,3,32], index: 15, kind: input, shape index: {}]   ;;  %s6834_s5 = inlined_call_operand.vmem [shape: f32[16,16], index: 5, kind: input, shape index: {}]   ;;  %s6835_s10 = inlined_call_operand.vmem [shape: bf16[2,32,32], index: 10, kind: input, shape index: {}]   ;;  %s6836_s12 = inlined_call_operand.vmem [shape: bf16[2,32,64], index: 12, kind: input, shape index: {}]   ;;  %s6837_s11 = inlined_call_operand.vmem [shape: bf16[2,32,32], index: 11, kind: input, shape index: {}]   ;;  %s6838_s6 = inlined_call_operand.vmem [shape: f32[16,32], index: 6, kind: input, shape index: {}]   ;;  %s6839_s13 = inlined_call_operand.vmem [shape: bf16[2,32,32], index: 13, kind: input, shape index: {}]   ;;  %s6840_s16 = inlined_call_operand.vmem [shape: bf16[2,32,128], index: 16, kind: input, shape index: {}]   ;;  %s6841_s18 = inlined_call_operand.vmem [shape: bf16[2,128,32], index: 18, kind: input, shape index: {}]   ;;  %s6842_s17 = inlined_call_operand.vmem [shape: f32[2,1,128], index: 17, kind: input, shape index: {}]   ;;  %s6843_s19 = inlined_call_operand.vmem [shape: f32[2,1,32], index: 19, kind: input, shape index: {}]   ;;  %s6844_s22 = inlined_call_operand.vmem [shape: bf16[32,128], index: 22, kind: input, shape index: {}]   ;;  %s6845_s20 = inlined_call_operand.vmem [shape: f32[1,32], index: 20, kind: input, shape index: {}]   ;;  %s6846_s21 = inlined_call_operand.vmem [shape: f32[1,32], index: 21, kind: input, shape index: {}]   ;;  %s6847_s23 = inlined_call_operand.vmem [shape: f32[1,128], index: 23, kind: input, shape index: {}]   ;;  %s6848_s2 = inlined_call_operand.vmem [shape: f32[1,16,128], index: 2, kind: input, shape index: {}]   ;;  %s6849_s24 = inlined_call_operand.vmem [shape: f32[1,1,128], index: 24, kind: output, shape index: {}]  }
   0x1   :  { %6891 = sst [smem:[#allocation3_spill]] %s6825_s1  ;;  %210 = vmatprep.subr.bf16.mxu0 %v5465_v4  ;;  %4775 = vmatprep.subr.bf16.mxu1 %v5466_v32  ;;  %vm5467_vm2 = vmmov 0   ;;  %v321_v60 = vlaneseq  ;;  %vm501_vm3 = vcmask 31744   ;;  %vm601_vm4 = vcmask 130048   ;;  %s6858_s28 = smov 124  }
   0x2   :  { %6892 = sst [smem:[#allocation4_spill]] %s6826_s7  ;;  %4777 = vmatprep.mubr.msk.bf16.mxu1 %vm5467_vm2, %v5466_v32  ;;  %s6876_s7 = smov 16   ;;  %vm673_vm5 = vcmask 64512   ;;  %vm859_vm6 = vcmask 130112   ;;  %vm1044_vm7 = vcmask 195712   ;;  %vm1229_vm8 = vcmask 261312  }
   0x3   :  { %6893 = sst [smem:[#allocation5_spill]] %s6827_s0  ;;  %v5739_v63 = vshrl.u32 %v321_v60, 7  ;;  %s6868_s0 = smov 80  }
   0x4   :  { %6894 = sst [smem:[#allocation6_spill]] %s6828_s9 }
   0x5   :  { %6895 = sst [smem:[#allocation7_spill]] %s6829_s4  ;;  %s6875_s4 = smov 48  }
   0x6   :  { %6896 = sst [smem:[#allocation8_spill]] %s6830_s3 }
   0x7   :  { %6897 = sst [smem:[#allocation9_spill]] %s6831_s8 }
   0x8   :  { %6898 = sst [smem:[#allocation10_spill]] %s6832_s14 }
   0x9   :  { %6899 = sst [smem:[#allocation11_spill]] %s6833_s15 }
   0xa   :  { %6900 = sst [smem:[#allocation12_spill]] %s6845_s20  ;;  %s6932_s20 = smov 100  }
   0xb   :  { %6901 = sst [smem:[#allocation13_spill]] %s6846_s21  ;;  %s6930_s21 = smov 48  }
   0xc   :  { %6902 = sst [smem:[#allocation14_spill]] %s6847_s23  ;;  %s6931_s23 = smov 84  }
   0xd   :  { %6903 = sst [smem:[#allocation15_spill]] %s6848_s2  ;;  %s6921_s2 = smov 24  }
   0xe   :  { %6904 = sst [smem:[#allocation16_spill]] %s6849_s24  ;;  %s6925_s24 = smov 108  }
   0xf   :  { %s6905_s27 = sld [smem:[#allocation3_spill]] }
  0x10   :  { %s6906_s1 = sld [smem:[#allocation4_spill]] }
  0x11   :  { %s6907_s26 = sld [smem:[#allocation5_spill]] }
  0x12   :  { %s6908_s3 = sld [smem:[#allocation6_spill]] }
  0x13   :  { %s6909_s29 = sld [smem:[#allocation7_spill]] }
  0x14   :  { %s6910_s15 = sld [smem:[#allocation8_spill]] }
  0x15   :  { %v281_v0 = vld [vmem:[%s6905_s27] sm:$0xff]  ;;  %v282_v1 = vld [vmem:[%s6905_s27 + $0x8] sm:$0xff]  ;;  %s6911_s14 = sld [smem:[#allocation9_spill]] }
  0x16   :  { %v294_v2 = vsel %vm293_vm0, %v281_v0, 0.0  ;;  %v297_v3 = vsel %vm293_vm0, %v282_v1, 0.0  ;;  %v5211_v5 = vld [vmem:[%s6906_s1 + $0x38] sm:$0xff]   ;;  %v5212_v6 = vld [vmem:[%s6906_s1 + $0x30] sm:$0xff]   ;;  %v5213_v7 = vld [vmem:[%s6906_s1 + $0x28] sm:$0xff]   ;;  %s6912_s9 = sld [smem:[#allocation10_spill]] }
  0x17   :  { %295 = vadd.xlane.f32.xlu0 %v294_v2  ;;  %211 = vmatpush1.bf16.msra.mxu0 %v5211_v5  ;;  %v5214_v8 = vld [vmem:[%s6906_s1 + $0x20] sm:$0xff]   ;;  %v5215_v10 = vld [vmem:[%s6906_s1 + $0x18] sm:$0xff]   ;;  %v5216_v11 = vld [vmem:[%s6906_s1 + $0x10] sm:$0xff]   ;;  %s6913_s8 = sld [smem:[#allocation11_spill]] }
  0x18   :  { %212 = vmatprep.subr.bf16.mxu0 %v5465_v4  ;;  %v5225_v9 = vld [vmem:[%s6907_s26 + $0x4] ss:$8 sps:$4 sm:$0xff]   ;;  %v5219_v14 = vld [vmem:[%s6906_s1 + $0x58] sm:$0xff]   ;;  %v5220_v15 = vld [vmem:[%s6906_s1 + $0x50] sm:$0xff]  }
  0x19   :  { %4462 = vmatprep.mubr.msk.bf16.mxu0 %vm203_vm1, %v5225_v9  ;;  %v5217_v12 = vld [vmem:[%s6906_s1 + $0x8] sm:$0xff]   ;;  %v5218_v13 = vld [vmem:[%s6906_s1] sm:$0xff]   ;;  %v5226_v29 = vld [vmem:[%s6907_s26 + $0x14] ss:$8 sps:$4 sm:$0xff]  }
  0x1a   :  { %v5221_v16 = vld [vmem:[%s6906_s1 + $0x48] sm:$0xff]   ;;  %v5222_v17 = vld [vmem:[%s6906_s1 + $0x40] sm:$0xff]   ;;  %v5228_v30 = vld [vmem:[%s6907_s26 + $0x10] ss:$8 sps:$4 sm:$0xff]   ;;  %s5468_s1 = smov 32  }
  0x1b   :  { %298 = vadd.xlane.f32.xlu0 %v297_v3  ;;  %213 = vmatpush1.bf16.msra.mxu0 %v5212_v6  ;;  %v5223_v18 = vld [vmem:[%s6907_s26] ss:$8 sps:$4 sm:$0xff]   ;;  %s6880_s26 = smov 112  }
  0x1c   :  { %214 = vmatprep.subr.bf16.mxu0 %v5465_v4  ;;  %v5229_v31 = vld [vmem:[%s6908_s3 + $0x8] sm:$0xff]   ;;  %v5230_v33 = vld [vmem:[%s6908_s3] sm:$0xff]  }
  0x1d   :  { %v5701_v34 = vld [vmem:[%s6909_s29 + $0x8] sm:$0xff]  ;;  %v5706_v35 = vld [vmem:[%s6909_s29] sm:$0xff] }
  0x1e   :  { %v5713_v36 = vld [vmem:[%s6910_s15] sm:$0xff]  ;;  %v5726_v37 = vld [vmem:[%s6910_s15 + $0x8] sm:$0xff] }
  0x1f   :  { %215 = vmatpush1.bf16.msra.mxu0 %v5213_v7  ;;  %v4445_v38 = vld [vmem:[%s6911_s14] ss:$0 sm:$0xff]  ;;  %s6886_s14 = smov 96  }
  0x20   :  { %216 = vmatprep.subr.bf16.mxu0 %v5465_v4  ;;  %v5755_v5 = vld [vmem:[%s6913_s8] sm:$0x7] }
  0x23   :  { %217 = vmatpush1.bf16.msra.mxu0 %v5214_v8 }
  0x24   :  { %218 = vmatprep.subr.bf16.mxu0 %v5465_v4 }
  0x27   :  { %219 = vmatpush1.bf16.msra.mxu0 %v5215_v10 }
  0x28   :  { %220 = vmatprep.subr.bf16.mxu0 %v5465_v4 }
  0x2b   :  { %221 = vmatpush1.bf16.msra.mxu0 %v5216_v11 }
  0x2c   :  { %222 = vmatprep.subr.bf16.mxu0 %v5465_v4 }
  0x2f   :  { %223 = vmatpush1.bf16.msra.mxu0 %v5217_v12 }
  0x30   :  { %224 = vmatprep.subr.bf16.mxu0 %v5465_v4 }
  0x31   :  { %476 = vrot.lane.b32.xlu0 %v5706_v35, %s5468_s1 }
  0x33   :  { %225 = vmatpush1.bf16.msra.mxu0 %v5218_v13 }
  0x34   :  { %234 = vmatprep.subr.bf16.mxu0 %v5465_v4 }
  0x35   :  { %468 = vrot.lane.b32.xlu0 %v5713_v36, %s6875_s4 }
  0x37   :  { %235 = vmatpush2.bf16.msra.mxu0 %v5219_v14 }
  0x38   :  { %236 = vmatprep.subr.bf16.mxu0 %v5465_v4 }
  0x39   :  { %420 = vrot.lane.b32.xlu0 %v5713_v36, %s6876_s7 }
  0x3b   :  { %237 = vmatpush2.bf16.msra.mxu0 %v5220_v15 }
  0x3c   :  { %238 = vmatprep.subr.bf16.mxu0 %v5465_v4 }
  0x3d   :  { %441 = vrot.lane.b32.xlu0 %v5713_v36, %s5468_s1 }
  0x3f   :  { %239 = vmatpush2.bf16.msra.mxu0 %v5221_v16 }
  0x40   :  { %240 = vmatprep.subr.bf16.mxu0 %v5465_v4 }
  0x43   :  { %241 = vmatpush2.bf16.msra.mxu0 %v5222_v17 }
  0x44   :  { %4767 = vmatprep.subr.bf16.mxu0 %v5466_v32 }
  0x46   :  { %243 = vmatmul.mubr.bf16.vlgmr.msra.gmra.mxu0 %v5223_v18 }
  0x47   :  { %4463 = vmatprep.mubr.msk.bf16.mxu0 %vm203_vm1, %v5226_v29  ;;  %4768 = vmatpush3.bf16.msra.mxu0 %v5229_v31 }
  0x48   :  { %4769 = vmatprep.subr.bf16.mxu0 %v5466_v32 }
  0x4b   :  { %4770 = vmatpush3.bf16.msra.mxu0 %v5230_v33 }
  0x4c   :  { %4811 = vmatprep.subr.bf16.mxu0 %v5466_v32 }
  0x4e   :  { %251 = vmatmul.mubr.bf16.gmra.mxu0 %v5228_v30 }
  0x4f   :  { %4771 = vmatprep.mubr.msk.bf16.mxu0 %vm5467_vm2, %v5466_v32 }
  0xa0   :  { %v296_v19 = vpop.xlane.xlu0 %295 }
  0xa1   :  { %v301_v20 = vmul.f32 0.03125, %v296_v19 }
  0xa3   :  { %v5667_v21 = vsub.f32 %v281_v0, %v301_v20  ;;  %v5742_v0 = vsub.s32 0, %v5739_v63 }
  0xa4   :  { %v299_v22 = vpop.xlane.xlu0 %298 }
  0xa5   :  { %v302_v23 = vmul.f32 0.03125, %v299_v22  ;;  %v305_v24 = vmul.f32 %v5667_v21, %v5667_v21  ;;  %v330_v9 = vrot.slane %v5755_v5, %v5742_v0 }
  0xa7   :  { %v5671_v25 = vsub.f32 %v282_v1, %v302_v23  ;;  %v307_v26 = vsel %vm293_vm0, %v305_v24, 0.0  ;;  %v5747_v1 = vld [vmem:[%s6912_s9] sm:$0x7] }
  0xa8   :  { %308 = vadd.xlane.f32.xlu1 %v307_v26  ;;  %v324_v3 = vrot.slane %v5747_v1, %v5742_v0  ;;  %v5767_v33 = vpop.permute.xlu0 %476 }
  0xa9   :  { %v306_v27 = vmul.f32 %v5671_v25, %v5671_v25 }
  0xab   :  { %v310_v28 = vsel %vm293_vm0, %v306_v27, 0.0 }
  0xac   :  { %311 = vadd.xlane.f32.xlu1 %v310_v28 }
  0xbd   :  { %478 = vrot.lane.b32.xlu1 %v5701_v34, %s5468_s1 }
  0xc1   :  { %449 = vrot.lane.b32.xlu1 %v5706_v35, %s6875_s4 }
  0xc5   :  { %451 = vrot.lane.b32.xlu1 %v5701_v34, %s6875_s4 }
  0xc9   :  { %470 = vrot.lane.b32.xlu1 %v5726_v37, %s6875_s4 }
  0xcd   :  { %422 = vrot.lane.b32.xlu1 %v5726_v37, %s6876_s7 }
  0xd1   :  { %443 = vrot.lane.b32.xlu1 %v5726_v37, %s5468_s1  ;;  %s6860_s1 = smov 108  }
 0x106   :  { %v244_v39 = vpop.f32.mrf.mxu0 }
 0x107   :  { %v245_v40 = vadd.f32 %v4445_v38, %v244_v39 }
 0x108   :  { %v246_v41 = vpop.f32.mrf.mxu0 }
 0x109   :  { %v263_v42 = vmul.f32 0.70710677, %v245_v40  ;;  %v259_v49 = vmul.f32 0.5, %v245_v40 }
 0x10a   :  { %v247_v43 = vpop.f32.mrf.mxu0 }
 0x10b   :  { %5271 = verf.f32 %v263_v42  ;;  %v248_v44 = vadd.f32 %v4445_v38, %v247_v43 }
 0x10c   :  { %v249_v45 = vpop.f32.mrf.mxu0 }
 0x10d   :  { %v264_v46 = vmul.f32 0.70710677, %v248_v44  ;;  %v260_v52 = vmul.f32 0.5, %v248_v44 }
 0x10e   :  { %v252_v14 = vpop.f32.mrf.mxu0 }
 0x10f   :  { %5273 = verf.f32 %v264_v46  ;;  %v253_v15 = vadd.f32 %v4445_v38, %v252_v14 }
 0x110   :  { %v254_v16 = vpop.f32.mrf.mxu0 }
 0x111   :  { %v265_v17 = vmul.f32 0.70710677, %v253_v15  ;;  %v261_v23 = vmul.f32 0.5, %v253_v15 }
 0x112   :  { %v255_v18 = vpop.f32.mrf.mxu0 }
 0x113   :  { %v256_v19 = vadd.f32 %v4445_v38, %v255_v18 }
 0x114   :  { %v257_v20 = vpop.f32.mrf.mxu0 }
 0x118   :  { %v5272_v47 = vpop.eup %5271 }
 0x119   :  { %v271_v50 = vadd.f32 1.0, %v5272_v47 }
 0x11b   :  { %v275_v56 = vmul.f32 %v271_v50, %v259_v49  ;;  %v5799_v50 = vpop.permute.xlu0 %468 }
 0x11c   :  { %v5274_v53 = vpop.eup %5273 }
 0x11d   :  { %v272_v57 = vadd.f32 1.0, %v5274_v53 }
 0x11f   :  { %v276_v59 = vmul.f32 %v272_v57, %v260_v52  ;;  %v5803_v52 = vpop.permute.xlu0 %420 }
 0x121   :  { %v5737_v62 = vpack.c.bf16 %v276_v59, %v275_v56 }
 0x131   :  { %v309_v48 = vpop.xlane.xlu1 %308 }
 0x132   :  { %v313_v51 = vmul.f32 0.03125, %v309_v48 }
 0x134   :  { %v315_v54 = vadd.f32 1e-05, %v313_v51 }
 0x135   :  { %v312_v55 = vpop.xlane.xlu1 %311 }
 0x136   :  { %5275 = vrsqrt.f32 %v315_v54  ;;  %v314_v58 = vmul.f32 0.03125, %v312_v55  ;;  %v5807_v54 = vpop.permute.xlu0 %441 }
 0x138   :  { %v316_v61 = vadd.f32 1e-05, %v314_v58 }
 0x139   :  { %v5765_v31 = vpop.permute.xlu1 %478 }
 0x13a   :  { %5277 = vrsqrt.f32 %v316_v61 }
 0x13b   :  { %5279 = verf.f32 %v265_v17 }
 0x13d   :  { %v5780_v44 = vpop.permute.xlu1 %449 }
 0x141   :  { %v5790_v48 = vpop.permute.xlu1 %451 }
 0x143   :  { %v5276_v2 = vpop.eup %5275 }
 0x144   :  { %v319_v4 = vmul.f32 %v5276_v2, %v5667_v21  ;;  %v266_v21 = vmul.f32 0.70710677, %v256_v19 }
 0x145   :  { %v5801_v51 = vpop.permute.xlu1 %470 }
 0x146   :  { %v325_v7 = vmul.f32 %v324_v3, %v319_v4  ;;  %5281 = verf.f32 %v266_v21 }
 0x147   :  { %v5278_v6 = vpop.eup %5277 }
 0x148   :  { %v320_v8 = vmul.f32 %v5278_v6, %v5671_v25  ;;  %v331_v11 = vadd.f32 %v330_v9, %v325_v7  ;;  %v5280_v22 = vpop.eup %5279  ;;  %v262_v25 = vmul.f32 0.5, %v256_v19 }
 0x149   :  { %v273_v24 = vadd.f32 1.0, %v5280_v22  ;;  %v5805_v53 = vpop.permute.xlu1 %422 }
 0x14a   :  { %v326_v10 = vmul.f32 %v324_v3, %v320_v8 }
 0x14b   :  { %v277_v27 = vmul.f32 %v273_v24, %v261_v23 }
 0x14c   :  { %v332_v12 = vadd.f32 %v330_v9, %v326_v10 }
 0x14d   :  { %v5809_v55 = vpop.permute.xlu1 %443 }
 0x14e   :  { %v333_v13 = vpack.c.bf16 %v332_v12, %v331_v11 }
 0x150   :  { %4772 = vmatmul.mubr.msk.bf16.vlgmr.msra.gmra.mxu0 %vm293_vm0, %v333_v13 }
 0x151   :  { %4813 = vmatprep.mubr.msk.bf16.mxu0 %vm5467_vm2, %v5466_v32 }
 0x153   :  { %v5282_v26 = vpop.eup %5281 }
 0x154   :  { %v274_v28 = vadd.f32 1.0, %v5282_v26 }
 0x156   :  { %v278_v29 = vmul.f32 %v274_v28, %v262_v25 }
 0x158   :  { %v5763_v30 = vpack.c.bf16 %v278_v29, %v277_v27 }
 0x210   :  { %v5769_v39 = vpop.f32.mrf.mxu0 }
 0x211   :  { %v482_v38 = vmul.f32 %v5767_v33, %v5769_v39  ;;  %v428_v42 = vmul.f32 %v5769_v39, %v5706_v35  ;;  %v455_v46 = vmul.f32 %v5780_v44, %v5769_v39  ;;  %v426_v61 = vmul.f32 %v5803_v52, %v5769_v39 }
 0x212   :  { %v4773_v40 = vpop.f32.mrf.mxu0  ;;  %v447_v9 = vmul.f32 %v5807_v54, %v5769_v39  ;;  %v395_v26 = vmul.f32 %v5769_v39, %v5713_v36 }
 0x213   :  { %486 = vrot.lane.b32.xlu0 %v482_v38, %s6876_s7 }
 0x214   :  { %v5774_v41 = vpop.f32.mrf.mxu0 }
 0x215   :  { %v483_v43 = vmul.f32 %v5765_v31, %v5774_v41  ;;  %v429_v47 = vmul.f32 %v5774_v41, %v5701_v34  ;;  %v456_v49 = vmul.f32 %v5790_v48, %v5774_v41  ;;  %v475_v57 = vmul.f32 %v5801_v51, %v5774_v41 }
 0x216   :  { %v4774_v45 = vpop.f32.mrf.mxu0  ;;  %v427_v3 = vmul.f32 %v5805_v53, %v5774_v41  ;;  %v448_v11 = vmul.f32 %v5809_v55, %v5774_v41  ;;  %v396_v27 = vmul.f32 %v5774_v41, %v5726_v37  ;;  %v5865_v37 = vld [vmem:[%s6834_s5] sm:$0xff] }
 0x217   :  { %432 = vrot.lane.b32.xlu0 %v428_v42, %s6876_s7  ;;  %488 = vrot.lane.b32.xlu1 %v483_v43, %s6876_s7 }
 0x21b   :  { %459 = vrot.lane.b32.xlu0 %v455_v46, %s6880_s26  ;;  %434 = vrot.lane.b32.xlu1 %v429_v47, %s6876_s7 }
 0x21f   :  { %399 = vrot.lane.b32.xlu0 %v5706_v35, %s6876_s7  ;;  %461 = vrot.lane.b32.xlu1 %v456_v49, %s6880_s26  ;;  %v474_v35 = vmul.f32 %v5799_v50, %v5769_v39 }
 0x223   :  { %401 = vrot.lane.b32.xlu1 %v5701_v34, %s6876_s7 }
 0x285   :  { %v487_v56 = vpop.permute.xlu0 %486 }
 0x286   :  { %v492_v59 = vadd.f32 %v487_v56, %v474_v35 }
 0x289   :  { %v433_v34 = vpop.permute.xlu0 %432  ;;  %v489_v58 = vpop.permute.xlu1 %488 }
 0x28a   :  { %v493_v60 = vadd.f32 %v489_v58, %v475_v57  ;;  %v438_v7 = vadd.f32 %v433_v34, %v426_v61  ;;  %v5871_v57 = vld [vmem:[%s6834_s5 + $0x8] sm:$0xff] }
 0x28c   :  { %v5817_v2 = vpack.c.bf16 %v493_v60, %v492_v59 }
 0x28d   :  { %v460_v4 = vpop.permute.xlu0 %459  ;;  %v435_v6 = vpop.permute.xlu1 %434 }
 0x28e   :  { %v439_v8 = vadd.f32 %v435_v6, %v427_v3  ;;  %499 = vrot.lane.b32.xlu0 %v5817_v2, %s6868_s0  ;;  %v465_v14 = vsub.f32 %v447_v9, %v460_v4  ;;  %v5878_v3 = vpack.c.bf16 %v5774_v41, %v5769_v39  ;;  %s6870_s0 = smov 116  }
 0x290   :  { %v5825_v10 = vpack.c.bf16 %v439_v8, %v438_v7 }
 0x291   :  { %v5829_v12 = vpop.permute.xlu0 %399  ;;  %v462_v13 = vpop.permute.xlu1 %461 }
 0x292   :  { %v466_v15 = vsub.f32 %v448_v11, %v462_v13  ;;  %496 = vrot.lane.b32.xlu1 %v5825_v10, %s6880_s26  ;;  %v405_v16 = vmul.f32 %v5829_v12, %v5769_v39 }
 0x294   :  { %v5835_v17 = vpack.c.bf16 %v466_v15, %v465_v14 }
 0x295   :  { %v5837_v18 = vpop.permute.xlu1 %401 }
 0x296   :  { %550 = vrot.lane.b32.xlu0 %v5835_v17, %s6886_s14  ;;  %409 = vrot.lane.b32.xlu1 %v405_v16, %s6880_s26  ;;  %v406_v19 = vmul.f32 %v5837_v18, %v5774_v41 }
 0x29a   :  { %411 = vrot.lane.b32.xlu0 %v406_v19, %s6880_s26  ;;  %s6916_s26 = smov 80  }
 0x300   :  { %v500_v20 = vpop.permute.xlu0 %499 }
 0x301   :  { %v506_v21 = vsel %vm501_vm3, %v500_v20, 0 }
 0x302   :  { %4776 = vmatpush3.bf16.xpose.msra.mxu1 %v506_v21 }
 0x303   :  { %4781 = vmatprep.subr.bf16.mxu1 %v5466_v32 }
 0x304   :  { %v497_v22 = vpop.permute.xlu1 %496 }
 0x308   :  { %v551_v23 = vpop.permute.xlu0 %550  ;;  %v410_v25 = vpop.permute.xlu1 %409 }
 0x309   :  { %v556_v24 = vsel %vm501_vm3, %v551_v23, 0  ;;  %4778 = vmatmul.mubr.msk.bf16.vlgmr.msra.gmra.mxu1 %vm501_vm3, %v497_v22  ;;  %v415_v29 = vsub.f32 %v395_v26, %v410_v25 }
 0x30a   :  { %4782 = vmatpush3.bf16.xpose.msra.mxu1 %v556_v24  ;;  %4783 = vmatprep.mubr.msk.bf16.mxu1 %vm5467_vm2, %v5466_v32 }
 0x30b   :  { %4787 = vmatprep.subr.bf16.mxu1 %v5466_v32 }
 0x30c   :  { %v412_v28 = vpop.permute.xlu0 %411 }
 0x30d   :  { %v416_v38 = vsub.f32 %v396_v27, %v412_v28 }
 0x30f   :  { %v5856_v40 = vpack.c.bf16 %v416_v38, %v415_v29 }
 0x311   :  { %4784 = vmatmul.mubr.msk.bf16.vlgmr.msra.gmra.mxu1 %vm501_vm3, %v5856_v40 }
 0x312   :  { %4789 = vmatprep.mubr.msk.bf16.mxu1 %vm5467_vm2, %v5466_v32 }
 0x3c9   :  { %v542_v42 = vpop.f32.mrf.mxu1 }
 0x3cb   :  { %v4779_v43 = vpop.f32.mrf.mxu1 }
 0x3cd   :  { %v545_v45 = vpop.f32.mrf.mxu1 }
 0x3cf   :  { %v4780_v36 = vpop.f32.mrf.mxu1 }
 0x3d1   :  { %v592_v46 = vpop.f32.mrf.mxu1 }
 0x3d2   :  { %v593_v47 = vadd.f32 %v592_v46, %v542_v42 }
 0x3d3   :  { %v4785_v49 = vpop.f32.mrf.mxu1 }
 0x3d4   :  { %v599_v56 = vadd.f32 %v593_v47, %v5865_v37 }
 0x3d5   :  { %v595_v35 = vpop.f32.mrf.mxu1 }
 0x3d6   :  { %v596_v34 = vadd.f32 %v595_v35, %v545_v45  ;;  %v602_v58 = vsel %vm601_vm4, %v599_v56, -inf }
 0x3d7   :  { %603 = vmax.xlane.f32.xlu1 %v602_v58  ;;  %v4786_v59 = vpop.f32.mrf.mxu1 }
 0x3d8   :  { %v600_v60 = vadd.f32 %v596_v34, %v5871_v57 }
 0x3da   :  { %v605_v61 = vsel %vm601_vm4, %v600_v60, -inf }
 0x3db   :  { %606 = vmax.xlane.f32.xlu0 %v605_v61 }
 0x3e8   :  { %626 = vrot.lane.b32.xlu1 %v5878_v3, %s6862_s30  ;;  %s6865_s30 = smov 56  }
 0x3ec   :  { %676 = vrot.lane.b32.xlu1 %v5825_v10, %s6860_s1  ;;  %s6882_s1 = smov 88  }
 0x3f0   :  { %730 = vrot.lane.b32.xlu1 %v5835_v17, %s6861_s25  ;;  %s6866_s25 = smov 104  }
 0x3f4   :  { %728 = vrot.lane.b32.xlu1 %v5856_v40, %s6858_s28  ;;  %s6859_s28 = smov 76  }
 0x460   :  { %v604_v4 = vpop.xlane.xlu1 %603 }
 0x461   :  { %v608_v6 = vsub.f32 %v599_v56, %v604_v4 }
 0x463   :  { %v610_v39 = vmul.f32 1.442695, %v608_v6 }
 0x464   :  { %v607_v41 = vpop.xlane.xlu0 %606  ;;  %v627_v7 = vpop.permute.xlu1 %626 }
 0x465   :  { %5283 = vpow2.f32 %v610_v39  ;;  %v609_v8 = vsub.f32 %v600_v60, %v607_v41  ;;  %4788 = vmatpush3.bf16.msra.mxu1 %v627_v7 }
 0x466   :  { %4793 = vmatprep.subr.bf16.mxu1 %v5466_v32 }
 0x467   :  { %v612_v9 = vmul.f32 1.442695, %v609_v8 }
 0x468   :  { %v677_v26 = vpop.permute.xlu1 %676 }
 0x469   :  { %5285 = vpow2.f32 %v612_v9 }
 0x46c   :  { %v731_v28 = vpop.permute.xlu1 %730 }
 0x46d   :  { %v736_v29 = vsel %vm501_vm3, %v731_v28, 0 }
 0x470   :  { %v729_v38 = vpop.permute.xlu1 %728 }
 0x472   :  { %v5284_v11 = vpop.eup %5283 }
 0x473   :  { %v614_v13 = vsel %vm601_vm4, %v5284_v11, 0.0 }
 0x474   :  { %615 = vadd.xlane.f32.xlu0 %v614_v13 }
 0x476   :  { %v5286_v14 = vpop.eup %5285 }
 0x477   :  { %v617_v15 = vsel %vm601_vm4, %v5286_v14, 0.0 }
 0x478   :  { %618 = vadd.xlane.f32.xlu0 %v617_v15 }
 0x48e   :  { %678 = vrot.lane.b32.xlu0 %v5817_v2, %s6859_s28  ;;  %s6863_s28 = smov 72  }
 0x4fd   :  { %v616_v16 = vpop.xlane.xlu0 %615 }
 0x4fe   :  { %5287 = vrcp.f32 %v616_v16 }
 0x501   :  { %v619_v19 = vpop.xlane.xlu0 %618 }
 0x502   :  { %5289 = vrcp.f32 %v619_v19 }
 0x505   :  { %v679_v24 = vpop.permute.xlu0 %678 }
 0x506   :  { %v684_v27 = vsel %vm501_vm3, %v679_v24, 0 }
 0x50b   :  { %v5288_v20 = vpop.eup %5287 }
 0x50c   :  { %v622_v22 = vmul.f32 %v5288_v20, %v5284_v11 }
 0x50f   :  { %v5290_v21 = vpop.eup %5289 }
 0x510   :  { %v623_v23 = vmul.f32 %v5290_v21, %v5286_v14 }
 0x512   :  { %v624_v25 = vpack.c.bf16 %v623_v23, %v622_v22 }
 0x514   :  { %4790 = vmatmul.mubr.msk.bf16.vlgmr.msra.gmra.mxu1 %vm601_vm4, %v624_v25 }
 0x515   :  { %4794 = vmatpush3.bf16.xpose.msra.mxu1 %v684_v27  ;;  %4795 = vmatprep.mubr.msk.bf16.mxu1 %vm5467_vm2, %v5466_v32 }
 0x516   :  { %4799 = vmatprep.subr.bf16.mxu1 %v5466_v32 }
 0x51c   :  { %4796 = vmatmul.mubr.msk.bf16.vlgmr.msra.gmra.mxu1 %vm501_vm3, %v677_v26 }
 0x51d   :  { %4800 = vmatpush3.bf16.xpose.msra.mxu1 %v736_v29  ;;  %4801 = vmatprep.mubr.msk.bf16.mxu1 %vm5467_vm2, %v5466_v32 }
 0x51e   :  { %4805 = vmatprep.subr.bf16.mxu1 %v5466_v32 }
 0x524   :  { %4802 = vmatmul.mubr.msk.bf16.vlgmr.msra.gmra.mxu1 %vm501_vm3, %v729_v38 }
 0x525   :  { %4807 = vmatprep.mubr.msk.bf16.mxu1 %vm5467_vm2, %v5466_v32 }
 0x5d4   :  { %v666_v42 = vpop.f32.mrf.mxu1 }
 0x5d5   :  { %674 = vst.msk [vmem:[#allocation2] sm:$0xff] %vm673_vm5, %v666_v42 }
 0x5d6   :  { %v4791_v43 = vpop.f32.mrf.mxu1 }
 0x5d8   :  { %v669_v45 = vpop.f32.mrf.mxu1 }
 0x5d9   :  { %675 = vst.msk [vmem:[#allocation2 + $0x8] sm:$0xff] %vm673_vm5, %v669_v45 }
 0x5da   :  { %v4792_v36 = vpop.f32.mrf.mxu1 }
 0x5dc   :  { %v720_v46 = vpop.f32.mrf.mxu1 }
 0x5de   :  { %v4797_v47 = vpop.f32.mrf.mxu1 }
 0x5e0   :  { %v723_v49 = vpop.f32.mrf.mxu1 }
 0x5e2   :  { %v4798_v56 = vpop.f32.mrf.mxu1 }
 0x5e4   :  { %v772_v35 = vpop.f32.mrf.mxu1 }
 0x5e5   :  { %v773_v34 = vadd.f32 %v772_v35, %v720_v46 }
 0x5e6   :  { %v4803_v58 = vpop.f32.mrf.mxu1 }
 0x5e7   :  { %v779_v59 = vadd.f32 %v773_v34, %v5865_v37 }
 0x5e8   :  { %v775_v60 = vpop.f32.mrf.mxu1 }
 0x5e9   :  { %v776_v61 = vadd.f32 %v775_v60, %v723_v49  ;;  %v781_v4 = vsel %vm601_vm4, %v779_v59, -inf }
 0x5ea   :  { %782 = vmax.xlane.f32.xlu0 %v781_v4  ;;  %v4804_v6 = vpop.f32.mrf.mxu1 }
 0x5eb   :  { %v780_v39 = vadd.f32 %v776_v61, %v5871_v57 }
 0x5ed   :  { %v784_v41 = vsel %vm601_vm4, %v780_v39, -inf }
 0x5ee   :  { %785 = vmax.xlane.f32.xlu1 %v784_v41 }
 0x5ff   :  { %864 = vrot.lane.b32.xlu1 %v5817_v2, %s6863_s28  ;;  %s6884_s28 = smov 120  }
 0x603   :  { %915 = vrot.lane.b32.xlu1 %v5835_v17, %s6882_s1  ;;  %s6918_s1 = smov 72  }
 0x607   :  { %862 = vrot.lane.b32.xlu1 %v5825_v10, %s6866_s25  ;;  %s6872_s25 = smov 100  }
 0x673   :  { %v783_v7 = vpop.xlane.xlu0 %782 }
 0x674   :  { %v787_v8 = vsub.f32 %v779_v59, %v783_v7 }
 0x676   :  { %v789_v9 = vmul.f32 1.442695, %v787_v8 }
 0x677   :  { %v786_v11 = vpop.xlane.xlu1 %785 }
 0x678   :  { %5291 = vpow2.f32 %v789_v9  ;;  %v788_v13 = vsub.f32 %v780_v39, %v786_v11 }
 0x67a   :  { %v791_v14 = vmul.f32 1.442695, %v788_v13 }
 0x67b   :  { %v865_v15 = vpop.permute.xlu1 %864 }
 0x67c   :  { %5293 = vpow2.f32 %v791_v14  ;;  %v870_v16 = vsel %vm501_vm3, %v865_v15, 0 }
 0x67d   :  { %4812 = vmatpush3.bf16.xpose.msra.mxu0 %v870_v16 }
 0x67e   :  { %4823 = vmatprep.subr.bf16.mxu0 %v5466_v32 }
 0x67f   :  { %v916_v19 = vpop.permute.xlu1 %915 }
 0x680   :  { %v921_v45 = vsel %vm501_vm3, %v916_v19, 0 }
 0x683   :  { %v863_v20 = vpop.permute.xlu1 %862 }
 0x684   :  { %4814 = vmatmul.mubr.msk.bf16.vlgmr.msra.gmra.mxu0 %vm501_vm3, %v863_v20 }
 0x685   :  { %v5292_v21 = vpop.eup %5291  ;;  %4825 = vmatprep.mubr.msk.bf16.mxu0 %vm5467_vm2, %v5466_v32 }
 0x686   :  { %v793_v22 = vsel %vm601_vm4, %v5292_v21, 0.0 }
 0x687   :  { %794 = vadd.xlane.f32.xlu0 %v793_v22 }
 0x689   :  { %v5294_v23 = vpop.eup %5293 }
 0x68a   :  { %v796_v24 = vsel %vm601_vm4, %v5294_v23, 0.0 }
 0x68b   :  { %797 = vadd.xlane.f32.xlu0 %v796_v24 }
 0x6a1   :  { %804 = vrot.lane.b32.xlu0 %v5878_v3, %s6865_s30  ;;  %s6874_s30 = smov 84  }
 0x6a5   :  { %913 = vrot.lane.b32.xlu0 %v5856_v40, %s6884_s28 }
 0x710   :  { %v795_v25 = vpop.xlane.xlu0 %794 }
 0x711   :  { %5295 = vrcp.f32 %v795_v25 }
 0x714   :  { %v798_v26 = vpop.xlane.xlu0 %797 }
 0x715   :  { %5297 = vrcp.f32 %v798_v26 }
 0x718   :  { %v805_v27 = vpop.permute.xlu0 %804 }
 0x719   :  { %4806 = vmatpush3.bf16.msra.mxu1 %v805_v27 }
 0x71a   :  { %4817 = vmatprep.subr.bf16.mxu1 %v5466_v32 }
 0x71c   :  { %v914_v36 = vpop.permute.xlu0 %913 }
 0x71e   :  { %v5296_v28 = vpop.eup %5295 }
 0x71f   :  { %v801_v38 = vmul.f32 %v5296_v28, %v5292_v21 }
 0x722   :  { %v5298_v29 = vpop.eup %5297 }
 0x723   :  { %v802_v42 = vmul.f32 %v5298_v29, %v5294_v23 }
 0x725   :  { %v803_v43 = vpack.c.bf16 %v802_v42, %v801_v38 }
 0x727   :  { %4808 = vmatmul.mubr.msk.bf16.vlgmr.msra.gmra.mxu1 %vm601_vm4, %v803_v43 }
 0x728   :  { %4818 = vmatpush3.bf16.xpose.msra.mxu1 %v921_v45  ;;  %4819 = vmatprep.mubr.msk.bf16.mxu1 %vm5467_vm2, %v5466_v32 }
 0x729   :  { %4829 = vmatprep.subr.bf16.mxu1 %v5466_v32 }
 0x72f   :  { %4820 = vmatmul.mubr.msk.bf16.vlgmr.msra.gmra.mxu1 %vm501_vm3, %v914_v36 }
 0x730   :  { %4831 = vmatprep.mubr.msk.bf16.mxu1 %vm5467_vm2, %v5466_v32 }
 0x744   :  { %v906_v46 = vpop.f32.mrf.mxu0 }
 0x746   :  { %v4815_v47 = vpop.f32.mrf.mxu0 }
 0x748   :  { %v909_v49 = vpop.f32.mrf.mxu0 }
 0x74a   :  { %v4816_v56 = vpop.f32.mrf.mxu0 }
 0x7e7   :  { %v5938_v35 = vpop.f32.mrf.mxu1 }
 0x7e9   :  { %v4809_v34 = vpop.f32.mrf.mxu1 }
 0x7eb   :  { %v5940_v58 = vpop.f32.mrf.mxu1 }
 0x7ed   :  { %v4810_v59 = vpop.f32.mrf.mxu1 }
 0x7ef   :  { %v957_v60 = vpop.f32.mrf.mxu1 }
 0x7f0   :  { %v958_v61 = vadd.f32 %v957_v60, %v906_v46 }
 0x7f1   :  { %v4821_v4 = vpop.f32.mrf.mxu1 }
 0x7f2   :  { %v964_v6 = vadd.f32 %v958_v61, %v5865_v37 }
 0x7f3   :  { %v960_v39 = vpop.f32.mrf.mxu1 }
 0x7f4   :  { %v961_v41 = vadd.f32 %v960_v39, %v909_v49  ;;  %v966_v7 = vsel %vm601_vm4, %v964_v6, -inf }
 0x7f5   :  { %v4822_v8 = vpop.f32.mrf.mxu1  ;;  %967 = vmax.xlane.f32.xlu1 %v966_v7 }
 0x7f6   :  { %v965_v9 = vadd.f32 %v961_v41, %v5871_v57 }
 0x7f8   :  { %v969_v11 = vsel %vm601_vm4, %v965_v9, -inf }
 0x7f9   :  { %970 = vmax.xlane.f32.xlu0 %v969_v11 }
 0x806   :  { %989 = vrot.lane.b32.xlu1 %v5878_v3, %s6875_s4  ;;  %s6914_s4 = smov 88  }
 0x80a   :  { %1100 = vrot.lane.b32.xlu1 %v5835_v17, %s6874_s30  ;;  %s6917_s30 = smov 104  }
 0x80e   :  { %1047 = vrot.lane.b32.xlu1 %v5825_v10, %s6872_s25  ;;  %s6873_s25 = smov 40  }
 0x812   :  { %1098 = vrot.lane.b32.xlu1 %v5856_v40, %s6870_s0  ;;  %s6871_s0 = smov 68  }
 0x87e   :  { %v968_v13 = vpop.xlane.xlu1 %967 }
 0x87f   :  { %v972_v14 = vsub.f32 %v964_v6, %v968_v13 }
 0x881   :  { %v974_v15 = vmul.f32 1.442695, %v972_v14 }
 0x882   :  { %v990_v16 = vpop.permute.xlu1 %989  ;;  %v971_v19 = vpop.xlane.xlu0 %970 }
 0x883   :  { %5299 = vpow2.f32 %v974_v15  ;;  %v973_v20 = vsub.f32 %v965_v9, %v971_v19  ;;  %4824 = vmatpush3.bf16.msra.mxu0 %v990_v16 }
 0x884   :  { %4835 = vmatprep.subr.bf16.mxu0 %v5466_v32 }
 0x885   :  { %v976_v21 = vmul.f32 1.442695, %v973_v20 }
 0x886   :  { %v1101_v27 = vpop.permute.xlu1 %1100 }
 0x887   :  { %5301 = vpow2.f32 %v976_v21  ;;  %v1106_v45 = vsel %vm501_vm3, %v1101_v27, 0 }
 0x88a   :  { %v1048_v29 = vpop.permute.xlu1 %1047 }
 0x88e   :  { %v1099_v36 = vpop.permute.xlu1 %1098 }
 0x890   :  { %v5300_v17 = vpop.eup %5299 }
 0x891   :  { %v978_v22 = vsel %vm601_vm4, %v5300_v17, 0.0 }
 0x892   :  { %979 = vadd.xlane.f32.xlu0 %v978_v22 }
 0x894   :  { %v5302_v10 = vpop.eup %5301 }
 0x895   :  { %v981_v23 = vsel %vm601_vm4, %v5302_v10, 0.0 }
 0x896   :  { %982 = vadd.xlane.f32.xlu0 %v981_v23 }
 0x8ac   :  { %1049 = vrot.lane.b32.xlu0 %v5817_v2, %s6871_s0  ;;  %s6878_s0 = smov 8  }
 0x91b   :  { %v980_v40 = vpop.xlane.xlu0 %979 }
 0x91c   :  { %5303 = vrcp.f32 %v980_v40 }
 0x91f   :  { %v983_v24 = vpop.xlane.xlu0 %982 }
 0x920   :  { %5305 = vrcp.f32 %v983_v24 }
 0x923   :  { %v1050_v25 = vpop.permute.xlu0 %1049 }
 0x924   :  { %v1055_v26 = vsel %vm501_vm3, %v1050_v25, 0 }
 0x925   :  { %4830 = vmatpush3.bf16.xpose.msra.mxu1 %v1055_v26 }
 0x926   :  { %4841 = vmatprep.subr.bf16.mxu1 %v5466_v32 }
 0x929   :  { %v5304_v28 = vpop.eup %5303 }
 0x92a   :  { %v986_v2 = vmul.f32 %v5304_v28, %v5300_v17 }
 0x92c   :  { %4832 = vmatmul.mubr.msk.bf16.vlgmr.msra.gmra.mxu1 %vm501_vm3, %v1048_v29 }
 0x92d   :  { %v5306_v38 = vpop.eup %5305  ;;  %4843 = vmatprep.mubr.msk.bf16.mxu1 %vm5467_vm2, %v5466_v32 }
 0x92e   :  { %v987_v42 = vmul.f32 %v5306_v38, %v5302_v10 }
 0x930   :  { %v988_v43 = vpack.c.bf16 %v987_v42, %v986_v2  ;;  %v5232_v42 = vld [vmem:[%s6835_s10] sm:$0xff]  }
 0x932   :  { %4826 = vmatmul.mubr.msk.bf16.vlgmr.msra.gmra.mxu0 %vm601_vm4, %v988_v43 }
 0x933   :  { %4836 = vmatpush3.bf16.xpose.msra.mxu0 %v1106_v45  ;;  %4837 = vmatprep.mubr.msk.bf16.mxu0 %vm5467_vm2, %v5466_v32  ;;  %v5233_v45 = vld [vmem:[%s6836_s12 + $0x8] sm:$0xff]  }
 0x934   :  { %4847 = vmatprep.subr.bf16.mxu0 %v5466_v32 }
 0x93a   :  { %4838 = vmatmul.mubr.msk.bf16.vlgmr.msra.gmra.mxu0 %vm501_vm3, %v1099_v36 }
 0x93b   :  { %4851 = vmatprep.mubr.msk.bf16.mxu0 %vm5467_vm2, %v5466_v32 }
 0x9ec   :  { %v1091_v46 = vpop.f32.mrf.mxu1 }
 0x9ee   :  { %v4833_v47 = vpop.f32.mrf.mxu1 }
 0x9f0   :  { %v1094_v49 = vpop.f32.mrf.mxu1 }
 0x9f2   :  { %v1029_v56 = vpop.f32.mrf.mxu0  ;;  %v4834_v34 = vpop.f32.mrf.mxu1 }
 0x9f4   :  { %v4827_v59 = vpop.f32.mrf.mxu0 }
 0x9f6   :  { %v1032_v60 = vpop.f32.mrf.mxu0 }
 0x9f8   :  { %v4828_v61 = vpop.f32.mrf.mxu0 }
 0x9f9   :  { %v5234_v61 = vld [vmem:[%s6836_s12] sm:$0xff]  }
 0x9fa   :  { %v1142_v4 = vpop.f32.mrf.mxu0 }
 0x9fb   :  { %v1143_v6 = vadd.f32 %v1142_v4, %v1091_v46 }
 0x9fc   :  { %v4839_v39 = vpop.f32.mrf.mxu0 }
 0x9fd   :  { %v1149_v41 = vadd.f32 %v1143_v6, %v5865_v37  ;;  %v5451_v6 = vld [vmem:[%s6905_s27] sm:$0xff] }
 0x9fe   :  { %v1145_v7 = vpop.f32.mrf.mxu0 }
 0x9ff   :  { %v1146_v8 = vadd.f32 %v1145_v7, %v1094_v49  ;;  %v1151_v9 = vsel %vm601_vm4, %v1149_v41, -inf }
 0xa00   :  { %1152 = vmax.xlane.f32.xlu0 %v1151_v9  ;;  %v4840_v11 = vpop.f32.mrf.mxu0  ;;  %v5452_v9 = vld [vmem:[%s6905_s27 + $0x8] sm:$0xff]  ;;  %s6920_s27 = smov 16  }
 0xa01   :  { %v1150_v13 = vadd.f32 %v1146_v8, %v5871_v57 }
 0xa03   :  { %v1154_v14 = vsel %vm601_vm4, %v1150_v13, -inf }
 0xa04   :  { %1155 = vmax.xlane.f32.xlu1 %v1154_v14 }
 0xa15   :  { %853 = vrot.lane.b32.xlu1 %v5938_v35, %s6878_s0 }
 0xa19   :  { %855 = vrot.lane.b32.xlu1 %v5940_v58, %s6878_s0  ;;  %s6888_s0 = smov 24  }
 0xa1d   :  { %1038 = vrot.lane.b32.xlu1 %v1029_v56, %s6876_s7 }
 0xa89   :  { %v1153_v37 = vpop.xlane.xlu0 %1152 }
 0xa8a   :  { %v1157_v15 = vsub.f32 %v1149_v41, %v1153_v37 }
 0xa8c   :  { %v1159_v16 = vmul.f32 1.442695, %v1157_v15 }
 0xa8d   :  { %v1156_v19 = vpop.xlane.xlu1 %1155 }
 0xa8e   :  { %5307 = vpow2.f32 %v1159_v16  ;;  %v1158_v20 = vsub.f32 %v1150_v13, %v1156_v19 }
 0xa90   :  { %v1161_v57 = vmul.f32 1.442695, %v1158_v20 }
 0xa91   :  { %v854_v21 = vpop.permute.xlu1 %853 }
 0xa92   :  { %5309 = vpow2.f32 %v1161_v57  ;;  %860 = vst.msk [vmem:[#allocation2] sm:$0xff] %vm859_vm6, %v854_v21 }
 0xa95   :  { %v856_v17 = vpop.permute.xlu1 %855 }
 0xa96   :  { %861 = vst.msk [vmem:[#allocation2 + $0x8] sm:$0xff] %vm859_vm6, %v856_v17 }
 0xa99   :  { %v1039_v35 = vpop.permute.xlu1 %1038 }
 0xa9a   :  { %1045 = vst.msk [vmem:[#allocation2] sm:$0xff] %vm1044_vm7, %v1039_v35 }
 0xa9b   :  { %v5308_v58 = vpop.eup %5307 }
 0xa9c   :  { %v1163_v22 = vsel %vm601_vm4, %v5308_v58, 0.0 }
 0xa9d   :  { %1164 = vadd.xlane.f32.xlu0 %v1163_v22  ;;  %v5235_v22 = vld [vmem:[%s6837_s11 + $0x8] sm:$0xff]  }
 0xa9f   :  { %v5310_v10 = vpop.eup %5309 }
 0xaa0   :  { %v1166_v23 = vsel %vm601_vm4, %v5310_v10, 0.0 }
 0xaa1   :  { %1167 = vadd.xlane.f32.xlu0 %v1166_v23 }
 0xab7   :  { %1174 = vrot.lane.b32.xlu0 %v5878_v3, %s6873_s25  ;;  %v5231_v3 = vld [vmem:[%s6835_s10 + $0x8] sm:$0xff]   ;;  %s6919_s25 = smov 8  }
 0xab8   :  { %4848 = vmatpush3.bf16.msra.mxu0 %v5231_v3 }
 0xab9   :  { %4849 = vmatprep.subr.bf16.mxu0 %v5466_v32 }
 0xabb   :  { %1040 = vrot.lane.b32.xlu0 %v1032_v60, %s6876_s7  ;;  %s6915_s7 = smov 112  }
 0xabc   :  { %4850 = vmatpush3.bf16.msra.mxu0 %v5232_v42 }
 0xabd   :  { %4863 = vmatprep.subr.bf16.mxu0 %v5233_v45 }
 0xb26   :  { %v1165_v40 = vpop.xlane.xlu0 %1164 }
 0xb27   :  { %5311 = vrcp.f32 %v1165_v40 }
 0xb2a   :  { %v1168_v24 = vpop.xlane.xlu0 %1167 }
 0xb2b   :  { %5313 = vrcp.f32 %v1168_v24 }
 0xb2e   :  { %v1175_v25 = vpop.permute.xlu0 %1174 }
 0xb2f   :  { %4842 = vmatpush3.bf16.msra.mxu1 %v1175_v25 }
 0xb30   :  { %4855 = vmatprep.subr.bf16.mxu1 %v5466_v32 }
 0xb32   :  { %v1041_v26 = vpop.permute.xlu0 %1040 }
 0xb33   :  { %1046 = vst.msk [vmem:[#allocation2 + $0x8] sm:$0xff] %vm1044_vm7, %v1041_v26 }
 0xb34   :  { %v5312_v27 = vpop.eup %5311 }
 0xb35   :  { %v1171_v29 = vmul.f32 %v5312_v27, %v5308_v58 }
 0xb38   :  { %v5314_v28 = vpop.eup %5313 }
 0xb39   :  { %v1172_v38 = vmul.f32 %v5314_v28, %v5310_v10  ;;  %v5236_v10 = vld [vmem:[%s6837_s11] sm:$0xff]   ;;  %v6046_v28 = vsub.s32 1, %v5739_v63 }
 0xb3b   :  { %v1173_v2 = vpack.c.bf16 %v1172_v38, %v1171_v29  ;;  %v1326_v3 = vrot.slane %v5747_v1, %v6046_v28 }
 0xb3d   :  { %4844 = vmatmul.mubr.msk.bf16.vlgmr.msra.gmra.mxu1 %vm601_vm4, %v1173_v2 }
 0xb3e   :  { %4859 = vmatprep.mubr.msk.bf16.mxu1 %vm5467_vm2, %v5466_v32  ;;  %4856 = vmatpush3.bf16.msra.mxu1 %v5235_v22 }
 0xb3f   :  { %4857 = vmatprep.subr.bf16.mxu1 %v5466_v32 }
 0xb42   :  { %4858 = vmatpush3.bf16.msra.mxu1 %v5236_v10 }
 0xb43   :  { %4871 = vmatprep.subr.bf16.mxu1 %v5466_v32 }
 0xbfd   :  { %v1214_v43 = vpop.f32.mrf.mxu1 }
 0xbfe   :  { %1223 = vrot.lane.b32.xlu1 %v1214_v43, %s6888_s0 }
 0xbff   :  { %v4845_v36 = vpop.f32.mrf.mxu1 }
 0xc01   :  { %v1217_v46 = vpop.f32.mrf.mxu1 }
 0xc02   :  { %1225 = vrot.lane.b32.xlu0 %v1217_v46, %s6888_s0  ;;  %v1332_v46 = vrot.slane %v5755_v5, %v6046_v28  ;;  %s6928_s0 = smov 56  }
 0xc03   :  { %v4846_v47 = vpop.f32.mrf.mxu1 }
 0xc70   :  { %v1224_v49 = vpop.permute.xlu1 %1223 }
 0xc71   :  { %1230 = vst.msk [vmem:[#allocation2] sm:$0xff] %vm1229_vm8, %v1224_v49 }
 0xc74   :  { %v1226_v56 = vpop.permute.xlu0 %1225 }
 0xc75   :  { %1231 = vst.msk [vmem:[#allocation2 + $0x8] sm:$0xff] %vm1229_vm8, %v1226_v56 }
 0xc78   :  { %v1232_v34 = vld [vmem:[#allocation2] sm:$0xff] }
 0xc7c   :  { %v1233_v59 = vld [vmem:[#allocation2 + $0x8] sm:$0xff] }
 0xc7d   :  { %v1234_v60 = vpack.c.bf16 %v1233_v59, %v1232_v34 }
 0xc7f   :  { %4852 = vmatmul.mubr.msk.bf16.vlgmr.msra.gmra.mxu0 %vm293_vm0, %v1234_v60 }
 0xc80   :  { %4864 = vmatpush3.bf16.msra.mxu0 %v5233_v45  ;;  %4867 = vmatprep.mubr.msk.bf16.mxu0 %vm293_vm0, %v5737_v62 }
 0xc81   :  { %4865 = vmatprep.subr.bf16.mxu0 %v5234_v61 }
 0xc84   :  { %4866 = vmatpush3.bf16.msra.mxu0 %v5234_v61 }
 0xc85   :  { %4879 = vmatprep.subr.bf16.mxu0 %v5466_v32 }
 0xc87   :  { %4868 = vmatmul.mubr.msk.bf16.vlgmr.msra.gmra.mxu0 %vm293_vm0, %v5763_v30 }
 0xc88   :  { %4883 = vmatprep.mubr.msk.bf16.mxu0 %vm5467_vm2, %v5466_v32 }
 0xd3f   :  { %v1288_v4 = vpop.f32.mrf.mxu0 }
 0xd40   :  { %v6022_v39 = vadd.f32 %v5451_v6, %v1288_v4 }
 0xd41   :  { %v4853_v41 = vpop.f32.mrf.mxu0 }
 0xd42   :  { %v1297_v7 = vsel %vm293_vm0, %v6022_v39, 0.0 }
 0xd43   :  { %1298 = vadd.xlane.f32.xlu1 %v1297_v7  ;;  %v1291_v8 = vpop.f32.mrf.mxu0 }
 0xd44   :  { %v6029_v11 = vadd.f32 %v5452_v9, %v1291_v8 }
 0xd45   :  { %v4854_v13 = vpop.f32.mrf.mxu0 }
 0xd46   :  { %v1300_v14 = vsel %vm293_vm0, %v6029_v11, 0.0  ;;  %v6074_v13 = vld [vmem:[%s6838_s6] sm:$0xff] }
 0xd47   :  { %1301 = vadd.xlane.f32.xlu0 %v1300_v14  ;;  %v4869_v29 = vpop.f32.mrf.mxu0 }
 0xd49   :  { %v1453_v42 = vpop.f32.mrf.mxu0 }
 0xd4b   :  { %v4870_v47 = vpop.f32.mrf.mxu0 }
 0xd4c   :  { %v6052_v56 = vpack.c.bf16 %v4870_v47, %v4869_v29 }
 0xd4d   :  { %v1456_v1 = vpop.f32.mrf.mxu0 }
 0xd4e   :  { %v1477_v61 = vsel %vm673_vm5, %v6052_v56, 0  ;;  %v6060_v5 = vpack.c.bf16 %v1456_v1, %v1453_v42 }
 0xd50   :  { %v1474_v4 = vsel %vm673_vm5, %v6060_v5, 0 }
 0xdcc   :  { %v1299_v37 = vpop.xlane.xlu1 %1298 }
 0xdcd   :  { %v1303_v15 = vmul.f32 0.03125, %v1299_v37 }
 0xdcf   :  { %v1305_v16 = vsub.f32 %v6022_v39, %v1303_v15 }
 0xdd0   :  { %v1302_v19 = vpop.xlane.xlu0 %1301 }
 0xdd1   :  { %v1304_v20 = vmul.f32 0.03125, %v1302_v19  ;;  %v1307_v57 = vmul.f32 %v1305_v16, %v1305_v16 }
 0xdd3   :  { %v1306_v21 = vsub.f32 %v6029_v11, %v1304_v20  ;;  %v1309_v17 = vsel %vm293_vm0, %v1307_v57, 0.0 }
 0xdd4   :  { %1310 = vadd.xlane.f32.xlu0 %v1309_v17 }
 0xdd5   :  { %v1308_v35 = vmul.f32 %v1306_v21, %v1306_v21 }
 0xdd7   :  { %v1312_v58 = vsel %vm293_vm0, %v1308_v35, 0.0 }
 0xdd8   :  { %1313 = vadd.xlane.f32.xlu0 %v1312_v58 }
 0xe5d   :  { %v1311_v23 = vpop.xlane.xlu0 %1310 }
 0xe5e   :  { %v1315_v40 = vmul.f32 0.03125, %v1311_v23 }
 0xe60   :  { %v1317_v24 = vadd.f32 1e-05, %v1315_v40 }
 0xe61   :  { %v1314_v25 = vpop.xlane.xlu0 %1313 }
 0xe62   :  { %5315 = vrsqrt.f32 %v1317_v24  ;;  %v1316_v26 = vmul.f32 0.03125, %v1314_v25 }
 0xe64   :  { %v1318_v27 = vadd.f32 1e-05, %v1316_v26 }
 0xe66   :  { %5317 = vrsqrt.f32 %v1318_v27 }
 0xe6f   :  { %v5316_v38 = vpop.eup %5315 }
 0xe70   :  { %v1321_v2 = vmul.f32 %v5316_v38, %v1305_v16  ;;  %v6080_v16 = vld [vmem:[%s6838_s6 + $0x8] sm:$0xff] }
 0xe72   :  { %v1327_v36 = vmul.f32 %v1326_v3, %v1321_v2 }
 0xe73   :  { %v5318_v43 = vpop.eup %5317 }
 0xe74   :  { %v1322_v45 = vmul.f32 %v5318_v43, %v1306_v21  ;;  %v1333_v34 = vadd.f32 %v1332_v46, %v1327_v36 }
 0xe76   :  { %v1328_v49 = vmul.f32 %v1326_v3, %v1322_v45 }
 0xe78   :  { %v1334_v59 = vadd.f32 %v1332_v46, %v1328_v49 }
 0xe7a   :  { %v1335_v60 = vpack.c.bf16 %v1334_v59, %v1333_v34 }
 0xe7c   :  { %4860 = vmatmul.mubr.msk.bf16.vlgmr.msra.gmra.mxu1 %vm293_vm0, %v1335_v60 }
 0xe7d   :  { %4872 = vmatpush3.bf16.xpose.msra.mxu1 %v1477_v61  ;;  %4875 = vmatprep.mubr.msk.bf16.mxu1 %vm5467_vm2, %v5466_v32 }
 0xe7e   :  { %4873 = vmatprep.subr.bf16.mxu1 %v5466_v32 }
 0xe85   :  { %4874 = vmatpush3.bf16.xpose.msra.mxu1 %v1474_v4 }
 0xe86   :  { %4895 = vmatprep.subr.bf16.mxu1 %v5466_v32 }
 0xf3c   :  { %v1389_v6 = vpop.f32.mrf.mxu1 }
 0xf3e   :  { %v4861_v41 = vpop.f32.mrf.mxu1 }
 0xf40   :  { %v1392_v7 = vpop.f32.mrf.mxu1 }
 0xf41   :  { %v6065_v8 = vpack.c.bf16 %v1392_v7, %v1389_v6 }
 0xf42   :  { %v4862_v9 = vpop.f32.mrf.mxu1 }
 0xf43   :  { %4876 = vmatmul.mubr.msk.bf16.vlgmr.msra.gmra.mxu1 %vm673_vm5, %v6065_v8 }
 0xf44   :  { %4899 = vmatprep.mubr.msk.bf16.mxu1 %vm5467_vm2, %v5466_v32 }
0x1003   :  { %v1513_v14 = vpop.f32.mrf.mxu1 }
0x1004   :  { %v1514_v37 = vadd.f32 %v1513_v14, %v6074_v13 }
0x1005   :  { %v4877_v15 = vpop.f32.mrf.mxu1 }
0x1006   :  { %v1520_v19 = vsel %vm293_vm0, %v1514_v37, -inf }
0x1007   :  { %1521 = vmax.xlane.f32.xlu1 %v1520_v19  ;;  %v1516_v20 = vpop.f32.mrf.mxu1 }
0x1008   :  { %v1517_v57 = vadd.f32 %v1516_v20, %v6080_v16 }
0x1009   :  { %v4878_v21 = vpop.f32.mrf.mxu1 }
0x100a   :  { %v1523_v17 = vsel %vm293_vm0, %v1517_v57, -inf }
0x100b   :  { %1524 = vmax.xlane.f32.xlu0 %v1523_v17 }
0x1018   :  { %1547 = vrot.lane.b32.xlu1 %v6052_v56, %s6886_s14 }
0x1090   :  { %v1522_v35 = vpop.xlane.xlu1 %1521 }
0x1091   :  { %v1526_v58 = vsub.f32 %v1514_v37, %v1522_v35 }
0x1093   :  { %v1528_v22 = vmul.f32 1.442695, %v1526_v58 }
0x1094   :  { %v1548_v10 = vpop.permute.xlu1 %1547  ;;  %v1525_v23 = vpop.xlane.xlu0 %1524 }
0x1095   :  { %5319 = vpow2.f32 %v1528_v22  ;;  %v1527_v40 = vsub.f32 %v1517_v57, %v1525_v23  ;;  %4880 = vmatpush3.bf16.msra.mxu0 %v1548_v10 }
0x1096   :  { %4881 = vmatprep.subr.bf16.mxu0 %v5466_v32 }
0x1097   :  { %v1530_v24 = vmul.f32 1.442695, %v1527_v40 }
0x1099   :  { %5321 = vpow2.f32 %v1530_v24 }
0x10a2   :  { %v5320_v25 = vpop.eup %5319 }
0x10a3   :  { %v1532_v26 = vsel %vm293_vm0, %v5320_v25, 0.0 }
0x10a4   :  { %1533 = vadd.xlane.f32.xlu1 %v1532_v26 }
0x10a6   :  { %v5322_v27 = vpop.eup %5321 }
0x10a7   :  { %v1535_v29 = vsel %vm293_vm0, %v5322_v27, 0.0 }
0x10a8   :  { %1536 = vadd.xlane.f32.xlu0 %v1535_v29 }
0x10b5   :  { %1602 = vrot.lane.b32.xlu1 %v6052_v56, %s6884_s28 }
0x10b9   :  { %1600 = vrot.lane.b32.xlu1 %v6060_v5, %s6884_s28 }
0x10bd   :  { %1598 = vrot.lane.b32.xlu1 %v6065_v8, %s6884_s28  ;;  %s6924_s28 = smov 92  }
0x10be   :  { %1545 = vrot.lane.b32.xlu0 %v6060_v5, %s6886_s14  ;;  %s6923_s14 = smov 64  }
0x112d   :  { %v1534_v38 = vpop.xlane.xlu1 %1533 }
0x112e   :  { %5323 = vrcp.f32 %v1534_v38 }
0x1131   :  { %v1537_v2 = vpop.xlane.xlu0 %1536  ;;  %v1603_v46 = vpop.permute.xlu1 %1602 }
0x1132   :  { %5325 = vrcp.f32 %v1537_v2  ;;  %v1611_v49 = vsel %vm673_vm5, %v1603_v46, 0 }
0x1135   :  { %v1546_v3 = vpop.permute.xlu0 %1545  ;;  %v1601_v34 = vpop.permute.xlu1 %1600 }
0x1136   :  { %4882 = vmatpush3.bf16.msra.mxu0 %v1546_v3  ;;  %v1608_v59 = vsel %vm673_vm5, %v1601_v34, 0 }
0x1137   :  { %4887 = vmatprep.subr.bf16.mxu0 %v5466_v32 }
0x1139   :  { %v1599_v60 = vpop.permute.xlu1 %1598 }
0x113b   :  { %v5324_v42 = vpop.eup %5323 }
0x113c   :  { %v1540_v45 = vmul.f32 %v5324_v42, %v5320_v25 }
0x113f   :  { %v5326_v43 = vpop.eup %5325 }
0x1140   :  { %v1541_v36 = vmul.f32 %v5326_v43, %v5322_v27 }
0x1142   :  { %v1542_v47 = vpack.c.bf16 %v1541_v36, %v1540_v45 }
0x1144   :  { %4884 = vmatmul.mubr.msk.bf16.vlgmr.msra.gmra.mxu0 %vm293_vm0, %v1542_v47 }
0x1145   :  { %4888 = vmatpush3.bf16.xpose.msra.mxu0 %v1611_v49  ;;  %4891 = vmatprep.mubr.msk.bf16.mxu0 %vm5467_vm2, %v5466_v32 }
0x1146   :  { %4889 = vmatprep.subr.bf16.mxu0 %v5466_v32 }
0x114d   :  { %4890 = vmatpush3.bf16.xpose.msra.mxu0 %v1608_v59 }
0x114e   :  { %4911 = vmatprep.subr.bf16.mxu0 %v5466_v32 }
0x1154   :  { %4892 = vmatmul.mubr.msk.bf16.vlgmr.msra.gmra.mxu0 %vm673_vm5, %v1599_v60 }
0x1155   :  { %4915 = vmatprep.mubr.msk.bf16.mxu0 %vm5467_vm2, %v5466_v32 }
0x1204   :  { %v1588_v61 = vpop.f32.mrf.mxu0 }
0x1205   :  { %1595 = vst.msk [vmem:[#allocation2] sm:$0xff] %vm673_vm5, %v1588_v61 }
0x1206   :  { %v4885_v1 = vpop.f32.mrf.mxu0 }
0x1208   :  { %v1591_v4 = vpop.f32.mrf.mxu0 }
0x1209   :  { %1596 = vst.msk [vmem:[#allocation2 + $0x8] sm:$0xff] %vm673_vm5, %v1591_v4 }
0x120a   :  { %v4886_v6 = vpop.f32.mrf.mxu0 }
0x1214   :  { %v1647_v41 = vpop.f32.mrf.mxu0 }
0x1215   :  { %v1648_v7 = vadd.f32 %v1647_v41, %v6074_v13 }
0x1216   :  { %v4893_v9 = vpop.f32.mrf.mxu0 }
0x1217   :  { %v1654_v14 = vsel %vm293_vm0, %v1648_v7, -inf }
0x1218   :  { %1655 = vmax.xlane.f32.xlu0 %v1654_v14  ;;  %v1650_v37 = vpop.f32.mrf.mxu0 }
0x1219   :  { %v1651_v15 = vadd.f32 %v1650_v37, %v6080_v16 }
0x121a   :  { %v4894_v19 = vpop.f32.mrf.mxu0 }
0x121b   :  { %v1657_v20 = vsel %vm293_vm0, %v1651_v15, -inf }
0x121c   :  { %1658 = vmax.xlane.f32.xlu1 %v1657_v20 }
0x122d   :  { %1677 = vrot.lane.b32.xlu1 %v6060_v5, %s6914_s4 }
0x1231   :  { %1741 = vrot.lane.b32.xlu1 %v6052_v56, %s6915_s7 }
0x1235   :  { %1739 = vrot.lane.b32.xlu1 %v6060_v5, %s6915_s7 }
0x12a1   :  { %v1656_v57 = vpop.xlane.xlu0 %1655 }
0x12a2   :  { %v1660_v21 = vsub.f32 %v1648_v7, %v1656_v57 }
0x12a4   :  { %v1662_v17 = vmul.f32 1.442695, %v1660_v21 }
0x12a5   :  { %v1659_v35 = vpop.xlane.xlu1 %1658 }
0x12a6   :  { %5327 = vpow2.f32 %v1662_v17  ;;  %v1661_v58 = vsub.f32 %v1651_v15, %v1659_v35 }
0x12a8   :  { %v1664_v22 = vmul.f32 1.442695, %v1661_v58 }
0x12a9   :  { %v1678_v29 = vpop.permute.xlu1 %1677 }
0x12aa   :  { %5329 = vpow2.f32 %v1664_v22 }
0x12ad   :  { %v1742_v43 = vpop.permute.xlu1 %1741 }
0x12ae   :  { %v1750_v36 = vsel %vm673_vm5, %v1742_v43, 0 }
0x12b1   :  { %v1740_v46 = vpop.permute.xlu1 %1739 }
0x12b2   :  { %v1747_v47 = vsel %vm673_vm5, %v1740_v46, 0 }
0x12b3   :  { %v5328_v10 = vpop.eup %5327 }
0x12b4   :  { %v1666_v23 = vsel %vm293_vm0, %v5328_v10, 0.0 }
0x12b5   :  { %1667 = vadd.xlane.f32.xlu0 %v1666_v23 }
0x12b7   :  { %v5330_v40 = vpop.eup %5329 }
0x12b8   :  { %v1669_v24 = vsel %vm293_vm0, %v5330_v40, 0.0 }
0x12b9   :  { %1670 = vadd.xlane.f32.xlu0 %v1669_v24 }
0x12cf   :  { %1679 = vrot.lane.b32.xlu0 %v6052_v56, %s6914_s4 }
0x12d3   :  { %1737 = vrot.lane.b32.xlu0 %v6065_v8, %s6915_s7 }
0x133e   :  { %v1668_v25 = vpop.xlane.xlu0 %1667 }
0x133f   :  { %5331 = vrcp.f32 %v1668_v25 }
0x1342   :  { %v1671_v26 = vpop.xlane.xlu0 %1670 }
0x1343   :  { %5333 = vrcp.f32 %v1671_v26 }
0x1346   :  { %v1680_v27 = vpop.permute.xlu0 %1679 }
0x1347   :  { %4896 = vmatpush3.bf16.msra.mxu1 %v1680_v27 }
0x1348   :  { %4897 = vmatprep.subr.bf16.mxu1 %v5466_v32 }
0x134a   :  { %v1738_v49 = vpop.permute.xlu0 %1737 }
0x134b   :  { %4898 = vmatpush3.bf16.msra.mxu1 %v1678_v29 }
0x134c   :  { %4903 = vmatprep.subr.bf16.mxu1 %v5466_v32  ;;  %v5332_v38 = vpop.eup %5331 }
0x134d   :  { %v1674_v3 = vmul.f32 %v5332_v38, %v5328_v10 }
0x1350   :  { %v5334_v2 = vpop.eup %5333 }
0x1351   :  { %v1675_v42 = vmul.f32 %v5334_v2, %v5330_v40 }
0x1353   :  { %v1676_v45 = vpack.c.bf16 %v1675_v42, %v1674_v3 }
0x1355   :  { %4900 = vmatmul.mubr.msk.bf16.vlgmr.msra.gmra.mxu1 %vm293_vm0, %v1676_v45 }
0x1356   :  { %4904 = vmatpush3.bf16.xpose.msra.mxu1 %v1750_v36  ;;  %4907 = vmatprep.mubr.msk.bf16.mxu1 %vm5467_vm2, %v5466_v32 }
0x1357   :  { %4905 = vmatprep.subr.bf16.mxu1 %v5466_v32 }
0x135e   :  { %4906 = vmatpush3.bf16.xpose.msra.mxu1 %v1747_v47 }
0x135f   :  { %4927 = vmatprep.subr.bf16.mxu1 %v5466_v32 }
0x1365   :  { %4908 = vmatmul.mubr.msk.bf16.vlgmr.msra.gmra.mxu1 %vm673_vm5, %v1738_v49 }
0x1366   :  { %4931 = vmatprep.mubr.msk.bf16.mxu1 %vm5467_vm2, %v5466_v32 }
0x1415   :  { %v6139_v34 = vpop.f32.mrf.mxu1 }
0x1417   :  { %v4901_v59 = vpop.f32.mrf.mxu1 }
0x1419   :  { %v6141_v60 = vpop.f32.mrf.mxu1 }
0x141b   :  { %v4902_v61 = vpop.f32.mrf.mxu1 }
0x1425   :  { %v1786_v1 = vpop.f32.mrf.mxu1 }
0x1426   :  { %v1787_v4 = vadd.f32 %v1786_v1, %v6074_v13 }
0x1427   :  { %v4909_v6 = vpop.f32.mrf.mxu1 }
0x1428   :  { %v1793_v41 = vsel %vm293_vm0, %v1787_v4, -inf }
0x1429   :  { %1794 = vmax.xlane.f32.xlu1 %v1793_v41  ;;  %v1789_v7 = vpop.f32.mrf.mxu1 }
0x142a   :  { %v1790_v9 = vadd.f32 %v1789_v7, %v6080_v16 }
0x142b   :  { %v4910_v14 = vpop.f32.mrf.mxu1 }
0x142c   :  { %v1796_v37 = vsel %vm293_vm0, %v1790_v9, -inf }
0x142d   :  { %1797 = vmax.xlane.f32.xlu0 %v1796_v37 }
0x143a   :  { %1818 = vrot.lane.b32.xlu1 %v6052_v56, %s6916_s26 }
0x143e   :  { %1880 = vrot.lane.b32.xlu1 %v6052_v56, %s6917_s30 }
0x1442   :  { %1878 = vrot.lane.b32.xlu1 %v6060_v5, %s6917_s30 }
0x1446   :  { %1876 = vrot.lane.b32.xlu1 %v6065_v8, %s6917_s30 }
0x14b2   :  { %v1795_v15 = vpop.xlane.xlu1 %1794 }
0x14b3   :  { %v1799_v19 = vsub.f32 %v1787_v4, %v1795_v15 }
0x14b5   :  { %v1801_v20 = vmul.f32 1.442695, %v1799_v19 }
0x14b6   :  { %v1819_v57 = vpop.permute.xlu1 %1818  ;;  %v1798_v21 = vpop.xlane.xlu0 %1797 }
0x14b7   :  { %5335 = vpow2.f32 %v1801_v20  ;;  %v1800_v17 = vsub.f32 %v1790_v9, %v1798_v21  ;;  %4912 = vmatpush3.bf16.msra.mxu0 %v1819_v57 }
0x14b8   :  { %4913 = vmatprep.subr.bf16.mxu0 %v5466_v32 }
0x14b9   :  { %v1803_v35 = vmul.f32 1.442695, %v1800_v17 }
0x14ba   :  { %v1881_v38 = vpop.permute.xlu1 %1880 }
0x14bb   :  { %5337 = vpow2.f32 %v1803_v35  ;;  %v1889_v3 = vsel %vm673_vm5, %v1881_v38, 0 }
0x14be   :  { %v1879_v42 = vpop.permute.xlu1 %1878 }
0x14bf   :  { %v1886_v43 = vsel %vm673_vm5, %v1879_v42, 0 }
0x14c2   :  { %v1877_v45 = vpop.permute.xlu1 %1876 }
0x14c4   :  { %v5336_v58 = vpop.eup %5335 }
0x14c5   :  { %v1805_v22 = vsel %vm293_vm0, %v5336_v58, 0.0 }
0x14c6   :  { %1806 = vadd.xlane.f32.xlu0 %v1805_v22 }
0x14c8   :  { %v5338_v10 = vpop.eup %5337 }
0x14c9   :  { %v1808_v23 = vsel %vm293_vm0, %v5338_v10, 0.0 }
0x14ca   :  { %1809 = vadd.xlane.f32.xlu0 %v1808_v23 }
0x14e0   :  { %1816 = vrot.lane.b32.xlu0 %v6060_v5, %s6916_s26 }
0x154f   :  { %v1807_v8 = vpop.xlane.xlu0 %1806 }
0x1550   :  { %5339 = vrcp.f32 %v1807_v8 }
0x1553   :  { %v1810_v40 = vpop.xlane.xlu0 %1809 }
0x1554   :  { %5341 = vrcp.f32 %v1810_v40 }
0x1557   :  { %v1817_v24 = vpop.permute.xlu0 %1816 }
0x1558   :  { %4914 = vmatpush3.bf16.msra.mxu0 %v1817_v24 }
0x1559   :  { %4919 = vmatprep.subr.bf16.mxu0 %v5466_v32 }
0x155d   :  { %v5340_v25 = vpop.eup %5339 }
0x155e   :  { %v1813_v27 = vmul.f32 %v5340_v25, %v5336_v58 }
0x1561   :  { %v5342_v26 = vpop.eup %5341 }
0x1562   :  { %v1814_v29 = vmul.f32 %v5342_v26, %v5338_v10  ;;  %v5237_v26 = vld [vmem:[%s6839_s13 + $0x8] sm:$0xff]  }
0x1564   :  { %v1815_v2 = vpack.c.bf16 %v1814_v29, %v1813_v27  ;;  %v5238_v27 = vld [vmem:[%s6839_s13] sm:$0xff]  }
0x1566   :  { %4916 = vmatmul.mubr.msk.bf16.vlgmr.msra.gmra.mxu0 %vm293_vm0, %v1815_v2 }
0x1567   :  { %4920 = vmatpush3.bf16.xpose.msra.mxu0 %v1889_v3  ;;  %4923 = vmatprep.mubr.msk.bf16.mxu0 %vm5467_vm2, %v5466_v32 }
0x1568   :  { %4921 = vmatprep.subr.bf16.mxu0 %v5466_v32 }
0x156f   :  { %4922 = vmatpush3.bf16.xpose.msra.mxu0 %v1886_v43 }
0x1570   :  { %4943 = vmatprep.subr.bf16.mxu0 %v5466_v32 }
0x1576   :  { %4924 = vmatmul.mubr.msk.bf16.vlgmr.msra.gmra.mxu0 %vm673_vm5, %v1877_v45 }
0x1577   :  { %4947 = vmatprep.mubr.msk.bf16.mxu0 %vm5467_vm2, %v5466_v32 }
0x1626   :  { %v1859_v36 = vpop.f32.mrf.mxu0 }
0x1628   :  { %v4917_v46 = vpop.f32.mrf.mxu0 }
0x162a   :  { %v1862_v47 = vpop.f32.mrf.mxu0 }
0x162c   :  { %v4918_v49 = vpop.f32.mrf.mxu0 }
0x1636   :  { %v1925_v59 = vpop.f32.mrf.mxu0 }
0x1637   :  { %v1926_v61 = vadd.f32 %v1925_v59, %v6074_v13 }
0x1638   :  { %v4925_v1 = vpop.f32.mrf.mxu0 }
0x1639   :  { %v1932_v4 = vsel %vm293_vm0, %v1926_v61, -inf }
0x163a   :  { %1933 = vmax.xlane.f32.xlu0 %v1932_v4  ;;  %v1928_v6 = vpop.f32.mrf.mxu0 }
0x163b   :  { %v1929_v41 = vadd.f32 %v1928_v6, %v6080_v16 }
0x163c   :  { %v4926_v7 = vpop.f32.mrf.mxu0 }
0x163d   :  { %v1935_v9 = vsel %vm293_vm0, %v1929_v41, -inf }
0x163e   :  { %1936 = vmax.xlane.f32.xlu1 %v1935_v9 }
0x164f   :  { %1955 = vrot.lane.b32.xlu1 %v6060_v5, %s6918_s1 }
0x1653   :  { %1729 = vrot.lane.b32.xlu1 %v6139_v34, %s6919_s25 }
0x1657   :  { %1731 = vrot.lane.b32.xlu1 %v6141_v60, %s6919_s25 }
0x165b   :  { %1870 = vrot.lane.b32.xlu1 %v1862_v47, %s6920_s27 }
0x16c3   :  { %v1934_v13 = vpop.xlane.xlu0 %1933 }
0x16c4   :  { %v1938_v14 = vsub.f32 %v1926_v61, %v1934_v13 }
0x16c6   :  { %v1940_v37 = vmul.f32 1.442695, %v1938_v14 }
0x16c7   :  { %v1937_v15 = vpop.xlane.xlu1 %1936 }
0x16c8   :  { %5343 = vpow2.f32 %v1940_v37  ;;  %v1939_v16 = vsub.f32 %v1929_v41, %v1937_v15 }
0x16ca   :  { %v1942_v19 = vmul.f32 1.442695, %v1939_v16 }
0x16cb   :  { %v1956_v20 = vpop.permute.xlu1 %1955 }
0x16cc   :  { %5345 = vpow2.f32 %v1942_v19 }
0x16cf   :  { %v1730_v57 = vpop.permute.xlu1 %1729 }
0x16d0   :  { %1735 = vst.msk [vmem:[#allocation2] sm:$0xff] %vm859_vm6, %v1730_v57  ;;  %v5240_v57 = vld [vmem:[%s6840_s16] sm:$0xff]  }
0x16d3   :  { %v1732_v5 = vpop.permute.xlu1 %1731 }
0x16d4   :  { %1736 = vst.msk [vmem:[#allocation2 + $0x8] sm:$0xff] %vm859_vm6, %v1732_v5  ;;  %v5241_v5 = vld [vmem:[%s6841_s18 + $0x38] sm:$0xff]  }
0x16d5   :  { %v5344_v34 = vpop.eup %5343 }
0x16d6   :  { %v1944_v60 = vsel %vm293_vm0, %v5344_v34, 0.0 }
0x16d7   :  { %1945 = vadd.xlane.f32.xlu0 %v1944_v60  ;;  %v1871_v21 = vpop.permute.xlu1 %1870 }
0x16d8   :  { %1875 = vst.msk [vmem:[#allocation2 + $0x8] sm:$0xff] %vm1044_vm7, %v1871_v21 }
0x16d9   :  { %v5346_v17 = vpop.eup %5345 }
0x16da   :  { %v1947_v35 = vsel %vm293_vm0, %v5346_v17, 0.0 }
0x16db   :  { %1948 = vadd.xlane.f32.xlu0 %v1947_v35 }
0x16f1   :  { %1957 = vrot.lane.b32.xlu0 %v6052_v56, %s6918_s1 }
0x16f5   :  { %1868 = vrot.lane.b32.xlu0 %v1859_v36, %s6920_s27 }
0x1760   :  { %v1946_v58 = vpop.xlane.xlu0 %1945 }
0x1761   :  { %5347 = vrcp.f32 %v1946_v58 }
0x1764   :  { %v1949_v22 = vpop.xlane.xlu0 %1948 }
0x1765   :  { %5349 = vrcp.f32 %v1949_v22  ;;  %v6238_v22 = vsub.s32 2, %v5739_v63 }
0x1768   :  { %v1958_v10 = vpop.permute.xlu0 %1957 }
0x1769   :  { %4928 = vmatpush3.bf16.msra.mxu1 %v1958_v10 }
0x176a   :  { %4929 = vmatprep.subr.bf16.mxu1 %v5466_v32 }
0x176c   :  { %v1869_v23 = vpop.permute.xlu0 %1868 }
0x176d   :  { %1874 = vst.msk [vmem:[#allocation2] sm:$0xff] %vm1044_vm7, %v1869_v23  ;;  %4930 = vmatpush3.bf16.msra.mxu1 %v1956_v20  ;;  %v5239_v20 = vld [vmem:[%s6840_s16 + $0x8] sm:$0xff]  }
0x176e   :  { %4935 = vmatprep.subr.bf16.mxu1 %v5466_v32  ;;  %v5348_v8 = vpop.eup %5347  ;;  %4944 = vmatpush3.bf16.msra.mxu0 %v5239_v20 }
0x176f   :  { %v1952_v24 = vmul.f32 %v5348_v8, %v5344_v34  ;;  %4945 = vmatprep.subr.bf16.mxu0 %v5466_v32  ;;  %v5453_v8 = vld [vmem:[%s6912_s9] sm:$0x7] }
0x1772   :  { %v5350_v40 = vpop.eup %5349  ;;  %4946 = vmatpush3.bf16.msra.mxu0 %v5240_v57 }
0x1773   :  { %v1953_v56 = vmul.f32 %v5350_v40, %v5346_v17  ;;  %4971 = vmatprep.subr.bf16.mxu0 %v5466_v32  ;;  %v2109_v40 = vrot.slane %v5453_v8, %v6238_v22 }
0x1775   :  { %v1954_v25 = vpack.c.bf16 %v1953_v56, %v1952_v24 }
0x1777   :  { %4932 = vmatmul.mubr.msk.bf16.vlgmr.msra.gmra.mxu1 %vm293_vm0, %v1954_v25 }
0x1778   :  { %4939 = vmatprep.mubr.msk.bf16.mxu1 %vm5467_vm2, %v5466_v32  ;;  %4936 = vmatpush3.bf16.msra.mxu1 %v5237_v26  ;;  %v5454_v26 = vld [vmem:[%s6913_s8] sm:$0x7] }
0x1779   :  { %4937 = vmatprep.subr.bf16.mxu1 %v5466_v32 }
0x177c   :  { %4938 = vmatpush3.bf16.msra.mxu1 %v5238_v27  ;;  %v2115_v27 = vrot.slane %v5454_v26, %v6238_v22 }
0x177d   :  { %4951 = vmatprep.subr.bf16.mxu1 %v5466_v32 }
0x1837   :  { %v1998_v29 = vpop.f32.mrf.mxu1 }
0x1838   :  { %2007 = vrot.lane.b32.xlu0 %v1998_v29, %s6921_s2 }
0x1839   :  { %v4933_v38 = vpop.f32.mrf.mxu1 }
0x183b   :  { %v2001_v2 = vpop.f32.mrf.mxu1 }
0x183c   :  { %2009 = vrot.lane.b32.xlu1 %v2001_v2, %s6921_s2 }
0x183d   :  { %v4934_v3 = vpop.f32.mrf.mxu1 }
0x183e   :  { %v5242_v3 = vld [vmem:[%s6841_s18 + $0x30] sm:$0xff]  }
0x18aa   :  { %v2008_v42 = vpop.permute.xlu0 %2007 }
0x18ab   :  { %2013 = vst.msk [vmem:[#allocation2] sm:$0xff] %vm1229_vm8, %v2008_v42  ;;  %v5243_v42 = vld [vmem:[%s6841_s18 + $0x28] sm:$0xff]  }
0x18ae   :  { %v2010_v43 = vpop.permute.xlu1 %2009 }
0x18af   :  { %2014 = vst.msk [vmem:[#allocation2 + $0x8] sm:$0xff] %vm1229_vm8, %v2010_v43  ;;  %v5244_v43 = vld [vmem:[%s6841_s18 + $0x20] sm:$0xff]  }
0x18b2   :  { %v2015_v45 = vld [vmem:[#allocation2] sm:$0xff] }
0x18b6   :  { %v2016_v36 = vld [vmem:[#allocation2 + $0x8] sm:$0xff] }
0x18b7   :  { %v2017_v46 = vpack.c.bf16 %v2016_v36, %v2015_v45  ;;  %v5245_v45 = vld [vmem:[%s6841_s18 + $0x18] sm:$0xff]   ;;  %v5246_v36 = vld [vmem:[%s6841_s18 + $0x10] sm:$0xff]  }
0x18b9   :  { %4940 = vmatmul.mubr.msk.bf16.vlgmr.msra.gmra.mxu1 %vm293_vm0, %v2017_v46  ;;  %v5247_v46 = vld [vmem:[%s6841_s18 + $0x8] sm:$0xff]  }
0x18ba   :  { %4967 = vmatprep.mubr.msk.bf16.mxu1 %vm5467_vm2, %v5466_v32  ;;  %4952 = vmatpush3.bf16.msra.mxu1 %v5241_v5 }
0x18bb   :  { %4953 = vmatprep.subr.bf16.mxu1 %v5466_v32 }
0x18be   :  { %4954 = vmatpush3.bf16.msra.mxu1 %v5242_v3  ;;  %v5249_v3 = vld [vmem:[%s6908_s3 + $0x18] sm:$0xff]  }
0x18bf   :  { %4955 = vmatprep.subr.bf16.mxu1 %v5466_v32 }
0x18c2   :  { %4956 = vmatpush3.bf16.msra.mxu1 %v5243_v42  ;;  %v5250_v42 = vld [vmem:[%s6908_s3 + $0x10] sm:$0xff]   ;;  %s6926_s3 = smov 124  }
0x18c3   :  { %4957 = vmatprep.subr.bf16.mxu1 %v5466_v32 }
0x18c6   :  { %4958 = vmatpush3.bf16.msra.mxu1 %v5244_v43 }
0x18c7   :  { %4959 = vmatprep.subr.bf16.mxu1 %v5466_v32 }
0x18ca   :  { %4960 = vmatpush3.bf16.msra.mxu1 %v5245_v45 }
0x18cb   :  { %4961 = vmatprep.subr.bf16.mxu1 %v5466_v32 }
0x18ce   :  { %4962 = vmatpush3.bf16.msra.mxu1 %v5246_v36 }
0x18cf   :  { %4963 = vmatprep.subr.bf16.mxu1 %v5466_v32 }
0x18d2   :  { %4964 = vmatpush3.bf16.msra.mxu1 %v5247_v46 }
0x18d3   :  { %4965 = vmatprep.subr.bf16.mxu1 %v5466_v32 }
0x1979   :  { %v2071_v47 = vpop.f32.mrf.mxu1 }
0x197a   :  { %v6212_v49 = vadd.f32 %v2071_v47, %v6022_v39  ;;  %v5248_v47 = vld [vmem:[%s6841_s18] sm:$0xff]  }
0x197b   :  { %v4941_v59 = vpop.f32.mrf.mxu1  ;;  %4966 = vmatpush3.bf16.msra.mxu1 %v5248_v47 }
0x197c   :  { %v2080_v61 = vsel %vm293_vm0, %v6212_v49, 0.0  ;;  %4997 = vmatprep.subr.bf16.mxu1 %v5466_v32  ;;  %v4500_v59 = vld [vmem:[%s6842_s17] ss:$0 sm:$0xff] }
0x197d   :  { %2081 = vadd.xlane.f32.xlu0 %v2080_v61  ;;  %v2074_v1 = vpop.f32.mrf.mxu1 }
0x197e   :  { %v6217_v4 = vadd.f32 %v2074_v1, %v6029_v11 }
0x197f   :  { %v4942_v6 = vpop.f32.mrf.mxu1 }
0x1980   :  { %v2083_v41 = vsel %vm293_vm0, %v6217_v4, 0.0 }
0x1981   :  { %2084 = vadd.xlane.f32.xlu1 %v2083_v41 }
0x1a06   :  { %v2082_v7 = vpop.xlane.xlu0 %2081 }
0x1a07   :  { %v2086_v9 = vmul.f32 0.03125, %v2082_v7 }
0x1a09   :  { %v2088_v13 = vsub.f32 %v6212_v49, %v2086_v9 }
0x1a0a   :  { %v2085_v39 = vpop.xlane.xlu1 %2084 }
0x1a0b   :  { %v2087_v14 = vmul.f32 0.03125, %v2085_v39  ;;  %v2090_v37 = vmul.f32 %v2088_v13, %v2088_v13 }
0x1a0d   :  { %v2089_v15 = vsub.f32 %v6217_v4, %v2087_v14  ;;  %v2092_v16 = vsel %vm293_vm0, %v2090_v37, 0.0 }
0x1a0e   :  { %2093 = vadd.xlane.f32.xlu0 %v2092_v16 }
0x1a0f   :  { %v2091_v19 = vmul.f32 %v2089_v15, %v2089_v15 }
0x1a11   :  { %v2095_v11 = vsel %vm293_vm0, %v2091_v19, 0.0 }
0x1a12   :  { %2096 = vadd.xlane.f32.xlu0 %v2095_v11 }
0x1a97   :  { %v2094_v34 = vpop.xlane.xlu0 %2093 }
0x1a98   :  { %v2098_v60 = vmul.f32 0.03125, %v2094_v34 }
0x1a9a   :  { %v2100_v21 = vadd.f32 1e-05, %v2098_v60  ;;  %v4512_v60 = vld [vmem:[%s6843_s19] ss:$0 sm:$0xff] }
0x1a9b   :  { %v2097_v17 = vpop.xlane.xlu0 %2096 }
0x1a9c   :  { %5351 = vrsqrt.f32 %v2100_v21  ;;  %v2099_v35 = vmul.f32 0.03125, %v2097_v17 }
0x1a9e   :  { %v2101_v58 = vadd.f32 1e-05, %v2099_v35 }
0x1aa0   :  { %5353 = vrsqrt.f32 %v2101_v58 }
0x1aa9   :  { %v5352_v10 = vpop.eup %5351 }
0x1aaa   :  { %v2104_v23 = vmul.f32 %v5352_v10, %v2088_v13 }
0x1aac   :  { %v2110_v25 = vmul.f32 %v2109_v40, %v2104_v23 }
0x1aad   :  { %v5354_v24 = vpop.eup %5353 }
0x1aae   :  { %v2105_v56 = vmul.f32 %v5354_v24, %v2089_v15  ;;  %v2116_v63 = vadd.f32 %v2115_v27, %v2110_v25 }
0x1ab0   :  { %v2111_v29 = vmul.f32 %v2109_v40, %v2105_v56 }
0x1ab2   :  { %v2117_v38 = vadd.f32 %v2115_v27, %v2111_v29 }
0x1ab4   :  { %v2118_v2 = vpack.c.bf16 %v2117_v38, %v2116_v63 }
0x1ab6   :  { %4948 = vmatmul.mubr.msk.bf16.vlgmr.msra.gmra.mxu0 %vm293_vm0, %v2118_v2 }
0x1ab7   :  { %4975 = vmatprep.mubr.msk.bf16.mxu0 %vm5467_vm2, %v5466_v32  ;;  %4972 = vmatpush3.bf16.msra.mxu0 %v5249_v3 }
0x1ab8   :  { %4973 = vmatprep.subr.bf16.mxu0 %v5466_v32 }
0x1abb   :  { %4974 = vmatpush3.bf16.msra.mxu0 %v5250_v42 }
0x1abc   :  { %4979 = vmatprep.subr.bf16.mxu0 %v5466_v32 }
0x1b76   :  { %v2179_v61 = vpop.f32.mrf.mxu0 }
0x1b77   :  { %v2180_v1 = vadd.f32 %v4500_v59, %v2179_v61  ;;  %v6312_v61 = vld [vmem:[%s6912_s9 + $0x4] sm:$0x7] }
0x1b78   :  { %v4949_v6 = vpop.f32.mrf.mxu0 }
0x1b79   :  { %v2188_v41 = vmul.f32 0.70710677, %v2180_v1  ;;  %v2186_v16 = vmul.f32 0.5, %v2180_v1 }
0x1b7a   :  { %v2182_v7 = vpop.f32.mrf.mxu0 }
0x1b7b   :  { %5355 = verf.f32 %v2188_v41  ;;  %v2183_v9 = vadd.f32 %v4500_v59, %v2182_v7  ;;  %v2346_v41 = vrot.slane %v6312_v61, %v5742_v0  ;;  %v6319_v7 = vld [vmem:[%s6913_s8 + $0x4] sm:$0x7] }
0x1b7c   :  { %v4950_v13 = vpop.f32.mrf.mxu0 }
0x1b7d   :  { %v2189_v39 = vmul.f32 0.70710677, %v2183_v9  ;;  %v2187_v19 = vmul.f32 0.5, %v2183_v9 }
0x1b7f   :  { %5357 = verf.f32 %v2189_v39 }
0x1b88   :  { %v5356_v14 = vpop.eup %5355 }
0x1b89   :  { %v2192_v37 = vadd.f32 1.0, %v5356_v14  ;;  %v2352_v14 = vrot.slane %v6319_v7, %v5742_v0 }
0x1b8b   :  { %v2194_v20 = vmul.f32 %v2192_v37, %v2186_v16 }
0x1b8c   :  { %v5358_v15 = vpop.eup %5357 }
0x1b8d   :  { %v2193_v11 = vadd.f32 1.0, %v5358_v15 }
0x1b8f   :  { %v2195_v57 = vmul.f32 %v2193_v11, %v2187_v19 }
0x1b91   :  { %v2196_v5 = vpack.c.bf16 %v2195_v57, %v2194_v20  ;;  %v5455_v57 = vld [vmem:[%s6909_s29] sm:$0xff] }
0x1b93   :  { %4968 = vmatmul.mubr.bf16.vlgmr.msra.gmra.mxu1 %v2196_v5 }
0x1b94   :  { %4999 = vmatprep.mubr.msk.bf16.mxu1 %vm5467_vm2, %v5466_v32 }
0x1c53   :  { %v2295_v34 = vpop.f32.mrf.mxu1 }
0x1c54   :  { %v2302_v21 = vadd.f32 %v2295_v34, %v6212_v49 }
0x1c55   :  { %v4969_v17 = vpop.f32.mrf.mxu1 }
0x1c56   :  { %v6288_v35 = vadd.f32 %v4512_v60, %v2302_v21 }
0x1c57   :  { %v2298_v58 = vpop.f32.mrf.mxu1 }
0x1c58   :  { %v2303_v10 = vadd.f32 %v2298_v58, %v6217_v4  ;;  %v2317_v23 = vsel %vm293_vm0, %v6288_v35, 0.0  ;;  %v5456_v58 = vld [vmem:[%s6909_s29 + $0x8] sm:$0xff]  ;;  %s6922_s29 = smov 96  }
0x1c59   :  { %2318 = vadd.xlane.f32.xlu0 %v2317_v23  ;;  %v4970_v8 = vpop.f32.mrf.mxu1 }
0x1c5a   :  { %v6293_v40 = vadd.f32 %v4512_v60, %v2303_v10 }
0x1c5c   :  { %v2320_v24 = vsel %vm293_vm0, %v6293_v40, 0.0 }
0x1c5d   :  { %2321 = vadd.xlane.f32.xlu1 %v2320_v24 }
0x1ce2   :  { %v2319_v56 = vpop.xlane.xlu0 %2318 }
0x1ce3   :  { %v2323_v25 = vmul.f32 0.03125, %v2319_v56 }
0x1ce5   :  { %v2325_v49 = vsub.f32 %v6288_v35, %v2323_v25 }
0x1ce6   :  { %v2322_v26 = vpop.xlane.xlu1 %2321 }
0x1ce7   :  { %v2324_v27 = vmul.f32 0.03125, %v2322_v26  ;;  %v2327_v29 = vmul.f32 %v2325_v49, %v2325_v49 }
0x1ce9   :  { %v2326_v4 = vsub.f32 %v6293_v40, %v2324_v27  ;;  %v2329_v63 = vsel %vm293_vm0, %v2327_v29, 0.0 }
0x1cea   :  { %2330 = vadd.xlane.f32.xlu0 %v2329_v63 }
0x1ceb   :  { %v2328_v38 = vmul.f32 %v2326_v4, %v2326_v4 }
0x1ced   :  { %v2332_v2 = vsel %vm293_vm0, %v2328_v38, 0.0 }
0x1cee   :  { %2333 = vadd.xlane.f32.xlu1 %v2332_v2 }
0x1d73   :  { %v2331_v43 = vpop.xlane.xlu0 %2330 }
0x1d74   :  { %v2335_v45 = vmul.f32 0.03125, %v2331_v43 }
0x1d76   :  { %v2337_v36 = vadd.f32 1e-05, %v2335_v45 }
0x1d77   :  { %v2334_v46 = vpop.xlane.xlu1 %2333 }
0x1d78   :  { %5359 = vrsqrt.f32 %v2337_v36  ;;  %v2336_v47 = vmul.f32 0.03125, %v2334_v46 }
0x1d7a   :  { %v2338_v59 = vadd.f32 1e-05, %v2336_v47 }
0x1d7c   :  { %5361 = vrsqrt.f32 %v2338_v59 }
0x1d85   :  { %v5360_v1 = vpop.eup %5359 }
0x1d86   :  { %v2341_v6 = vmul.f32 %v5360_v1, %v2325_v49  ;;  %v5458_v1 = vld [vmem:[%s6910_s15 + $0x8] sm:$0xff] }
0x1d88   :  { %v2347_v39 = vmul.f32 %v2346_v41, %v2341_v6 }
0x1d89   :  { %v5362_v9 = vpop.eup %5361 }
0x1d8a   :  { %v2342_v13 = vmul.f32 %v5362_v9, %v2326_v4  ;;  %v2353_v15 = vadd.f32 %v2352_v14, %v2347_v39 }
0x1d8c   :  { %v2348_v37 = vmul.f32 %v2346_v41, %v2342_v13 }
0x1d8e   :  { %v2354_v16 = vadd.f32 %v2352_v14, %v2348_v37 }
0x1d90   :  { %v2355_v19 = vpack.c.bf16 %v2354_v16, %v2353_v15 }
0x1d92   :  { %4976 = vmatmul.mubr.msk.bf16.vlgmr.msra.gmra.mxu0 %vm293_vm0, %v2355_v19 }
0x1d93   :  { %4981 = vmatprep.mubr.msk.bf16.mxu0 %vm5467_vm2, %v5466_v32 }
0x1e52   :  { %v2410_v11 = vpop.f32.mrf.mxu0 }
0x1e53   :  { %v2465_v20 = vmul.f32 %v2410_v11, %v5767_v33  ;;  %v2435_v5 = vmul.f32 %v5455_v57, %v2410_v11  ;;  %v2450_v60 = vmul.f32 %v2410_v11, %v5780_v44  ;;  %v2463_v8 = vmul.f32 %v2410_v11, %v5799_v50  ;;  %v6388_v57 = vld [vmem:[%s6834_s5] sm:$0xff] }
0x1e54   :  { %v4977_v34 = vpop.f32.mrf.mxu0  ;;  %v2433_v26 = vmul.f32 %v2410_v11, %v5803_v52  ;;  %v2448_v50 = vmul.f32 %v2410_v11, %v5807_v54  ;;  %v2420_v43 = vmul.f32 %v2410_v11, %v5829_v12 }
0x1e55   :  { %2469 = vrot.lane.b32.xlu0 %v2465_v20, %s6920_s27  ;;  %2439 = vrot.lane.b32.xlu1 %v2435_v5, %s6920_s27 }
0x1e56   :  { %v2413_v0 = vpop.f32.mrf.mxu0 }
0x1e57   :  { %v2466_v21 = vmul.f32 %v2413_v0, %v5765_v31  ;;  %v6336_v33 = vpack.c.bf16 %v2413_v0, %v2410_v11  ;;  %v2436_v10 = vmul.f32 %v5456_v58, %v2413_v0  ;;  %v2451_v23 = vmul.f32 %v2413_v0, %v5790_v48 }
0x1e58   :  { %v4978_v17 = vpop.f32.mrf.mxu0  ;;  %v2464_v24 = vmul.f32 %v2413_v0, %v5801_v51  ;;  %v2434_v29 = vmul.f32 %v2413_v0, %v5805_v53  ;;  %v2449_v51 = vmul.f32 %v2413_v0, %v5809_v55  ;;  %v2421_v54 = vmul.f32 %v2413_v0, %v5837_v18  ;;  %v5457_v18 = vld [vmem:[%s6910_s15] sm:$0xff]  ;;  %s6929_s15 = smov 120  }
0x1e59   :  { %2454 = vrot.lane.b32.xlu0 %v2450_v60, %s6915_s7  ;;  %2471 = vrot.lane.b32.xlu1 %v2466_v21, %s6920_s27  ;;  %v2418_v59 = vmul.f32 %v5457_v18, %v2410_v11  ;;  %v2419_v6 = vmul.f32 %v5458_v1, %v2413_v0  ;;  %v6395_v17 = vld [vmem:[%s6834_s5 + $0x8] sm:$0xff]  ;;  %s6927_s5 = smov 76  }
0x1e5d   :  { %2441 = vrot.lane.b32.xlu1 %v2436_v10, %s6920_s27 }
0x1e61   :  { %2456 = vrot.lane.b32.xlu1 %v2451_v23, %s6915_s7 }
0x1ec7   :  { %v2440_v44 = vpop.permute.xlu1 %2439  ;;  %v2470_v31 = vpop.permute.xlu0 %2469 }
0x1ec8   :  { %v2475_v25 = vadd.f32 %v2470_v31, %v2463_v8  ;;  %v2445_v63 = vadd.f32 %v2440_v44, %v2433_v26 }
0x1ecb   :  { %v2472_v56 = vpop.permute.xlu1 %2471  ;;  %v2455_v38 = vpop.permute.xlu0 %2454 }
0x1ecc   :  { %v2476_v49 = vadd.f32 %v2472_v56, %v2464_v24  ;;  %v2460_v42 = vsub.f32 %v2448_v50, %v2455_v38 }
0x1ece   :  { %v6347_v27 = vpack.c.bf16 %v2476_v49, %v2475_v25 }
0x1ecf   :  { %v2442_v4 = vpop.permute.xlu1 %2441 }
0x1ed0   :  { %v2446_v48 = vadd.f32 %v2442_v4, %v2434_v29  ;;  %2482 = vrot.lane.b32.xlu0 %v6347_v27, %s6916_s26 }
0x1ed2   :  { %v6353_v2 = vpack.c.bf16 %v2446_v48, %v2445_v63 }
0x1ed3   :  { %v2457_v3 = vpop.permute.xlu1 %2456 }
0x1ed4   :  { %v2461_v52 = vsub.f32 %v2449_v51, %v2457_v3  ;;  %2479 = vrot.lane.b32.xlu1 %v6353_v2, %s6915_s7 }
0x1ed6   :  { %v6358_v53 = vpack.c.bf16 %v2461_v52, %v2460_v42 }
0x1ed8   :  { %2532 = vrot.lane.b32.xlu0 %v6358_v53, %s6922_s29  ;;  %2424 = vrot.lane.b32.xlu1 %v2420_v43, %s6915_s7 }
0x1edc   :  { %2426 = vrot.lane.b32.xlu0 %v2421_v54, %s6915_s7 }
0x1f42   :  { %v2483_v55 = vpop.permute.xlu0 %2482 }
0x1f43   :  { %v2488_v45 = vsel %vm501_vm3, %v2483_v55, 0 }
0x1f44   :  { %4980 = vmatpush3.bf16.xpose.msra.mxu0 %v2488_v45 }
0x1f45   :  { %4985 = vmatprep.subr.bf16.mxu0 %v5466_v32 }
0x1f46   :  { %v2480_v36 = vpop.permute.xlu1 %2479 }
0x1f4a   :  { %v2533_v46 = vpop.permute.xlu0 %2532  ;;  %v2425_v12 = vpop.permute.xlu1 %2424 }
0x1f4b   :  { %v2538_v47 = vsel %vm501_vm3, %v2533_v46, 0  ;;  %4982 = vmatmul.mubr.msk.bf16.vlgmr.msra.gmra.mxu0 %vm501_vm3, %v2480_v36  ;;  %v2430_v9 = vsub.f32 %v2418_v59, %v2425_v12 }
0x1f4c   :  { %4986 = vmatpush3.bf16.xpose.msra.mxu0 %v2538_v47  ;;  %4987 = vmatprep.mubr.msk.bf16.mxu0 %vm5467_vm2, %v5466_v32 }
0x1f4d   :  { %4991 = vmatprep.subr.bf16.mxu0 %v5466_v32 }
0x1f4e   :  { %v2427_v41 = vpop.permute.xlu0 %2426 }
0x1f4f   :  { %v2431_v13 = vsub.f32 %v2419_v6, %v2427_v41 }
0x1f51   :  { %v6379_v39 = vpack.c.bf16 %v2431_v13, %v2430_v9 }
0x1f53   :  { %4988 = vmatmul.mubr.msk.bf16.vlgmr.msra.gmra.mxu0 %vm501_vm3, %v6379_v39 }
0x1f54   :  { %4993 = vmatprep.mubr.msk.bf16.mxu0 %vm5467_vm2, %v5466_v32 }
0x200b   :  { %v2524_v14 = vpop.f32.mrf.mxu0 }
0x200d   :  { %v4983_v37 = vpop.f32.mrf.mxu0 }
0x200f   :  { %v2527_v15 = vpop.f32.mrf.mxu0 }
0x2011   :  { %v4984_v16 = vpop.f32.mrf.mxu0 }
0x2013   :  { %v2574_v19 = vpop.f32.mrf.mxu0 }
0x2014   :  { %v2575_v11 = vadd.f32 %v2574_v19, %v2524_v14 }
0x2015   :  { %v4989_v20 = vpop.f32.mrf.mxu0 }
0x2016   :  { %v2581_v5 = vadd.f32 %v6388_v57, %v2575_v11 }
0x2017   :  { %v2577_v34 = vpop.f32.mrf.mxu0 }
0x2018   :  { %v2578_v0 = vadd.f32 %v2577_v34, %v2527_v15  ;;  %v2583_v60 = vsel %vm601_vm4, %v2581_v5, -inf }
0x2019   :  { %2584 = vmax.xlane.f32.xlu1 %v2583_v60  ;;  %v4990_v21 = vpop.f32.mrf.mxu0 }
0x201a   :  { %v2582_v58 = vadd.f32 %v6395_v17, %v2578_v0 }
0x201c   :  { %v2586_v10 = vsel %vm601_vm4, %v2582_v58, -inf }
0x201d   :  { %2587 = vmax.xlane.f32.xlu0 %v2586_v10 }
0x202a   :  { %2607 = vrot.lane.b32.xlu1 %v6336_v33, %s6923_s14  ;;  %s6933_s14 = smov 116  }
0x202e   :  { %2710 = vrot.lane.b32.xlu1 %v6358_v53, %s6924_s28  ;;  %s6934_s28 = smov 68  }
0x2032   :  { %2656 = vrot.lane.b32.xlu1 %v6353_v2, %s6925_s24  ;;  %s6935_s24 = smov 40  }
0x2036   :  { %2708 = vrot.lane.b32.xlu1 %v6379_v39, %s6926_s3 }
0x20a2   :  { %v2585_v23 = vpop.xlane.xlu1 %2584 }
0x20a3   :  { %v2589_v44 = vsub.f32 %v2581_v5, %v2585_v23 }
0x20a5   :  { %v2591_v31 = vmul.f32 1.442695, %v2589_v44 }
0x20a6   :  { %v2608_v8 = vpop.permute.xlu1 %2607  ;;  %v2588_v24 = vpop.xlane.xlu0 %2587 }
0x20a7   :  { %5363 = vpow2.f32 %v2591_v31  ;;  %v2590_v56 = vsub.f32 %v2582_v58, %v2588_v24  ;;  %4992 = vmatpush3.bf16.msra.mxu0 %v2608_v8 }
0x20a8   :  { %5003 = vmatprep.subr.bf16.mxu0 %v5466_v32 }
0x20a9   :  { %v2593_v25 = vmul.f32 1.442695, %v2590_v56 }
0x20aa   :  { %v2711_v51 = vpop.permute.xlu1 %2710 }
0x20ab   :  { %5365 = vpow2.f32 %v2593_v25  ;;  %v2716_v45 = vsel %vm501_vm3, %v2711_v51, 0 }
0x20ae   :  { %v2657_v42 = vpop.permute.xlu1 %2656 }
0x20b2   :  { %v2709_v36 = vpop.permute.xlu1 %2708 }
0x20b4   :  { %v5364_v49 = vpop.eup %5363 }
0x20b5   :  { %v2595_v26 = vsel %vm601_vm4, %v5364_v49, 0.0 }
0x20b6   :  { %2596 = vadd.xlane.f32.xlu0 %v2595_v26 }
0x20b8   :  { %v5366_v29 = vpop.eup %5365 }
0x20b9   :  { %v2598_v4 = vsel %vm601_vm4, %v5366_v29, 0.0 }
0x20ba   :  { %2599 = vadd.xlane.f32.xlu0 %v2598_v4 }
0x20d0   :  { %2658 = vrot.lane.b32.xlu0 %v6347_v27, %s6927_s5 }
0x213f   :  { %v2597_v63 = vpop.xlane.xlu0 %2596 }
0x2140   :  { %5367 = vrcp.f32 %v2597_v63 }
0x2143   :  { %v2600_v48 = vpop.xlane.xlu0 %2599 }
0x2144   :  { %5369 = vrcp.f32 %v2600_v48 }
0x2147   :  { %v2659_v38 = vpop.permute.xlu0 %2658 }
0x2148   :  { %v2664_v50 = vsel %vm501_vm3, %v2659_v38, 0 }
0x2149   :  { %4998 = vmatpush3.bf16.xpose.msra.mxu1 %v2664_v50 }
0x214a   :  { %5009 = vmatprep.subr.bf16.mxu1 %v5466_v32 }
0x214d   :  { %v5368_v3 = vpop.eup %5367 }
0x214e   :  { %v2603_v43 = vmul.f32 %v5368_v3, %v5364_v49 }
0x2150   :  { %5000 = vmatmul.mubr.msk.bf16.vlgmr.msra.gmra.mxu1 %vm501_vm3, %v2657_v42 }
0x2151   :  { %v5370_v52 = vpop.eup %5369  ;;  %5011 = vmatprep.mubr.msk.bf16.mxu1 %vm5467_vm2, %v5466_v32 }
0x2152   :  { %v2604_v54 = vmul.f32 %v5370_v52, %v5366_v29 }
0x2154   :  { %v2605_v55 = vpack.c.bf16 %v2604_v54, %v2603_v43 }
0x2156   :  { %4994 = vmatmul.mubr.msk.bf16.vlgmr.msra.gmra.mxu0 %vm601_vm4, %v2605_v55 }
0x2157   :  { %5004 = vmatpush3.bf16.xpose.msra.mxu0 %v2716_v45  ;;  %5005 = vmatprep.mubr.msk.bf16.mxu0 %vm5467_vm2, %v5466_v32 }
0x2158   :  { %5015 = vmatprep.subr.bf16.mxu0 %v5466_v32 }
0x215e   :  { %5006 = vmatmul.mubr.msk.bf16.vlgmr.msra.gmra.mxu0 %vm501_vm3, %v2709_v36 }
0x215f   :  { %5017 = vmatprep.mubr.msk.bf16.mxu0 %vm5467_vm2, %v5466_v32 }
0x2210   :  { %v2700_v46 = vpop.f32.mrf.mxu1 }
0x2212   :  { %v5001_v47 = vpop.f32.mrf.mxu1 }
0x2214   :  { %v2703_v12 = vpop.f32.mrf.mxu1 }
0x2216   :  { %v2647_v18 = vpop.f32.mrf.mxu0  ;;  %v5002_v59 = vpop.f32.mrf.mxu1 }
0x2217   :  { %2654 = vst.msk [vmem:[#allocation2] sm:$0xff] %vm673_vm5, %v2647_v18 }
0x2218   :  { %v4995_v1 = vpop.f32.mrf.mxu0 }
0x221a   :  { %v2650_v6 = vpop.f32.mrf.mxu0 }
0x221b   :  { %2655 = vst.msk [vmem:[#allocation2 + $0x8] sm:$0xff] %vm673_vm5, %v2650_v6 }
0x221c   :  { %v4996_v41 = vpop.f32.mrf.mxu0 }
0x221e   :  { %v2752_v9 = vpop.f32.mrf.mxu0 }
0x221f   :  { %v2753_v13 = vadd.f32 %v2752_v9, %v2700_v46 }
0x2220   :  { %v5007_v14 = vpop.f32.mrf.mxu0 }
0x2221   :  { %v2759_v37 = vadd.f32 %v6388_v57, %v2753_v13 }
0x2222   :  { %v2755_v15 = vpop.f32.mrf.mxu0 }
0x2223   :  { %v2756_v16 = vadd.f32 %v2755_v15, %v2703_v12  ;;  %v2761_v19 = vsel %vm601_vm4, %v2759_v37, -inf }
0x2224   :  { %v5008_v11 = vpop.f32.mrf.mxu0  ;;  %2762 = vmax.xlane.f32.xlu0 %v2761_v19 }
0x2225   :  { %v2760_v20 = vadd.f32 %v6395_v17, %v2756_v16 }
0x2227   :  { %v2764_v5 = vsel %vm601_vm4, %v2760_v20, -inf }
0x2228   :  { %2765 = vmax.xlane.f32.xlu1 %v2764_v5 }
0x2239   :  { %2843 = vrot.lane.b32.xlu1 %v6347_v27, %s6918_s1 }
0x223d   :  { %2894 = vrot.lane.b32.xlu1 %v6358_v53, %s6914_s4 }
0x2241   :  { %2841 = vrot.lane.b32.xlu1 %v6353_v2, %s6917_s30 }
0x22ad   :  { %v2763_v34 = vpop.xlane.xlu0 %2762 }
0x22ae   :  { %v2767_v0 = vsub.f32 %v2759_v37, %v2763_v34 }
0x22b0   :  { %v2769_v60 = vmul.f32 1.442695, %v2767_v0 }
0x22b1   :  { %v2766_v21 = vpop.xlane.xlu1 %2765 }
0x22b2   :  { %5371 = vpow2.f32 %v2769_v60  ;;  %v2768_v58 = vsub.f32 %v2760_v20, %v2766_v21 }
0x22b4   :  { %v2771_v10 = vmul.f32 1.442695, %v2768_v58 }
0x22b5   :  { %v2844_v23 = vpop.permute.xlu1 %2843 }
0x22b6   :  { %5373 = vpow2.f32 %v2771_v10  ;;  %v2849_v44 = vsel %vm501_vm3, %v2844_v23, 0 }
0x22b7   :  { %5016 = vmatpush3.bf16.xpose.msra.mxu0 %v2849_v44 }
0x22b8   :  { %5027 = vmatprep.subr.bf16.mxu0 %v5466_v32 }
0x22b9   :  { %v2895_v31 = vpop.permute.xlu1 %2894 }
0x22ba   :  { %v2900_v3 = vsel %vm501_vm3, %v2895_v31, 0 }
0x22bd   :  { %v2842_v8 = vpop.permute.xlu1 %2841 }
0x22be   :  { %5018 = vmatmul.mubr.msk.bf16.vlgmr.msra.gmra.mxu0 %vm501_vm3, %v2842_v8 }
0x22bf   :  { %v5372_v24 = vpop.eup %5371  ;;  %5029 = vmatprep.mubr.msk.bf16.mxu0 %vm5467_vm2, %v5466_v32 }
0x22c0   :  { %v2773_v56 = vsel %vm601_vm4, %v5372_v24, 0.0 }
0x22c1   :  { %2774 = vadd.xlane.f32.xlu0 %v2773_v56 }
0x22c3   :  { %v5374_v25 = vpop.eup %5373 }
0x22c4   :  { %v2776_v49 = vsel %vm601_vm4, %v5374_v25, 0.0 }
0x22c5   :  { %2777 = vadd.xlane.f32.xlu0 %v2776_v49 }
0x22db   :  { %2784 = vrot.lane.b32.xlu0 %v6336_v33, %s6928_s0 }
0x22df   :  { %2892 = vrot.lane.b32.xlu0 %v6379_v39, %s6929_s15 }
0x234a   :  { %v2775_v26 = vpop.xlane.xlu0 %2774 }
0x234b   :  { %5375 = vrcp.f32 %v2775_v26 }
0x234e   :  { %v2778_v29 = vpop.xlane.xlu0 %2777 }
0x234f   :  { %5377 = vrcp.f32 %v2778_v29 }
0x2352   :  { %v2785_v4 = vpop.permute.xlu0 %2784 }
0x2353   :  { %5010 = vmatpush3.bf16.msra.mxu1 %v2785_v4 }
0x2354   :  { %5021 = vmatprep.subr.bf16.mxu1 %v5466_v32 }
0x2356   :  { %v2893_v42 = vpop.permute.xlu0 %2892 }
0x2358   :  { %v5376_v63 = vpop.eup %5375 }
0x2359   :  { %v2781_v38 = vmul.f32 %v5376_v63, %v5372_v24 }
0x235c   :  { %v5378_v48 = vpop.eup %5377 }
0x235d   :  { %v2782_v50 = vmul.f32 %v5378_v48, %v5374_v25 }
0x235f   :  { %v2783_v51 = vpack.c.bf16 %v2782_v50, %v2781_v38 }
0x2361   :  { %5012 = vmatmul.mubr.msk.bf16.vlgmr.msra.gmra.mxu1 %vm601_vm4, %v2783_v51 }
0x2362   :  { %5022 = vmatpush3.bf16.xpose.msra.mxu1 %v2900_v3  ;;  %5023 = vmatprep.mubr.msk.bf16.mxu1 %vm5467_vm2, %v5466_v32 }
0x2363   :  { %5033 = vmatprep.subr.bf16.mxu1 %v5466_v32 }
0x2369   :  { %5024 = vmatmul.mubr.msk.bf16.vlgmr.msra.gmra.mxu1 %vm501_vm3, %v2893_v42 }
0x236a   :  { %5035 = vmatprep.mubr.msk.bf16.mxu1 %vm5467_vm2, %v5466_v32 }
0x237e   :  { %v2885_v52 = vpop.f32.mrf.mxu0 }
0x2380   :  { %v5019_v43 = vpop.f32.mrf.mxu0 }
0x2382   :  { %v2888_v54 = vpop.f32.mrf.mxu0 }
0x2384   :  { %v5020_v55 = vpop.f32.mrf.mxu0 }
0x2421   :  { %v6457_v45 = vpop.f32.mrf.mxu1 }
0x2423   :  { %v5013_v36 = vpop.f32.mrf.mxu1 }
0x2425   :  { %v6459_v46 = vpop.f32.mrf.mxu1 }
0x2427   :  { %v5014_v47 = vpop.f32.mrf.mxu1 }
0x2429   :  { %v2936_v12 = vpop.f32.mrf.mxu1 }
0x242a   :  { %v2937_v18 = vadd.f32 %v2936_v12, %v2885_v52 }
0x242b   :  { %v5025_v59 = vpop.f32.mrf.mxu1 }
0x242c   :  { %v2943_v1 = vadd.f32 %v6388_v57, %v2937_v18 }
0x242d   :  { %v2939_v6 = vpop.f32.mrf.mxu1 }
0x242e   :  { %v2940_v41 = vadd.f32 %v2939_v6, %v2888_v54  ;;  %v2945_v9 = vsel %vm601_vm4, %v2943_v1, -inf }
0x242f   :  { %2946 = vmax.xlane.f32.xlu1 %v2945_v9  ;;  %v5026_v13 = vpop.f32.mrf.mxu1 }
0x2430   :  { %v2944_v14 = vadd.f32 %v6395_v17, %v2940_v41 }
0x2432   :  { %v2948_v37 = vsel %vm601_vm4, %v2944_v14, -inf }
0x2433   :  { %2949 = vmax.xlane.f32.xlu0 %v2948_v37 }
0x2440   :  { %2968 = vrot.lane.b32.xlu1 %v6336_v33, %s6930_s21 }
0x2444   :  { %3078 = vrot.lane.b32.xlu1 %v6358_v53, %s6931_s23  ;;  %s6938_s23 = sld [smem:[#allocation14_spill]] }
0x2448   :  { %3025 = vrot.lane.b32.xlu1 %v6353_v2, %s6932_s20 }
0x244c   :  { %3076 = vrot.lane.b32.xlu1 %v6379_v39, %s6933_s14 }
0x24b8   :  { %v2947_v15 = vpop.xlane.xlu1 %2946 }
0x24b9   :  { %v2951_v16 = vsub.f32 %v2943_v1, %v2947_v15 }
0x24bb   :  { %v2953_v19 = vmul.f32 1.442695, %v2951_v16 }
0x24bc   :  { %v2969_v11 = vpop.permute.xlu1 %2968  ;;  %v2950_v20 = vpop.xlane.xlu0 %2949 }
0x24bd   :  { %5379 = vpow2.f32 %v2953_v19  ;;  %v2952_v5 = vsub.f32 %v2944_v14, %v2950_v20  ;;  %5028 = vmatpush3.bf16.msra.mxu0 %v2969_v11 }
0x24be   :  { %5039 = vmatprep.subr.bf16.mxu0 %v5466_v32 }
0x24bf   :  { %v2955_v34 = vmul.f32 1.442695, %v2952_v5 }
0x24c0   :  { %v3079_v23 = vpop.permute.xlu1 %3078 }
0x24c1   :  { %5381 = vpow2.f32 %v2955_v34  ;;  %v3084_v25 = vsel %vm501_vm3, %v3079_v23, 0 }
0x24c4   :  { %v3026_v31 = vpop.permute.xlu1 %3025 }
0x24c8   :  { %v3077_v49 = vpop.permute.xlu1 %3076 }
0x24ca   :  { %v5380_v0 = vpop.eup %5379 }
0x24cb   :  { %v2957_v53 = vsel %vm601_vm4, %v5380_v0, 0.0 }
0x24cc   :  { %2958 = vadd.xlane.f32.xlu0 %v2957_v53 }
0x24ce   :  { %v5382_v2 = vpop.eup %5381 }
0x24cf   :  { %v2960_v60 = vsel %vm601_vm4, %v5382_v2, 0.0 }
0x24d0   :  { %2961 = vadd.xlane.f32.xlu0 %v2960_v60  ;;  %v5252_v60 = vld [vmem:[%s6835_s10 + $0x10] sm:$0xff]  }
0x24e6   :  { %3027 = vrot.lane.b32.xlu0 %v6347_v27, %s6934_s28 }
0x2555   :  { %v2959_v39 = vpop.xlane.xlu0 %2958 }
0x2556   :  { %5383 = vrcp.f32 %v2959_v39 }
0x2559   :  { %v2962_v21 = vpop.xlane.xlu0 %2961 }
0x255a   :  { %5385 = vrcp.f32 %v2962_v21 }
0x255d   :  { %v3028_v58 = vpop.permute.xlu0 %3027 }
0x255e   :  { %v3033_v10 = vsel %vm501_vm3, %v3028_v58, 0  ;;  %v5253_v58 = vld [vmem:[%s6836_s12 + $0x18] sm:$0xff]  }
0x255f   :  { %5034 = vmatpush3.bf16.xpose.msra.mxu1 %v3033_v10 }
0x2560   :  { %5045 = vmatprep.subr.bf16.mxu1 %v5466_v32 }
0x2563   :  { %v5384_v44 = vpop.eup %5383 }
0x2564   :  { %v2965_v27 = vmul.f32 %v5384_v44, %v5380_v0 }
0x2566   :  { %5036 = vmatmul.mubr.msk.bf16.vlgmr.msra.gmra.mxu1 %vm501_vm3, %v3026_v31 }
0x2567   :  { %v5386_v8 = vpop.eup %5385  ;;  %5047 = vmatprep.mubr.msk.bf16.mxu1 %vm5467_vm2, %v5466_v32 }
0x2568   :  { %v2966_v24 = vmul.f32 %v5386_v8, %v5382_v2 }
0x256a   :  { %v2967_v56 = vpack.c.bf16 %v2966_v24, %v2965_v27 }
0x256c   :  { %5030 = vmatmul.mubr.msk.bf16.vlgmr.msra.gmra.mxu0 %vm601_vm4, %v2967_v56  ;;  %v5254_v56 = vld [vmem:[%s6836_s12 + $0x10] sm:$0xff]  }
0x256d   :  { %5040 = vmatpush3.bf16.xpose.msra.mxu0 %v3084_v25  ;;  %5041 = vmatprep.mubr.msk.bf16.mxu0 %vm5467_vm2, %v5466_v32 }
0x256e   :  { %5051 = vmatprep.subr.bf16.mxu0 %v5466_v32 }
0x2574   :  { %5042 = vmatmul.mubr.msk.bf16.vlgmr.msra.gmra.mxu0 %vm501_vm3, %v3077_v49 }
0x2575   :  { %5055 = vmatprep.mubr.msk.bf16.mxu0 %vm5467_vm2, %v5466_v32 }
0x2626   :  { %v3069_v26 = vpop.f32.mrf.mxu1 }
0x2628   :  { %v5037_v29 = vpop.f32.mrf.mxu1 }
0x262a   :  { %v3072_v4 = vpop.f32.mrf.mxu1 }
0x262c   :  { %v3008_v63 = vpop.f32.mrf.mxu0  ;;  %v5038_v48 = vpop.f32.mrf.mxu1 }
0x262e   :  { %v5031_v38 = vpop.f32.mrf.mxu0 }
0x2630   :  { %v3011_v50 = vpop.f32.mrf.mxu0 }
0x2632   :  { %v5032_v51 = vpop.f32.mrf.mxu0 }
0x2634   :  { %v3120_v3 = vpop.f32.mrf.mxu0 }
0x2635   :  { %v3121_v42 = vadd.f32 %v3120_v3, %v3069_v26 }
0x2636   :  { %v5043_v52 = vpop.f32.mrf.mxu0 }
0x2637   :  { %v3127_v43 = vadd.f32 %v6388_v57, %v3121_v42 }
0x2638   :  { %v3123_v54 = vpop.f32.mrf.mxu0 }
0x2639   :  { %v3124_v55 = vadd.f32 %v3123_v54, %v3072_v4  ;;  %v3129_v36 = vsel %vm601_vm4, %v3127_v43, -inf  ;;  %v5255_v54 = vld [vmem:[%s6837_s11 + $0x18] sm:$0xff]  }
0x263a   :  { %v5044_v47 = vpop.f32.mrf.mxu0  ;;  %3130 = vmax.xlane.f32.xlu0 %v3129_v36 }
0x263b   :  { %v3128_v12 = vadd.f32 %v6395_v17, %v3124_v55  ;;  %v5256_v55 = vld [vmem:[%s6837_s11 + $0x10] sm:$0xff]   ;;  %s6940_s11 = sld [smem:[#allocation16_spill]] }
0x263d   :  { %v3132_v18 = vsel %vm601_vm4, %v3128_v12, -inf }
0x263e   :  { %3133 = vmax.xlane.f32.xlu1 %v3132_v18 }
0x264f   :  { %2833 = vrot.lane.b32.xlu1 %v6457_v45, %s6919_s25 }
0x2653   :  { %2835 = vrot.lane.b32.xlu1 %v6459_v46, %s6919_s25 }
0x2657   :  { %3017 = vrot.lane.b32.xlu1 %v3008_v63, %s6920_s27 }
0x26c3   :  { %v3131_v57 = vpop.xlane.xlu0 %3130 }
0x26c4   :  { %v3135_v59 = vsub.f32 %v3127_v43, %v3131_v57 }
0x26c6   :  { %v3137_v1 = vmul.f32 1.442695, %v3135_v59 }
0x26c7   :  { %v3134_v6 = vpop.xlane.xlu1 %3133 }
0x26c8   :  { %5387 = vpow2.f32 %v3137_v1  ;;  %v3136_v41 = vsub.f32 %v3128_v12, %v3134_v6 }
0x26ca   :  { %v3139_v9 = vmul.f32 1.442695, %v3136_v41 }
0x26cb   :  { %v2834_v13 = vpop.permute.xlu1 %2833 }
0x26cc   :  { %5389 = vpow2.f32 %v3139_v9  ;;  %2839 = vst.msk [vmem:[#allocation2] sm:$0xff] %vm859_vm6, %v2834_v13  ;;  %v3304_v9 = vrot.slane %v6312_v61, %v6046_v28 }
0x26cf   :  { %v2836_v17 = vpop.permute.xlu1 %2835 }
0x26d0   :  { %2840 = vst.msk [vmem:[#allocation2 + $0x8] sm:$0xff] %vm859_vm6, %v2836_v17 }
0x26d3   :  { %v3018_v45 = vpop.permute.xlu1 %3017 }
0x26d4   :  { %3023 = vst.msk [vmem:[#allocation2] sm:$0xff] %vm1044_vm7, %v3018_v45 }
0x26d5   :  { %v5388_v46 = vpop.eup %5387 }
0x26d6   :  { %v3141_v14 = vsel %vm601_vm4, %v5388_v46, 0.0 }
0x26d7   :  { %3142 = vadd.xlane.f32.xlu0 %v3141_v14  ;;  %v3310_v14 = vrot.slane %v6319_v7, %v6046_v28 }
0x26d9   :  { %v5390_v37 = vpop.eup %5389 }
0x26da   :  { %v3144_v15 = vsel %vm601_vm4, %v5390_v37, 0.0 }
0x26db   :  { %3145 = vadd.xlane.f32.xlu0 %v3144_v15 }
0x26f1   :  { %3152 = vrot.lane.b32.xlu0 %v6336_v33, %s6935_s24  ;;  %v5251_v33 = vld [vmem:[%s6835_s10 + $0x18] sm:$0xff]   ;;  %s6939_s10 = sld [smem:[#allocation15_spill]] }
0x26f2   :  { %5052 = vmatpush3.bf16.msra.mxu0 %v5251_v33 }
0x26f3   :  { %5053 = vmatprep.subr.bf16.mxu0 %v5466_v32 }
0x26f5   :  { %3019 = vrot.lane.b32.xlu0 %v3011_v50, %s6920_s27 }
0x26f6   :  { %5054 = vmatpush3.bf16.msra.mxu0 %v5252_v60 }
0x26f7   :  { %5067 = vmatprep.subr.bf16.mxu0 %v5253_v58 }
0x2760   :  { %v3143_v16 = vpop.xlane.xlu0 %3142 }
0x2761   :  { %5391 = vrcp.f32 %v3143_v16 }
0x2764   :  { %v3146_v19 = vpop.xlane.xlu0 %3145 }
0x2765   :  { %5393 = vrcp.f32 %v3146_v19 }
0x2768   :  { %v3153_v11 = vpop.permute.xlu0 %3152 }
0x2769   :  { %5046 = vmatpush3.bf16.msra.mxu1 %v3153_v11 }
0x276a   :  { %5059 = vmatprep.subr.bf16.mxu1 %v5466_v32 }
0x276c   :  { %v3020_v20 = vpop.permute.xlu0 %3019 }
0x276d   :  { %3024 = vst.msk [vmem:[#allocation2 + $0x8] sm:$0xff] %vm1044_vm7, %v3020_v20 }
0x276e   :  { %v5392_v5 = vpop.eup %5391 }
0x276f   :  { %v3149_v0 = vmul.f32 %v5392_v5, %v5388_v46 }
0x2772   :  { %v5394_v34 = vpop.eup %5393 }
0x2773   :  { %v3150_v53 = vmul.f32 %v5394_v34, %v5390_v37 }
0x2775   :  { %v3151_v2 = vpack.c.bf16 %v3150_v53, %v3149_v0 }
0x2777   :  { %5048 = vmatmul.mubr.msk.bf16.vlgmr.msra.gmra.mxu1 %vm601_vm4, %v3151_v2 }
0x2778   :  { %5063 = vmatprep.mubr.msk.bf16.mxu1 %vm5467_vm2, %v5466_v32  ;;  %5060 = vmatpush3.bf16.msra.mxu1 %v5255_v54 }
0x2779   :  { %5061 = vmatprep.subr.bf16.mxu1 %v5466_v32 }
0x277c   :  { %5062 = vmatpush3.bf16.msra.mxu1 %v5256_v55 }
0x277d   :  { %5075 = vmatprep.subr.bf16.mxu1 %v5466_v32 }
0x2837   :  { %v3192_v39 = vpop.f32.mrf.mxu1 }
0x2838   :  { %3201 = vrot.lane.b32.xlu1 %v3192_v39, %s6921_s2  ;;  %v6586_v39 = vld [vmem:[%s6838_s6] sm:$0xff] }
0x2839   :  { %v5049_v21 = vpop.f32.mrf.mxu1 }
0x283b   :  { %v3195_v10 = vpop.f32.mrf.mxu1 }
0x283c   :  { %3203 = vrot.lane.b32.xlu0 %v3195_v10, %s6921_s2 }
0x283d   :  { %v5050_v23 = vpop.f32.mrf.mxu1 }
0x28aa   :  { %v3202_v44 = vpop.permute.xlu1 %3201 }
0x28ab   :  { %3207 = vst.msk [vmem:[#allocation2] sm:$0xff] %vm1229_vm8, %v3202_v44  ;;  %v6593_v44 = vld [vmem:[%s6838_s6 + $0x8] sm:$0xff] }
0x28ae   :  { %v3204_v31 = vpop.permute.xlu0 %3203 }
0x28af   :  { %3208 = vst.msk [vmem:[#allocation2 + $0x8] sm:$0xff] %vm1229_vm8, %v3204_v31 }
0x28b2   :  { %v3209_v8 = vld [vmem:[#allocation2] sm:$0xff] }
0x28b6   :  { %v3210_v27 = vld [vmem:[#allocation2 + $0x8] sm:$0xff] }
0x28b7   :  { %v3211_v24 = vpack.c.bf16 %v3210_v27, %v3209_v8 }
0x28b9   :  { %5056 = vmatmul.mubr.msk.bf16.vlgmr.msra.gmra.mxu0 %vm293_vm0, %v3211_v24 }
0x28ba   :  { %5068 = vmatpush3.bf16.msra.mxu0 %v5253_v58  ;;  %5071 = vmatprep.mubr.msk.bf16.mxu0 %vm293_vm0, %v5737_v62 }
0x28bb   :  { %5069 = vmatprep.subr.bf16.mxu0 %v5254_v56 }
0x28be   :  { %5070 = vmatpush3.bf16.msra.mxu0 %v5254_v56 }
0x28bf   :  { %5083 = vmatprep.subr.bf16.mxu0 %v5466_v32 }
0x28c1   :  { %5072 = vmatmul.mubr.msk.bf16.vlgmr.msra.gmra.mxu0 %vm293_vm0, %v5763_v30 }
0x28c2   :  { %5087 = vmatprep.mubr.msk.bf16.mxu0 %vm5467_vm2, %v5466_v32 }
0x2979   :  { %v3266_v25 = vpop.f32.mrf.mxu0 }
0x297a   :  { %v6539_v49 = vadd.f32 %v3266_v25, %v6288_v35 }
0x297b   :  { %v5057_v26 = vpop.f32.mrf.mxu0 }
0x297c   :  { %v3275_v29 = vsel %vm293_vm0, %v6539_v49, 0.0 }
0x297d   :  { %3276 = vadd.xlane.f32.xlu1 %v3275_v29  ;;  %v3269_v62 = vpop.f32.mrf.mxu0 }
0x297e   :  { %v6544_v4 = vadd.f32 %v3269_v62, %v6293_v40 }
0x297f   :  { %v5058_v63 = vpop.f32.mrf.mxu0 }
0x2980   :  { %v3278_v30 = vsel %vm293_vm0, %v6544_v4, 0.0 }
0x2981   :  { %3279 = vadd.xlane.f32.xlu0 %v3278_v30  ;;  %v5073_v1 = vpop.f32.mrf.mxu0 }
0x2983   :  { %v3427_v13 = vpop.f32.mrf.mxu0 }
0x2985   :  { %v5074_v37 = vpop.f32.mrf.mxu0 }
0x2986   :  { %v6564_v16 = vpack.c.bf16 %v5074_v37, %v5073_v1 }
0x2987   :  { %v3430_v61 = vpop.f32.mrf.mxu0 }
0x2988   :  { %v3451_v5 = vsel %vm673_vm5, %v6564_v16, 0  ;;  %v6572_v28 = vpack.c.bf16 %v3430_v61, %v3427_v13 }
0x298a   :  { %v3448_v7 = vsel %vm673_vm5, %v6572_v28, 0 }
0x2a06   :  { %v3277_v48 = vpop.xlane.xlu1 %3276 }
0x2a07   :  { %v3281_v38 = vmul.f32 0.03125, %v3277_v48 }
0x2a09   :  { %v3283_v50 = vsub.f32 %v6539_v49, %v3281_v38 }
0x2a0a   :  { %v3280_v35 = vpop.xlane.xlu0 %3279 }
0x2a0b   :  { %v3282_v51 = vmul.f32 0.03125, %v3280_v35  ;;  %v3285_v3 = vmul.f32 %v3283_v50, %v3283_v50 }
0x2a0d   :  { %v3284_v42 = vsub.f32 %v6544_v4, %v3282_v51  ;;  %v3287_v52 = vsel %vm293_vm0, %v3285_v3, 0.0 }
0x2a0e   :  { %3288 = vadd.xlane.f32.xlu0 %v3287_v52 }
0x2a0f   :  { %v3286_v43 = vmul.f32 %v3284_v42, %v3284_v42 }
0x2a11   :  { %v3290_v40 = vsel %vm293_vm0, %v3286_v43, 0.0 }
0x2a12   :  { %3291 = vadd.xlane.f32.xlu0 %v3290_v40 }
0x2a97   :  { %v3289_v36 = vpop.xlane.xlu0 %3288 }
0x2a98   :  { %v3293_v47 = vmul.f32 0.03125, %v3289_v36 }
0x2a9a   :  { %v3295_v12 = vadd.f32 1e-05, %v3293_v47 }
0x2a9b   :  { %v3292_v18 = vpop.xlane.xlu0 %3291 }
0x2a9c   :  { %5395 = vrsqrt.f32 %v3295_v12  ;;  %v3294_v57 = vmul.f32 0.03125, %v3292_v18 }
0x2a9e   :  { %v3296_v59 = vadd.f32 1e-05, %v3294_v57 }
0x2aa0   :  { %5397 = vrsqrt.f32 %v3296_v59 }
0x2aa9   :  { %v5396_v6 = vpop.eup %5395 }
0x2aaa   :  { %v3299_v41 = vmul.f32 %v5396_v6, %v3283_v50 }
0x2aac   :  { %v3305_v46 = vmul.f32 %v3304_v9, %v3299_v41 }
0x2aad   :  { %v5398_v17 = vpop.eup %5397 }
0x2aae   :  { %v3300_v45 = vmul.f32 %v5398_v17, %v3284_v42  ;;  %v3311_v19 = vadd.f32 %v3310_v14, %v3305_v46 }
0x2ab0   :  { %v3306_v15 = vmul.f32 %v3304_v9, %v3300_v45 }
0x2ab2   :  { %v3312_v11 = vadd.f32 %v3310_v14, %v3306_v15 }
0x2ab4   :  { %v3313_v20 = vpack.c.bf16 %v3312_v11, %v3311_v19 }
0x2ab6   :  { %5064 = vmatmul.mubr.msk.bf16.vlgmr.msra.gmra.mxu1 %vm293_vm0, %v3313_v20 }
0x2ab7   :  { %5076 = vmatpush3.bf16.xpose.msra.mxu1 %v3451_v5  ;;  %5079 = vmatprep.mubr.msk.bf16.mxu1 %vm5467_vm2, %v5466_v32 }
0x2ab8   :  { %5077 = vmatprep.subr.bf16.mxu1 %v5466_v32 }
0x2abf   :  { %5078 = vmatpush3.bf16.xpose.msra.mxu1 %v3448_v7 }
0x2ac0   :  { %5099 = vmatprep.subr.bf16.mxu1 %v5466_v32 }
0x2b76   :  { %v3368_v34 = vpop.f32.mrf.mxu1 }
0x2b78   :  { %v5065_v0 = vpop.f32.mrf.mxu1 }
0x2b7a   :  { %v3371_v53 = vpop.f32.mrf.mxu1 }
0x2b7b   :  { %v6577_v2 = vpack.c.bf16 %v3371_v53, %v3368_v34 }
0x2b7c   :  { %v5066_v33 = vpop.f32.mrf.mxu1 }
0x2b7d   :  { %5080 = vmatmul.mubr.msk.bf16.vlgmr.msra.gmra.mxu1 %vm673_vm5, %v6577_v2 }
0x2b7e   :  { %5103 = vmatprep.mubr.msk.bf16.mxu1 %vm5467_vm2, %v5466_v32 }
0x2c3d   :  { %v3487_v60 = vpop.f32.mrf.mxu1 }
0x2c3e   :  { %v3488_v21 = vadd.f32 %v6586_v39, %v3487_v60 }
0x2c3f   :  { %v5081_v58 = vpop.f32.mrf.mxu1 }
0x2c40   :  { %v3494_v10 = vsel %vm293_vm0, %v3488_v21, -inf }
0x2c41   :  { %3495 = vmax.xlane.f32.xlu1 %v3494_v10  ;;  %v3490_v23 = vpop.f32.mrf.mxu1 }
0x2c42   :  { %v3491_v31 = vadd.f32 %v6593_v44, %v3490_v23 }
0x2c43   :  { %v5082_v8 = vpop.f32.mrf.mxu1 }
0x2c44   :  { %v3497_v27 = vsel %vm293_vm0, %v3491_v31, -inf }
0x2c45   :  { %3498 = vmax.xlane.f32.xlu0 %v3497_v27 }
0x2c52   :  { %3521 = vrot.lane.b32.xlu1 %v6564_v16, %s6922_s29 }
0x2cca   :  { %v3496_v24 = vpop.xlane.xlu1 %3495 }
0x2ccb   :  { %v3500_v56 = vsub.f32 %v3488_v21, %v3496_v24 }
0x2ccd   :  { %v3502_v25 = vmul.f32 1.442695, %v3500_v56 }
0x2cce   :  { %v3522_v26 = vpop.permute.xlu1 %3521  ;;  %v3499_v29 = vpop.xlane.xlu0 %3498 }
0x2ccf   :  { %5399 = vpow2.f32 %v3502_v25  ;;  %v3501_v62 = vsub.f32 %v3491_v31, %v3499_v29  ;;  %5084 = vmatpush3.bf16.msra.mxu0 %v3522_v26 }
0x2cd0   :  { %5085 = vmatprep.subr.bf16.mxu0 %v5466_v32 }
0x2cd1   :  { %v3504_v63 = vmul.f32 1.442695, %v3501_v62 }
0x2cd3   :  { %5401 = vpow2.f32 %v3504_v63 }
0x2cdc   :  { %v5400_v30 = vpop.eup %5399 }
0x2cdd   :  { %v3506_v48 = vsel %vm293_vm0, %v5400_v30, 0.0 }
0x2cde   :  { %3507 = vadd.xlane.f32.xlu1 %v3506_v48 }
0x2ce0   :  { %v5402_v38 = vpop.eup %5401 }
0x2ce1   :  { %v3509_v50 = vsel %vm293_vm0, %v5402_v38, 0.0 }
0x2ce2   :  { %3510 = vadd.xlane.f32.xlu0 %v3509_v50 }
0x2cef   :  { %3576 = vrot.lane.b32.xlu1 %v6564_v16, %s6929_s15 }
0x2cf3   :  { %3574 = vrot.lane.b32.xlu1 %v6572_v28, %s6929_s15 }
0x2cf7   :  { %3572 = vrot.lane.b32.xlu1 %v6577_v2, %s6929_s15 }
0x2cf8   :  { %3519 = vrot.lane.b32.xlu0 %v6572_v28, %s6922_s29 }
0x2d67   :  { %v3508_v35 = vpop.xlane.xlu1 %3507 }
0x2d68   :  { %5403 = vrcp.f32 %v3508_v35 }
0x2d6b   :  { %v3511_v51 = vpop.xlane.xlu0 %3510  ;;  %v3577_v54 = vpop.permute.xlu1 %3576 }
0x2d6c   :  { %5405 = vrcp.f32 %v3511_v51  ;;  %v3585_v36 = vsel %vm673_vm5, %v3577_v54, 0 }
0x2d6f   :  { %v3520_v3 = vpop.permute.xlu0 %3519  ;;  %v3575_v47 = vpop.permute.xlu1 %3574 }
0x2d70   :  { %5086 = vmatpush3.bf16.msra.mxu0 %v3520_v3  ;;  %v3582_v12 = vsel %vm673_vm5, %v3575_v47, 0 }
0x2d71   :  { %5091 = vmatprep.subr.bf16.mxu0 %v5466_v32 }
0x2d73   :  { %v3573_v18 = vpop.permute.xlu1 %3572 }
0x2d75   :  { %v5404_v42 = vpop.eup %5403 }
0x2d76   :  { %v3514_v43 = vmul.f32 %v5404_v42, %v5400_v30 }
0x2d79   :  { %v5406_v52 = vpop.eup %5405 }
0x2d7a   :  { %v3515_v40 = vmul.f32 %v5406_v52, %v5402_v38 }
0x2d7c   :  { %v3516_v55 = vpack.c.bf16 %v3515_v40, %v3514_v43 }
0x2d7e   :  { %5088 = vmatmul.mubr.msk.bf16.vlgmr.msra.gmra.mxu0 %vm293_vm0, %v3516_v55 }
0x2d7f   :  { %5092 = vmatpush3.bf16.xpose.msra.mxu0 %v3585_v36  ;;  %5095 = vmatprep.mubr.msk.bf16.mxu0 %vm5467_vm2, %v5466_v32 }
0x2d80   :  { %5093 = vmatprep.subr.bf16.mxu0 %v5466_v32 }
0x2d87   :  { %5094 = vmatpush3.bf16.xpose.msra.mxu0 %v3582_v12 }
0x2d88   :  { %5115 = vmatprep.subr.bf16.mxu0 %v5466_v32 }
0x2d8e   :  { %5096 = vmatmul.mubr.msk.bf16.vlgmr.msra.gmra.mxu0 %vm673_vm5, %v3573_v18 }
0x2d8f   :  { %5119 = vmatprep.mubr.msk.bf16.mxu0 %vm5467_vm2, %v5466_v32 }
0x2e3e   :  { %v3562_v57 = vpop.f32.mrf.mxu0 }
0x2e3f   :  { %3569 = vst.msk [vmem:[#allocation2] sm:$0xff] %vm673_vm5, %v3562_v57 }
0x2e40   :  { %v5089_v59 = vpop.f32.mrf.mxu0 }
0x2e42   :  { %v3565_v1 = vpop.f32.mrf.mxu0 }
0x2e43   :  { %3570 = vst.msk [vmem:[#allocation2 + $0x8] sm:$0xff] %vm673_vm5, %v3565_v1 }
0x2e44   :  { %v5090_v6 = vpop.f32.mrf.mxu0 }
0x2e4e   :  { %v3621_v41 = vpop.f32.mrf.mxu0 }
0x2e4f   :  { %v3622_v9 = vadd.f32 %v6586_v39, %v3621_v41 }
0x2e50   :  { %v5097_v13 = vpop.f32.mrf.mxu0 }
0x2e51   :  { %v3628_v17 = vsel %vm293_vm0, %v3622_v9, -inf }
0x2e52   :  { %3629 = vmax.xlane.f32.xlu0 %v3628_v17  ;;  %v3624_v45 = vpop.f32.mrf.mxu0 }
0x2e53   :  { %v3625_v46 = vadd.f32 %v6593_v44, %v3624_v45 }
0x2e54   :  { %v5098_v14 = vpop.f32.mrf.mxu0 }
0x2e55   :  { %v3631_v37 = vsel %vm293_vm0, %v3625_v46, -inf }
0x2e56   :  { %3632 = vmax.xlane.f32.xlu1 %v3631_v37 }
0x2e67   :  { %3651 = vrot.lane.b32.xlu1 %v6572_v28, %s6914_s4 }
0x2e6b   :  { %3715 = vrot.lane.b32.xlu1 %v6564_v16, %s6915_s7 }
0x2e6f   :  { %3713 = vrot.lane.b32.xlu1 %v6572_v28, %s6915_s7 }
0x2edb   :  { %v3630_v15 = vpop.xlane.xlu0 %3629 }
0x2edc   :  { %v3634_v19 = vsub.f32 %v3622_v9, %v3630_v15 }
0x2ede   :  { %v3636_v11 = vmul.f32 1.442695, %v3634_v19 }
0x2edf   :  { %v3633_v20 = vpop.xlane.xlu1 %3632 }
0x2ee0   :  { %5407 = vpow2.f32 %v3636_v11  ;;  %v3635_v5 = vsub.f32 %v3625_v46, %v3633_v20 }
0x2ee2   :  { %v3638_v61 = vmul.f32 1.442695, %v3635_v5 }
0x2ee3   :  { %v3652_v58 = vpop.permute.xlu1 %3651 }
0x2ee4   :  { %5409 = vpow2.f32 %v3638_v61 }
0x2ee7   :  { %v3716_v27 = vpop.permute.xlu1 %3715 }
0x2ee8   :  { %v3724_v56 = vsel %vm673_vm5, %v3716_v27, 0 }
0x2eeb   :  { %v3714_v25 = vpop.permute.xlu1 %3713 }
0x2eec   :  { %v3721_v26 = vsel %vm673_vm5, %v3714_v25, 0 }
0x2eed   :  { %v5408_v7 = vpop.eup %5407 }
0x2eee   :  { %v3640_v34 = vsel %vm293_vm0, %v5408_v7, 0.0 }
0x2eef   :  { %3641 = vadd.xlane.f32.xlu0 %v3640_v34 }
0x2ef1   :  { %v5410_v0 = vpop.eup %5409 }
0x2ef2   :  { %v3643_v53 = vsel %vm293_vm0, %v5410_v0, 0.0 }
0x2ef3   :  { %3644 = vadd.xlane.f32.xlu0 %v3643_v53 }
0x2f09   :  { %3653 = vrot.lane.b32.xlu0 %v6564_v16, %s6914_s4 }
0x2f0d   :  { %3711 = vrot.lane.b32.xlu0 %v6577_v2, %s6915_s7 }
0x2f78   :  { %v3642_v33 = vpop.xlane.xlu0 %3641 }
0x2f79   :  { %5411 = vrcp.f32 %v3642_v33 }
0x2f7c   :  { %v3645_v60 = vpop.xlane.xlu0 %3644 }
0x2f7d   :  { %5413 = vrcp.f32 %v3645_v60 }
0x2f80   :  { %v3654_v21 = vpop.permute.xlu0 %3653 }
0x2f81   :  { %5100 = vmatpush3.bf16.msra.mxu1 %v3654_v21 }
0x2f82   :  { %5101 = vmatprep.subr.bf16.mxu1 %v5466_v32 }
0x2f84   :  { %v3712_v29 = vpop.permute.xlu0 %3711 }
0x2f85   :  { %5102 = vmatpush3.bf16.msra.mxu1 %v3652_v58 }
0x2f86   :  { %5107 = vmatprep.subr.bf16.mxu1 %v5466_v32  ;;  %v5412_v10 = vpop.eup %5411 }
0x2f87   :  { %v3648_v31 = vmul.f32 %v5412_v10, %v5408_v7 }
0x2f8a   :  { %v5414_v23 = vpop.eup %5413 }
0x2f8b   :  { %v3649_v8 = vmul.f32 %v5414_v23, %v5410_v0 }
0x2f8d   :  { %v3650_v24 = vpack.c.bf16 %v3649_v8, %v3648_v31 }
0x2f8f   :  { %5104 = vmatmul.mubr.msk.bf16.vlgmr.msra.gmra.mxu1 %vm293_vm0, %v3650_v24 }
0x2f90   :  { %5108 = vmatpush3.bf16.xpose.msra.mxu1 %v3724_v56  ;;  %5111 = vmatprep.mubr.msk.bf16.mxu1 %vm5467_vm2, %v5466_v32 }
0x2f91   :  { %5109 = vmatprep.subr.bf16.mxu1 %v5466_v32 }
0x2f98   :  { %5110 = vmatpush3.bf16.xpose.msra.mxu1 %v3721_v26 }
0x2f99   :  { %5131 = vmatprep.subr.bf16.mxu1 %v5466_v32 }
0x2f9f   :  { %5112 = vmatmul.mubr.msk.bf16.vlgmr.msra.gmra.mxu1 %vm673_vm5, %v3712_v29 }
0x2fa0   :  { %5135 = vmatprep.mubr.msk.bf16.mxu1 %vm5467_vm2, %v5466_v32 }
0x304f   :  { %v6651_v62 = vpop.f32.mrf.mxu1 }
0x3051   :  { %v5105_v63 = vpop.f32.mrf.mxu1 }
0x3053   :  { %v6653_v30 = vpop.f32.mrf.mxu1 }
0x3055   :  { %v5106_v48 = vpop.f32.mrf.mxu1 }
0x305f   :  { %v3760_v38 = vpop.f32.mrf.mxu1 }
0x3060   :  { %v3761_v50 = vadd.f32 %v6586_v39, %v3760_v38 }
0x3061   :  { %v5113_v35 = vpop.f32.mrf.mxu1 }
0x3062   :  { %v3767_v51 = vsel %vm293_vm0, %v3761_v50, -inf }
0x3063   :  { %3768 = vmax.xlane.f32.xlu1 %v3767_v51  ;;  %v3763_v3 = vpop.f32.mrf.mxu1 }
0x3064   :  { %v3764_v42 = vadd.f32 %v6593_v44, %v3763_v3 }
0x3065   :  { %v5114_v52 = vpop.f32.mrf.mxu1 }
0x3066   :  { %v3770_v43 = vsel %vm293_vm0, %v3764_v42, -inf }
0x3067   :  { %3771 = vmax.xlane.f32.xlu0 %v3770_v43  ;;  %v5257_v43 = vld [vmem:[%s6839_s13 + $0x18] sm:$0xff]  }
0x3074   :  { %3792 = vrot.lane.b32.xlu1 %v6564_v16, %s6916_s26 }
0x3078   :  { %3854 = vrot.lane.b32.xlu1 %v6564_v16, %s6917_s30 }
0x307c   :  { %3852 = vrot.lane.b32.xlu1 %v6572_v28, %s6917_s30 }
0x3080   :  { %3850 = vrot.lane.b32.xlu1 %v6577_v2, %s6917_s30 }
0x30ec   :  { %v3769_v40 = vpop.xlane.xlu1 %3768 }
0x30ed   :  { %v3773_v54 = vsub.f32 %v3761_v50, %v3769_v40  ;;  %v5258_v40 = vld [vmem:[%s6839_s13 + $0x10] sm:$0xff]  }
0x30ef   :  { %v3775_v55 = vmul.f32 1.442695, %v3773_v54 }
0x30f0   :  { %v3793_v36 = vpop.permute.xlu1 %3792  ;;  %v3772_v47 = vpop.xlane.xlu0 %3771 }
0x30f1   :  { %5415 = vpow2.f32 %v3775_v55  ;;  %v3774_v12 = vsub.f32 %v3764_v42, %v3772_v47  ;;  %5116 = vmatpush3.bf16.msra.mxu0 %v3793_v36 }
0x30f2   :  { %5117 = vmatprep.subr.bf16.mxu0 %v5466_v32 }
0x30f3   :  { %v3777_v18 = vmul.f32 1.442695, %v3774_v12 }
0x30f4   :  { %v3855_v14 = vpop.permute.xlu1 %3854 }
0x30f5   :  { %5417 = vpow2.f32 %v3777_v18  ;;  %v3863_v15 = vsel %vm673_vm5, %v3855_v14, 0 }
0x30f8   :  { %v3853_v19 = vpop.permute.xlu1 %3852 }
0x30f9   :  { %v3860_v11 = vsel %vm673_vm5, %v3853_v19, 0 }
0x30fc   :  { %v3851_v20 = vpop.permute.xlu1 %3850 }
0x30fe   :  { %v5416_v57 = vpop.eup %5415 }
0x30ff   :  { %v3779_v59 = vsel %vm293_vm0, %v5416_v57, 0.0 }
0x3100   :  { %3780 = vadd.xlane.f32.xlu0 %v3779_v59 }
0x3102   :  { %v5418_v1 = vpop.eup %5417 }
0x3103   :  { %v3782_v6 = vsel %vm293_vm0, %v5418_v1, 0.0 }
0x3104   :  { %3783 = vadd.xlane.f32.xlu0 %v3782_v6 }
0x311a   :  { %3790 = vrot.lane.b32.xlu0 %v6572_v28, %s6916_s26 }
0x3189   :  { %v3781_v2 = vpop.xlane.xlu0 %3780 }
0x318a   :  { %5419 = vrcp.f32 %v3781_v2 }
0x318d   :  { %v3784_v41 = vpop.xlane.xlu0 %3783 }
0x318e   :  { %5421 = vrcp.f32 %v3784_v41 }
0x3191   :  { %v3791_v9 = vpop.permute.xlu0 %3790 }
0x3192   :  { %5118 = vmatpush3.bf16.msra.mxu0 %v3791_v9 }
0x3193   :  { %5123 = vmatprep.subr.bf16.mxu0 %v5466_v32 }
0x3197   :  { %v5420_v13 = vpop.eup %5419 }
0x3198   :  { %v3787_v45 = vmul.f32 %v5420_v13, %v5416_v57 }
0x319b   :  { %v5422_v17 = vpop.eup %5421 }
0x319c   :  { %v3788_v46 = vmul.f32 %v5422_v17, %v5418_v1 }
0x319e   :  { %v3789_v37 = vpack.c.bf16 %v3788_v46, %v3787_v45 }
0x31a0   :  { %5120 = vmatmul.mubr.msk.bf16.vlgmr.msra.gmra.mxu0 %vm293_vm0, %v3789_v37 }
0x31a1   :  { %5124 = vmatpush3.bf16.xpose.msra.mxu0 %v3863_v15  ;;  %5127 = vmatprep.mubr.msk.bf16.mxu0 %vm5467_vm2, %v5466_v32 }
0x31a2   :  { %5125 = vmatprep.subr.bf16.mxu0 %v5466_v32 }
0x31a9   :  { %5126 = vmatpush3.bf16.xpose.msra.mxu0 %v3860_v11 }
0x31aa   :  { %5147 = vmatprep.subr.bf16.mxu0 %v5466_v32 }
0x31b0   :  { %5128 = vmatmul.mubr.msk.bf16.vlgmr.msra.gmra.mxu0 %vm673_vm5, %v3851_v20 }
0x31b1   :  { %5151 = vmatprep.mubr.msk.bf16.mxu0 %vm5467_vm2, %v5466_v32 }
0x3260   :  { %v3833_v5 = vpop.f32.mrf.mxu0 }
0x3262   :  { %v5121_v61 = vpop.f32.mrf.mxu0 }
0x3264   :  { %v3836_v7 = vpop.f32.mrf.mxu0 }
0x3266   :  { %v5122_v34 = vpop.f32.mrf.mxu0 }
0x3267   :  { %v5260_v34 = vld [vmem:[%s6840_s16 + $0x10] sm:$0xff]  }
0x3270   :  { %v3899_v0 = vpop.f32.mrf.mxu0 }
0x3271   :  { %v3900_v53 = vadd.f32 %v6586_v39, %v3899_v0  ;;  %v5261_v0 = vld [vmem:[%s6841_s18 + $0x78] sm:$0xff]  }
0x3272   :  { %v5129_v33 = vpop.f32.mrf.mxu0 }
0x3273   :  { %v3906_v60 = vsel %vm293_vm0, %v3900_v53, -inf }
0x3274   :  { %3907 = vmax.xlane.f32.xlu0 %v3906_v60  ;;  %v3902_v21 = vpop.f32.mrf.mxu0 }
0x3275   :  { %v3903_v58 = vadd.f32 %v6593_v44, %v3902_v21 }
0x3276   :  { %v5130_v10 = vpop.f32.mrf.mxu0 }
0x3277   :  { %v3909_v23 = vsel %vm293_vm0, %v3903_v58, -inf }
0x3278   :  { %3910 = vmax.xlane.f32.xlu1 %v3909_v23 }
0x3289   :  { %3929 = vrot.lane.b32.xlu1 %v6572_v28, %s6918_s1 }
0x328d   :  { %3703 = vrot.lane.b32.xlu1 %v6651_v62, %s6919_s25 }
0x3291   :  { %3705 = vrot.lane.b32.xlu1 %v6653_v30, %s6919_s25  ;;  %s6936_s25 = sld [smem:[#allocation12_spill]] }
0x3295   :  { %3844 = vrot.lane.b32.xlu1 %v3836_v7, %s6920_s27  ;;  %v5259_v7 = vld [vmem:[%s6840_s16 + $0x18] sm:$0xff]   ;;  %s6937_s16 = sld [smem:[#allocation13_spill]] }
0x3296   :  { %5148 = vmatpush3.bf16.msra.mxu0 %v5259_v7 }
0x3297   :  { %5149 = vmatprep.subr.bf16.mxu0 %v5466_v32 }
0x329a   :  { %5150 = vmatpush3.bf16.msra.mxu0 %v5260_v34 }
0x329b   :  { %5175 = vmatprep.subr.bf16.mxu0 %v5466_v32 }
0x32fd   :  { %v3908_v39 = vpop.xlane.xlu0 %3907 }
0x32fe   :  { %v3912_v31 = vsub.f32 %v3900_v53, %v3908_v39 }
0x3300   :  { %v3914_v8 = vmul.f32 1.442695, %v3912_v31  ;;  %v5463_v31 = vld [vmem:[%s6912_s9 + $0x4] sm:$0x7] }
0x3301   :  { %v3911_v27 = vpop.xlane.xlu1 %3910 }
0x3302   :  { %5423 = vpow2.f32 %v3914_v8  ;;  %v3913_v44 = vsub.f32 %v3903_v58, %v3911_v27  ;;  %v4084_v8 = vrot.slane %v5463_v31, %v6238_v22 }
0x3304   :  { %v3916_v24 = vmul.f32 1.442695, %v3913_v44 }
0x3305   :  { %v3930_v56 = vpop.permute.xlu1 %3929 }
0x3306   :  { %5425 = vpow2.f32 %v3916_v24 }
0x3309   :  { %v3704_v25 = vpop.permute.xlu1 %3703 }
0x330a   :  { %3709 = vst.msk [vmem:[#allocation2] sm:$0xff] %vm859_vm6, %v3704_v25 }
0x330d   :  { %v3706_v28 = vpop.permute.xlu1 %3705 }
0x330e   :  { %3710 = vst.msk [vmem:[#allocation2 + $0x8] sm:$0xff] %vm859_vm6, %v3706_v28 }
0x330f   :  { %v5424_v26 = vpop.eup %5423 }
0x3310   :  { %v3918_v29 = vsel %vm293_vm0, %v5424_v26, 0.0 }
0x3311   :  { %3919 = vadd.xlane.f32.xlu0 %v3918_v29  ;;  %v3845_v62 = vpop.permute.xlu1 %3844 }
0x3312   :  { %3849 = vst.msk [vmem:[#allocation2 + $0x8] sm:$0xff] %vm1044_vm7, %v3845_v62 }
0x3313   :  { %v5426_v63 = vpop.eup %5425 }
0x3314   :  { %v3921_v30 = vsel %vm293_vm0, %v5426_v63, 0.0 }
0x3315   :  { %3922 = vadd.xlane.f32.xlu0 %v3921_v30  ;;  %v5264_v30 = vld [vmem:[%s6841_s18 + $0x60] sm:$0xff]  }
0x332b   :  { %3931 = vrot.lane.b32.xlu0 %v6564_v16, %s6918_s1 }
0x332f   :  { %3842 = vrot.lane.b32.xlu0 %v3833_v5, %s6920_s27 }
0x339a   :  { %v3920_v48 = vpop.xlane.xlu0 %3919 }
0x339b   :  { %5427 = vrcp.f32 %v3920_v48  ;;  %v5265_v48 = vld [vmem:[%s6841_s18 + $0x58] sm:$0xff]  }
0x339e   :  { %v3923_v38 = vpop.xlane.xlu0 %3922 }
0x339f   :  { %5429 = vrcp.f32 %v3923_v38  ;;  %v5266_v38 = vld [vmem:[%s6841_s18 + $0x50] sm:$0xff]  }
0x33a2   :  { %v3932_v50 = vpop.permute.xlu0 %3931 }
0x33a3   :  { %5132 = vmatpush3.bf16.msra.mxu1 %v3932_v50  ;;  %v5267_v50 = vld [vmem:[%s6841_s18 + $0x48] sm:$0xff]  }
0x33a4   :  { %5133 = vmatprep.subr.bf16.mxu1 %v5466_v32 }
0x33a6   :  { %v3843_v35 = vpop.permute.xlu0 %3842 }
0x33a7   :  { %3848 = vst.msk [vmem:[#allocation2] sm:$0xff] %vm1044_vm7, %v3843_v35  ;;  %5134 = vmatpush3.bf16.msra.mxu1 %v3930_v56  ;;  %v5464_v56 = vld [vmem:[%s6913_s8 + $0x4] sm:$0x7] }
0x33a8   :  { %5139 = vmatprep.subr.bf16.mxu1 %v5466_v32  ;;  %v5428_v51 = vpop.eup %5427  ;;  %v4090_v25 = vrot.slane %v5464_v56, %v6238_v22  ;;  %v5263_v22 = vld [vmem:[%s6841_s18 + $0x68] sm:$0xff]   ;;  %v5268_v35 = vld [vmem:[%s6841_s18 + $0x40] sm:$0xff]  }
0x33a9   :  { %v3926_v42 = vmul.f32 %v5428_v51, %v5424_v26  ;;  %v4576_v51 = vld [vmem:[%s6842_s17 + $0x1] ss:$0 sm:$0xff] }
0x33ac   :  { %v5430_v3 = vpop.eup %5429 }
0x33ad   :  { %v3927_v16 = vmul.f32 %v5430_v3, %v5426_v63  ;;  %v5262_v63 = vld [vmem:[%s6841_s18 + $0x70] sm:$0xff]  }
0x33af   :  { %v3928_v52 = vpack.c.bf16 %v3927_v16, %v3926_v42 }
0x33b1   :  { %5136 = vmatmul.mubr.msk.bf16.vlgmr.msra.gmra.mxu1 %vm293_vm0, %v3928_v52 }
0x33b2   :  { %5143 = vmatprep.mubr.msk.bf16.mxu1 %vm5467_vm2, %v5466_v32  ;;  %5140 = vmatpush3.bf16.msra.mxu1 %v5257_v43 }
0x33b3   :  { %5141 = vmatprep.subr.bf16.mxu1 %v5466_v32 }
0x33b6   :  { %5142 = vmatpush3.bf16.msra.mxu1 %v5258_v40 }
0x33b7   :  { %5155 = vmatprep.subr.bf16.mxu1 %v5466_v32 }
0x3471   :  { %v3972_v54 = vpop.f32.mrf.mxu1 }
0x3472   :  { %3981 = vrot.lane.b32.xlu0 %v3972_v54, %s6921_s2 }
0x3473   :  { %v5137_v55 = vpop.f32.mrf.mxu1 }
0x3475   :  { %v3975_v36 = vpop.f32.mrf.mxu1 }
0x3476   :  { %3983 = vrot.lane.b32.xlu1 %v3975_v36, %s6921_s2 }
0x3477   :  { %v5138_v47 = vpop.f32.mrf.mxu1 }
0x34e4   :  { %v3982_v12 = vpop.permute.xlu0 %3981 }
0x34e5   :  { %3987 = vst.msk [vmem:[#allocation2] sm:$0xff] %vm1229_vm8, %v3982_v12 }
0x34e8   :  { %v3984_v18 = vpop.permute.xlu1 %3983 }
0x34e9   :  { %3988 = vst.msk [vmem:[#allocation2 + $0x8] sm:$0xff] %vm1229_vm8, %v3984_v18 }
0x34ec   :  { %v3989_v57 = vld [vmem:[#allocation2] sm:$0xff] }
0x34f0   :  { %v3990_v59 = vld [vmem:[#allocation2 + $0x8] sm:$0xff] }
0x34f1   :  { %v3991_v1 = vpack.c.bf16 %v3990_v59, %v3989_v57 }
0x34f3   :  { %5144 = vmatmul.mubr.msk.bf16.vlgmr.msra.gmra.mxu1 %vm293_vm0, %v3991_v1 }
0x34f4   :  { %5171 = vmatprep.mubr.msk.bf16.mxu1 %vm5467_vm2, %v5466_v32  ;;  %5156 = vmatpush3.bf16.msra.mxu1 %v5261_v0 }
0x34f5   :  { %5157 = vmatprep.subr.bf16.mxu1 %v5466_v32 }
0x34f8   :  { %5158 = vmatpush3.bf16.msra.mxu1 %v5262_v63 }
0x34f9   :  { %5159 = vmatprep.subr.bf16.mxu1 %v5466_v32 }
0x34fc   :  { %5160 = vmatpush3.bf16.msra.mxu1 %v5263_v22  ;;  %v4608_v22 = vld [vmem:[%s6938_s23] ss:$0 sm:$0xff] }
0x34fd   :  { %5161 = vmatprep.subr.bf16.mxu1 %v5466_v32 }
0x3500   :  { %5162 = vmatpush3.bf16.msra.mxu1 %v5264_v30 }
0x3501   :  { %5163 = vmatprep.subr.bf16.mxu1 %v5466_v32 }
0x3504   :  { %5164 = vmatpush3.bf16.msra.mxu1 %v5265_v48 }
0x3505   :  { %5165 = vmatprep.subr.bf16.mxu1 %v5466_v32 }
0x3508   :  { %5166 = vmatpush3.bf16.msra.mxu1 %v5266_v38 }
0x3509   :  { %5167 = vmatprep.subr.bf16.mxu1 %v5466_v32 }
0x350c   :  { %5168 = vmatpush3.bf16.msra.mxu1 %v5267_v50 }
0x350d   :  { %5169 = vmatprep.subr.bf16.mxu1 %v5466_v32 }
0x3510   :  { %5170 = vmatpush3.bf16.msra.mxu1 %v5268_v35 }
0x35b3   :  { %v4046_v6 = vpop.f32.mrf.mxu1 }
0x35b4   :  { %v6724_v2 = vadd.f32 %v4046_v6, %v6539_v49 }
0x35b5   :  { %v5145_v41 = vpop.f32.mrf.mxu1 }
0x35b6   :  { %v4055_v9 = vsel %vm293_vm0, %v6724_v2, 0.0 }
0x35b7   :  { %4056 = vadd.xlane.f32.xlu0 %v4055_v9  ;;  %v4049_v13 = vpop.f32.mrf.mxu1 }
0x35b8   :  { %v6729_v17 = vadd.f32 %v4049_v13, %v6544_v4  ;;  %v4605_v13 = vld [vmem:[%s6843_s19 + $0x1] ss:$0 sm:$0xff] }
0x35b9   :  { %v5146_v45 = vpop.f32.mrf.mxu1 }
0x35ba   :  { %v4058_v46 = vsel %vm293_vm0, %v6729_v17, 0.0 }
0x35bb   :  { %4059 = vadd.xlane.f32.xlu1 %v4058_v46 }
0x3640   :  { %v4057_v14 = vpop.xlane.xlu0 %4056 }
0x3641   :  { %v4061_v37 = vmul.f32 0.03125, %v4057_v14 }
0x3643   :  { %v4063_v15 = vsub.f32 %v6724_v2, %v4061_v37 }
0x3644   :  { %v4060_v49 = vpop.xlane.xlu1 %4059 }
0x3645   :  { %v4062_v19 = vmul.f32 0.03125, %v4060_v49  ;;  %v4065_v11 = vmul.f32 %v4063_v15, %v4063_v15 }
0x3647   :  { %v4064_v20 = vsub.f32 %v6729_v17, %v4062_v19  ;;  %v4067_v5 = vsel %vm293_vm0, %v4065_v11, 0.0 }
0x3648   :  { %4068 = vadd.xlane.f32.xlu0 %v4067_v5 }
0x3649   :  { %v4066_v61 = vmul.f32 %v4064_v20, %v4064_v20 }
0x364b   :  { %v4070_v4 = vsel %vm293_vm0, %v4066_v61, 0.0 }
0x364c   :  { %4071 = vadd.xlane.f32.xlu0 %v4070_v4 }
0x36d1   :  { %v4069_v53 = vpop.xlane.xlu0 %4068 }
0x36d2   :  { %v4073_v33 = vmul.f32 0.03125, %v4069_v53 }
0x36d4   :  { %v4075_v60 = vadd.f32 1e-05, %v4073_v33 }
0x36d5   :  { %v4072_v21 = vpop.xlane.xlu0 %4071 }
0x36d6   :  { %5431 = vrsqrt.f32 %v4075_v60  ;;  %v4074_v58 = vmul.f32 0.03125, %v4072_v21  ;;  %v5269_v60 = vld [vmem:[%s6844_s22 + $0x8] sm:$0xff]   ;;  %v5270_v21 = vld [vmem:[%s6844_s22] sm:$0xff]  }
0x36d8   :  { %v4076_v10 = vadd.f32 1e-05, %v4074_v58 }
0x36da   :  { %5433 = vrsqrt.f32 %v4076_v10 }
0x36e3   :  { %v5432_v23 = vpop.eup %5431 }
0x36e4   :  { %v4079_v39 = vmul.f32 %v5432_v23, %v4063_v15 }
0x36e6   :  { %v4085_v24 = vmul.f32 %v4084_v8, %v4079_v39 }
0x36e7   :  { %v5434_v27 = vpop.eup %5433 }
0x36e8   :  { %v4080_v44 = vmul.f32 %v5434_v27, %v4064_v20  ;;  %v4091_v26 = vadd.f32 %v4090_v25, %v4085_v24  ;;  %v4606_v24 = vld [vmem:[%s6936_s25] ss:$0 sm:$0xff] }
0x36ea   :  { %v4086_v28 = vmul.f32 %v4084_v8, %v4080_v44 }
0x36ec   :  { %v4092_v29 = vadd.f32 %v4090_v25, %v4086_v28  ;;  %v4607_v28 = vld [vmem:[%s6937_s16] ss:$0 sm:$0xff] }
0x36ee   :  { %v4093_v62 = vpack.c.bf16 %v4092_v29, %v4091_v26 }
0x36f0   :  { %5152 = vmatmul.mubr.msk.bf16.vlgmr.msra.gmra.mxu0 %vm293_vm0, %v4093_v62 }
0x36f1   :  { %5179 = vmatprep.mubr.msk.bf16.mxu0 %vm5467_vm2, %v5466_v32  ;;  %5176 = vmatpush3.bf16.msra.mxu0 %v5269_v60 }
0x36f2   :  { %5177 = vmatprep.subr.bf16.mxu0 %v5466_v32 }
0x36f5   :  { %5178 = vmatpush3.bf16.msra.mxu0 %v5270_v21 }
0x37b0   :  { %v4156_v3 = vpop.f32.mrf.mxu0 }
0x37b1   :  { %v4157_v42 = vadd.f32 %v4576_v51, %v4156_v3 }
0x37b2   :  { %v5153_v16 = vpop.f32.mrf.mxu0 }
0x37b3   :  { %v4165_v52 = vmul.f32 0.70710677, %v4157_v42  ;;  %v4163_v18 = vmul.f32 0.5, %v4157_v42 }
0x37b4   :  { %v4159_v43 = vpop.f32.mrf.mxu0 }
0x37b5   :  { %5435 = verf.f32 %v4165_v52  ;;  %v4160_v40 = vadd.f32 %v4576_v51, %v4159_v43 }
0x37b6   :  { %v5154_v54 = vpop.f32.mrf.mxu0 }
0x37b7   :  { %v4166_v55 = vmul.f32 0.70710677, %v4160_v40  ;;  %v4164_v57 = vmul.f32 0.5, %v4160_v40 }
0x37b9   :  { %5437 = verf.f32 %v4166_v55 }
0x37c2   :  { %v5436_v36 = vpop.eup %5435 }
0x37c3   :  { %v4169_v47 = vadd.f32 1.0, %v5436_v36 }
0x37c5   :  { %v4171_v1 = vmul.f32 %v4169_v47, %v4163_v18 }
0x37c6   :  { %v5438_v12 = vpop.eup %5437 }
0x37c7   :  { %v4170_v59 = vadd.f32 1.0, %v5438_v12 }
0x37c9   :  { %v4172_v6 = vmul.f32 %v4170_v59, %v4164_v57 }
0x37cb   :  { %v4173_v41 = vpack.c.bf16 %v4172_v6, %v4171_v1  ;;  %v4424_v6 = vld [vmem:[%s6939_s10] sm:$0xff] }
0x37cd   :  { %5172 = vmatmul.mubr.bf16.vlgmr.msra.gmra.mxu1 %v4173_v41  ;;  %v4425_v41 = vld [vmem:[%s6939_s10 + $0x8] sm:$0xff] }
0x388d   :  { %v4273_v9 = vpop.f32.mrf.mxu1 }
0x388e   :  { %v4280_v45 = vadd.f32 %v4273_v9, %v6724_v2 }
0x388f   :  { %v5173_v46 = vpop.f32.mrf.mxu1 }
0x3890   :  { %v4290_v14 = vadd.f32 %v4605_v13, %v4280_v45 }
0x3891   :  { %v4276_v37 = vpop.f32.mrf.mxu1 }
0x3892   :  { %v4281_v15 = vadd.f32 %v4276_v37, %v6729_v17  ;;  %v4294_v49 = vsel %vm293_vm0, %v4290_v14, 0.0 }
0x3893   :  { %4295 = vadd.xlane.f32.xlu0 %v4294_v49  ;;  %v5174_v19 = vpop.f32.mrf.mxu1 }
0x3894   :  { %v4291_v11 = vadd.f32 %v4605_v13, %v4281_v15 }
0x3896   :  { %v4297_v20 = vsel %vm293_vm0, %v4291_v11, 0.0 }
0x3897   :  { %4298 = vadd.xlane.f32.xlu1 %v4297_v20 }
0x391c   :  { %v4296_v5 = vpop.xlane.xlu0 %4295 }
0x391d   :  { %v4300_v61 = vmul.f32 0.03125, %v4296_v5 }
0x391f   :  { %v4302_v4 = vsub.f32 %v4290_v14, %v4300_v61 }
0x3920   :  { %v4299_v7 = vpop.xlane.xlu1 %4298 }
0x3921   :  { %v4301_v34 = vmul.f32 0.03125, %v4299_v7  ;;  %v4304_v0 = vmul.f32 %v4302_v4, %v4302_v4 }
0x3923   :  { %v4303_v2 = vsub.f32 %v4291_v11, %v4301_v34  ;;  %v4306_v53 = vsel %vm293_vm0, %v4304_v0, 0.0 }
0x3924   :  { %4307 = vadd.xlane.f32.xlu0 %v4306_v53 }
0x3925   :  { %v4305_v33 = vmul.f32 %v4303_v2, %v4303_v2 }
0x3927   :  { %v4309_v17 = vsel %vm293_vm0, %v4305_v33, 0.0 }
0x3928   :  { %4310 = vadd.xlane.f32.xlu1 %v4309_v17 }
0x39ad   :  { %v4308_v58 = vpop.xlane.xlu0 %4307 }
0x39ae   :  { %v4312_v10 = vmul.f32 0.03125, %v4308_v58 }
0x39b0   :  { %v4314_v23 = vadd.f32 1e-05, %v4312_v10 }
0x39b1   :  { %v4311_v39 = vpop.xlane.xlu1 %4310 }
0x39b2   :  { %5439 = vrsqrt.f32 %v4314_v23  ;;  %v4313_v31 = vmul.f32 0.03125, %v4311_v39 }
0x39b4   :  { %v4315_v8 = vadd.f32 1e-05, %v4313_v31 }
0x39b6   :  { %5441 = vrsqrt.f32 %v4315_v8 }
0x39bf   :  { %v5440_v27 = vpop.eup %5439 }
0x39c0   :  { %v4318_v44 = vmul.f32 %v5440_v27, %v4302_v4 }
0x39c2   :  { %v4326_v56 = vmul.f32 %v4606_v24, %v4318_v44 }
0x39c3   :  { %v5442_v32 = vpop.eup %5441 }
0x39c4   :  { %v4319_v25 = vmul.f32 %v5442_v32, %v4303_v2  ;;  %v4334_v29 = vadd.f32 %v4607_v28, %v4326_v56 }
0x39c6   :  { %v4327_v26 = vmul.f32 %v4606_v24, %v4319_v25 }
0x39c8   :  { %v4335_v62 = vadd.f32 %v4607_v28, %v4327_v26 }
0x39ca   :  { %v4336_v63 = vpack.c.bf16 %v4335_v62, %v4334_v29 }
0x39cc   :  { %5180 = vmatmul.mubr.msk.bf16.vlgmr.msra.gmra.mxu0 %vm293_vm0, %v4336_v63 }
0x3a8c   :  { %v4397_v30 = vpop.f32.mrf.mxu0 }
0x3a8d   :  { %v4398_v48 = vadd.f32 %v4608_v22, %v4397_v30 }
0x3a8e   :  { %v5181_v38 = vpop.f32.mrf.mxu0 }
0x3a8f   :  { %4404 = vmax.xlane.f32.xlu0 %v4398_v48 }
0x3a90   :  { %v4400_v50 = vpop.f32.mrf.mxu0 }
0x3a91   :  { %v4401_v35 = vadd.f32 %v4608_v22, %v4400_v50 }
0x3a92   :  { %v5182_v51 = vpop.f32.mrf.mxu0 }
0x3a93   :  { %4406 = vmax.xlane.f32.xlu1 %v4401_v35 }
0x3b18   :  { %v4405_v3 = vpop.xlane.xlu0 %4404 }
0x3b19   :  { %v4408_v42 = vsub.f32 %v4398_v48, %v4405_v3 }
0x3b1b   :  { %v4410_v16 = vmul.f32 1.442695, %v4408_v42 }
0x3b1c   :  { %v4407_v52 = vpop.xlane.xlu1 %4406 }
0x3b1d   :  { %5443 = vpow2.f32 %v4410_v16  ;;  %v4409_v43 = vsub.f32 %v4401_v35, %v4407_v52 }
0x3b1f   :  { %v4412_v40 = vmul.f32 1.442695, %v4409_v43 }
0x3b21   :  { %5445 = vpow2.f32 %v4412_v40 }
0x3b2a   :  { %v5444_v54 = vpop.eup %5443 }
0x3b2b   :  { %4414 = vadd.xlane.f32.xlu0 %v5444_v54 }
0x3b2e   :  { %v5446_v55 = vpop.eup %5445 }
0x3b2f   :  { %4416 = vadd.xlane.f32.xlu1 %v5446_v55 }
0x3bb4   :  { %v4415_v36 = vpop.xlane.xlu0 %4414 }
0x3bb5   :  { %5447 = vlog2.f32 %v4415_v36 }
0x3bb8   :  { %v4417_v47 = vpop.xlane.xlu1 %4416 }
0x3bb9   :  { %5449 = vlog2.f32 %v4417_v47 }
0x3bc2   :  { %v5448_v12 = vpop.eup %5447 }
0x3bc3   :  { %v4419_v18 = vmul.f32 0.6931472, %v5448_v12 }
0x3bc5   :  { %v4422_v59 = vsub.f32 %v4408_v42, %v4419_v18 }
0x3bc6   :  { %v5450_v57 = vpop.eup %5449 }
0x3bc7   :  { %v4421_v1 = vmul.f32 0.6931472, %v5450_v57  ;;  %v4426_v13 = vmul.f32 %v4424_v6, %v4422_v59 }
0x3bc9   :  { %v4423_v9 = vsub.f32 %v4409_v43, %v4421_v1 }
0x3bcb   :  { %v4427_v45 = vmul.f32 %v4425_v41, %v4423_v9 }
0x3bcd   :  { %v4428_v46 = vadd.f32 %v4427_v45, %v4426_v13 }
0x3bcf   :  { %4429 = vadd.xlane.f32.xlu0 %v4428_v46 }
0x3c58   :  { %v4430_v14 = vpop.xlane.xlu0 %4429 }
0x3c59   :  { %v4431_v37 = vrot.slane %v4430_v14, 4 }
0x3c5b   :  { %v4432_v15 = vadd.f32 %v4431_v37, %v4430_v14 }
0x3c5d   :  { %v4433_v49 = vrot.slane %v4432_v15, 2 }
0x3c5f   :  { %v4434_v19 = vadd.f32 %v4433_v49, %v4432_v15 }
0x3c61   :  { %v4435_v11 = vrot.slane %v4434_v19, 1 }
0x3c63   :  { %v4436_v20 = vadd.f32 %v4435_v11, %v4434_v19 }
0x3c65   :  { %5183 = vpush %v4436_v20 }
0x3c96   :  { %s5184_s12 = spop %5183 }
0x3c97   :  { %s4438_s28 = ssub.f32 0.0, %s5184_s12 }
0x3c99   :  { %v4439_v5 = vstv %s4438_s28 }
0x3c9a   :  { %4440 = vst [vmem:[%s6940_s11] sm:$0x1] %v4439_v5 }

</bundles_post_ra>
